<compile_context>
chip_gen: v7x
topology: tpu7x:2x2x1
jax: 0.10.0
libtpu: 0.0.40
codegen_flags: <defaults>
</compile_context>

<pallas_src>
import functools

import jax
import jax.numpy as jnp
from jax.experimental import pallas as pl
from jax.experimental.pallas import tpu as pltpu


# ---------------------------------------------------------------------------
# Fused conv3x3 + BN(eval) + ReLU + maxpool2x2 kernel
# ---------------------------------------------------------------------------
def _conv_pool_kernel(xe_ref, xo_ref, w_ref, scale_ref, bias_ref, o_ref, *,
                      wo2, cin):
    """One grid step computes one pooled output row for one image.

    xe_ref / xo_ref : (1, Hp, We, Cin) / (1, Hp, Wod, Cin)  even / odd padded
                      input columns (f32, resident in VMEM).
    w_ref           : (9*Cin, Cout)  im2col-flattened conv weight (bf16, or f32
                      when Cin == 1).
    scale_ref/bias  : (1, Cout) folded BatchNorm scale / bias (f32).
    o_ref           : (1, 1, Wo2, Cout) pooled output row.
    """
    q = pl.program_id(1)

    # The pooled row q needs conv rows 2q, 2q+1 -> padded input rows 2q .. 2q+3.
    rows_e = [xe_ref[0, 2 * q + t, :, :] for t in range(4)]
    rows_o = [xo_ref[0, 2 * q + t, :, :] for t in range(4)]

    def tap_pieces(rr, parity):
        # conv output element (row 2q+rr, col 2p+parity) needs, for tap (di, dj),
        # padded input col 2p+parity+dj:
        #   parity 0 (even cols): dj=0 -> e[p], dj=1 -> o[p], dj=2 -> e[p+1]
        #   parity 1 (odd  cols): dj=0 -> o[p], dj=1 -> e[p+1], dj=2 -> o[p+1]
        pieces = []
        for di in range(3):
            er, orow = rows_e[rr + di], rows_o[rr + di]
            ee, e1 = er[0:wo2, :], er[1:wo2 + 1, :]
            oo, o1 = orow[0:wo2, :], orow[1:wo2 + 1, :]
            pieces += ([ee, oo, e1] if parity == 0 else [oo, e1, o1])
        return pieces  # 9 pieces, each (wo2, cin)

    scale = scale_ref[...]
    bias = bias_ref[...]
    blocks = [tap_pieces(rr, par) for rr in range(2) for par in range(2)]

    if cin == 1:
        # conv1: K = 9 is far too small for the MXU -> 9 broadcast multiply-adds
        # on the VPU per phase (feedback item).
        w = w_ref[...].astype(jnp.float32)               # (9, Cout)
        outs = []
        for pieces in blocks:
            acc = pieces[0] * w[0:1, :]
            for t in range(1, 9):
                acc = acc + pieces[t] * w[t:t + 1, :]
            outs.append(jnp.maximum(acc * scale + bias, 0.0))
    else:
        # In-kernel im2col for the four (row, column-parity) phases of this
        # pooled row, then a single bf16 MXU matmul with f32 accumulation.
        xmat = jnp.concatenate(
            [jnp.concatenate(pieces, axis=-1) for pieces in blocks], axis=0)
        acc = jnp.dot(xmat.astype(jnp.bfloat16), w_ref[...],
                      preferred_element_type=jnp.float32)  # (4*wo2, Cout)
        y = jnp.maximum(acc * scale + bias, 0.0)
        outs = [y[k * wo2:(k + 1) * wo2, :] for k in range(4)]

    # 2x2 max-pool == elementwise max of the four phases.
    pooled = jnp.maximum(jnp.maximum(outs[0], outs[1]),
                         jnp.maximum(outs[2], outs[3]))
    o_ref[0, 0, :, :] = pooled.astype(o_ref.dtype)


def conv_bn_relu_pool(x, wmat, scale, bias, *, pad):
    """x: (B, H, W, Cin) NHWC f32 -> (B, Ho//2, Wo//2, Cout)."""
    B, H, W, Cin = x.shape
    Cout = wmat.shape[1]
    Hp, Wp = H + 2 * pad, W + 2 * pad
    Ho, Wo = Hp - 2, Wp - 2
    Ho2, Wo2 = Ho // 2, Wo // 2

    if pad:
        x = jnp.pad(x, ((0, 0), (pad, pad), (pad, pad), (0, 0)))
    # Even / odd column planes of the padded input (cheap 1x-sized XLA split);
    # everything downstream is unit-stride inside the kernel.
    xe = x[:, :, 0::2, :]
    xo = x[:, :, 1::2, :]
    We, Wod = xe.shape[2], xo.shape[2]

    kernel = functools.partial(_conv_pool_kernel, wo2=Wo2, cin=Cin)
    return pl.pallas_call(
        kernel,
        out_shape=jax.ShapeDtypeStruct((B, Ho2, Wo2, Cout), jnp.float32),
        grid=(B, Ho2),
        in_specs=[
            pl.BlockSpec((1, Hp, We, Cin), lambda b, q: (b, 0, 0, 0)),
            pl.BlockSpec((1, Hp, Wod, Cin), lambda b, q: (b, 0, 0, 0)),
            pl.BlockSpec((9 * Cin, Cout), lambda b, q: (0, 0)),
            pl.BlockSpec((1, Cout), lambda b, q: (0, 0)),
            pl.BlockSpec((1, Cout), lambda b, q: (0, 0)),
        ],
        out_specs=pl.BlockSpec((1, 1, Wo2, Cout), lambda b, q: (b, q, 0, 0)),
        compiler_params=pltpu.CompilerParams(
            dimension_semantics=("parallel", "parallel")),
    )(xe, xo, wmat, scale, bias)


# ---------------------------------------------------------------------------
# Fused fc1 + ReLU + fc2 + log_softmax head
# ---------------------------------------------------------------------------
def _fc_head_kernel(x_ref, w1_ref, b1_ref, w2_ref, b2_ref, o_ref):
    x = x_ref[...].astype(jnp.bfloat16)
    h = jnp.dot(x, w1_ref[...], preferred_element_type=jnp.float32)
    h = jnp.maximum(h + b1_ref[...], 0.0)
    logits = jnp.dot(h.astype(jnp.bfloat16), w2_ref[...],
                     preferred_element_type=jnp.float32) + b2_ref[...]
    m = jnp.max(logits, axis=-1, keepdims=True)
    lse = jnp.log(jnp.sum(jnp.exp(logits - m), axis=-1, keepdims=True)) + m
    o_ref[...] = (logits - lse).astype(o_ref.dtype)


def fc_head(x, w1, b1, w2, b2):
    B, K = x.shape
    H = w1.shape[1]
    N = w2.shape[1]
    tb = B if B <= 256 else 256
    return pl.pallas_call(
        _fc_head_kernel,
        out_shape=jax.ShapeDtypeStruct((B, N), jnp.float32),
        grid=(pl.cdiv(B, tb),),
        in_specs=[
            pl.BlockSpec((tb, K), lambda i: (i, 0)),
            pl.BlockSpec((K, H), lambda i: (0, 0)),
            pl.BlockSpec((1, H), lambda i: (0, 0)),
            pl.BlockSpec((H, N), lambda i: (0, 0)),
            pl.BlockSpec((1, N), lambda i: (0, 0)),
        ],
        out_specs=pl.BlockSpec((tb, N), lambda i: (i, 0)),
        compiler_params=pltpu.CompilerParams(dimension_semantics=("parallel",)),
    )(x, w1, b1, w2, b2)


# ---------------------------------------------------------------------------
# Parameters (torch layout) + one-time preparation (hoisted out of forward)
# ---------------------------------------------------------------------------
def init_params(key, num_classes):
    ks = jax.random.split(key, 24)

    def conv_w(k, cout, cin, kh, kw):
        fan_in = cin * kh * kw
        return jax.random.normal(k, (cout, cin, kh, kw), jnp.float32) * (2.0 / fan_in) ** 0.5

    def lin_w(k, out_f, in_f):
        return jax.random.normal(k, (out_f, in_f), jnp.float32) * (1.0 / in_f) ** 0.5

    def bn(kg, kb, km, kv, c):
        return (1.0 + 0.1 * jax.random.normal(kg, (c,), jnp.float32),   # gamma
                0.1 * jax.random.normal(kb, (c,), jnp.float32),         # beta
                0.1 * jax.random.normal(km, (c,), jnp.float32),         # running_mean
                1.0 + 0.1 * jax.random.uniform(kv, (c,), jnp.float32))  # running_var

    p = {}
    p['conv1_w'] = conv_w(ks[0], 64, 1, 3, 3)
    p['conv1_b'] = 0.1 * jax.random.normal(ks[1], (64,), jnp.float32)
    p['bn1_g'], p['bn1_b'], p['bn1_m'], p['bn1_v'] = bn(ks[2], ks[3], ks[4], ks[5], 64)
    p['conv2_w'] = conv_w(ks[6], 128, 64, 3, 3)
    p['conv2_b'] = 0.1 * jax.random.normal(ks[7], (128,), jnp.float32)
    p['bn2_g'], p['bn2_b'], p['bn2_m'], p['bn2_v'] = bn(ks[8], ks[9], ks[10], ks[11], 128)
    p['conv3_w'] = conv_w(ks[12], 128, 128, 3, 3)
    p['conv3_b'] = 0.1 * jax.random.normal(ks[13], (128,), jnp.float32)
    p['bn3_g'], p['bn3_b'], p['bn3_m'], p['bn3_v'] = bn(ks[14], ks[15], ks[16], ks[17], 128)
    p['fc1_w'] = lin_w(ks[18], 256, 2 * 2 * 128)          # torch layout (out, in)
    p['fc1_b'] = 0.1 * jax.random.normal(ks[19], (256,), jnp.float32)
    p['fc2_w'] = lin_w(ks[20], num_classes, 256)
    p['fc2_b'] = 0.1 * jax.random.normal(ks[21], (num_classes,), jnp.float32)
    return p


def prepare_params(p, eps=1e-5):
    """Fold BN into scale/bias, flatten conv weights, transpose/permute fc weights."""
    def fold_conv(w, b, g, beta, m, v):
        cout, cin = w.shape[0], w.shape[1]
        wmat = jnp.transpose(w, (2, 3, 1, 0)).reshape(9 * cin, cout)
        s = g / jnp.sqrt(v + eps)
        scale = s.reshape(1, cout).astype(jnp.float32)
        bias = ((b - m) * s + beta).reshape(1, cout).astype(jnp.float32)
        wdtype = jnp.float32 if cin == 1 else jnp.bfloat16   # conv1 runs on the VPU in f32
        return wmat.astype(wdtype), scale, bias

    prep = {
        'c1': fold_conv(p['conv1_w'], p['conv1_b'], p['bn1_g'], p['bn1_b'], p['bn1_m'], p['bn1_v']),
        'c2': fold_conv(p['conv2_w'], p['conv2_b'], p['bn2_g'], p['bn2_b'], p['bn2_m'], p['bn2_v']),
        'c3': fold_conv(p['conv3_w'], p['conv3_b'], p['bn3_g'], p['bn3_b'], p['bn3_m'], p['bn3_v']),
    }
    # fc1 expects torch NCHW flatten order (c*4 + h*2 + w); the kernel path flattens
    # NHWC ((h*2+w)*128 + c).  Permute fc1's input columns once so no transpose is
    # needed in the traced forward.
    j = jnp.arange(2 * 2 * 128)
    perm = (j % 128) * 4 + (j // 128)
    prep['fc1_w'] = p['fc1_w'][:, perm].T.astype(jnp.bfloat16)     # (512, 256)
    prep['fc1_b'] = p['fc1_b'].reshape(1, -1).astype(jnp.float32)
    prep['fc2_w'] = p['fc2_w'].T.astype(jnp.bfloat16)              # (256, num_classes)
    prep['fc2_b'] = p['fc2_b'].reshape(1, -1).astype(jnp.float32)
    return prep


def forward(prep, x_nchw):
    x = jnp.transpose(x_nchw, (0, 2, 3, 1)).astype(jnp.float32)    # NCHW -> NHWC
    x = conv_bn_relu_pool(x, *prep['c1'], pad=1)    # (B, 14, 14, 64)
    x = conv_bn_relu_pool(x, *prep['c2'], pad=1)    # (B, 7, 7, 128)
    x = conv_bn_relu_pool(x, *prep['c3'], pad=0)    # (B, 2, 2, 128)
    B = x.shape[0]
    x = x.reshape(B, -1)                            # NHWC flatten (fc1_w pre-permuted)
    return fc_head(x, prep['fc1_w'], prep['fc1_b'], prep['fc2_w'], prep['fc2_b'])


# ---------------------------------------------------------------------------
# Pure-JAX (f32) reference of the original PyTorch module, for validation.
# ---------------------------------------------------------------------------
def reference_forward(p, x_nchw, eps=1e-5):
    x = x_nchw.astype(jnp.float32)

    def cbr(x, w, b, g, beta, m, v, pad):
        y = jax.lax.conv_general_dilated(
            x, w, window_strides=(1, 1), padding=[(pad, pad), (pad, pad)],
            dimension_numbers=('NCHW', 'OIHW', 'NCHW'))
        y = y + b[None, :, None, None]
        y = (y - m[None, :, None, None]) * (g / jnp.sqrt(v + eps))[None, :, None, None] \
            + beta[None, :, None, None]
        return jnp.maximum(y, 0.0)

    def pool(x):
        return jax.lax.reduce_window(x, -jnp.inf, jax.lax.max,
                                     (1, 1, 2, 2), (1, 1, 2, 2), 'VALID')

    x = pool(cbr(x, p['conv1_w'], p['conv1_b'], p['bn1_g'], p['bn1_b'], p['bn1_m'], p['bn1_v'], 1))
    x = pool(cbr(x, p['conv2_w'], p['conv2_b'], p['bn2_g'], p['bn2_b'], p['bn2_m'], p['bn2_v'], 1))
    x = pool(cbr(x, p['conv3_w'], p['conv3_b'], p['bn3_g'], p['bn3_b'], p['bn3_m'], p['bn3_v'], 0))
    x = x.reshape(x.shape[0], -1)                    # NCHW flatten
    h = jnp.maximum(x @ p['fc1_w'].T + p['fc1_b'], 0.0)
    logits = h @ p['fc2_w'].T + p['fc2_b']
    return jax.nn.log_softmax(logits, axis=-1)


if __name__ == "__main__":
    num_classes = 10
    key = jax.random.PRNGKey(0)
    k_in, k_par = jax.random.split(key)
    params = init_params(k_par, num_classes)
    # 28x28 input is what the module implies (fc1 expects 2*2*128 features).
    x = jax.random.normal(k_in, (2, 1, 28, 28), jnp.float32)

    prep = prepare_params(params)
    out = jax.jit(forward)(prep, x)
    out = jax.block_until_ready(out)

    assert out.shape == (2, num_classes)
    assert bool(jnp.all(jnp.isfinite(out)))
    probs = jnp.exp(out)
    assert bool(jnp.allclose(jnp.sum(probs, axis=1), 1.0, atol=1e-4))

    # Compare against the f32 reference (kernel uses bf16 MXU operands -> loose tol).
    ref_probs = jnp.exp(reference_forward(params, x))
    assert bool(jnp.max(jnp.abs(probs - ref_probs)) < 0.05), "mismatch vs f32 reference"
    print("KERNEL_OK")
</pallas_src>

<mosaic_0001>
module attributes {stable_mosaic.version = 11 : i64} {
  func.func @_conv_pool_kernel(%arg0: i32, %arg1: i32, %arg2: memref<1x30x15x1xf32, #tpu.memory_space<vmem>>, %arg3: memref<1x30x15x1xf32, #tpu.memory_space<vmem>>, %arg4: memref<9x64xf32, #tpu.memory_space<vmem>>, %arg5: memref<1x64xf32, #tpu.memory_space<vmem>>, %arg6: memref<1x64xf32, #tpu.memory_space<vmem>>, %arg7: memref<1x1x14x64xf32, #tpu.memory_space<vmem>>) attributes {dimension_semantics = [#tpu.dimension_semantics<parallel>, #tpu.dimension_semantics<parallel>], iteration_bounds = array<i64: 2, 14>, scalar_prefetch = 0 : i64, scratch_operands = 0 : i64, tpu.core_type = #tpu.core_type<tc>, window_params = [{transform_indices = @transform_0, window_bounds = array<i64: 1, 30, 15, 1>}, {transform_indices = @transform_1, window_bounds = array<i64: 1, 30, 15, 1>}, {pipeline_mode = #tpu.pipeline_mode<synchronous>, transform_indices = @transform_2, window_bounds = array<i64: 9, 64>}, {pipeline_mode = #tpu.pipeline_mode<synchronous>, transform_indices = @transform_3, window_bounds = array<i64: 1, 64>}, {pipeline_mode = #tpu.pipeline_mode<synchronous>, transform_indices = @transform_4, window_bounds = array<i64: 1, 64>}, {transform_indices = @transform_5, window_bounds = array<i64: 1, 1, 14, 64>}]} {
    %c2_i32 = arith.constant 2 : i32
    %0 = arith.muli %c2_i32, %arg1 : i32
    %c0_i32 = arith.constant 0 : i32
    %1 = arith.addi %0, %c0_i32 : i32
    %c0 = arith.constant 0 : index
    %2 = arith.index_cast %1 : i32 to index
    %c0_0 = arith.constant 0 : index
    %c0_1 = arith.constant 0 : index
    %3 = vector.load %arg2[%c0, %2, %c0_0, %c0_1] : memref<1x30x15x1xf32, #tpu.memory_space<vmem>>, vector<1x1x15x1xf32>
    %4 = vector.shape_cast %3 : vector<1x1x15x1xf32> to vector<15x1xf32>
    %c2_i32_2 = arith.constant 2 : i32
    %5 = arith.muli %c2_i32_2, %arg1 : i32
    %c1_i32 = arith.constant 1 : i32
    %6 = arith.addi %5, %c1_i32 : i32
    %c0_3 = arith.constant 0 : index
    %7 = arith.index_cast %6 : i32 to index
    %c0_4 = arith.constant 0 : index
    %c0_5 = arith.constant 0 : index
    %8 = vector.load %arg2[%c0_3, %7, %c0_4, %c0_5] : memref<1x30x15x1xf32, #tpu.memory_space<vmem>>, vector<1x1x15x1xf32>
    %9 = vector.shape_cast %8 : vector<1x1x15x1xf32> to vector<15x1xf32>
    %c2_i32_6 = arith.constant 2 : i32
    %10 = arith.muli %c2_i32_6, %arg1 : i32
    %c2_i32_7 = arith.constant 2 : i32
    %11 = arith.addi %10, %c2_i32_7 : i32
    %c0_8 = arith.constant 0 : index
    %12 = arith.index_cast %11 : i32 to index
    %c0_9 = arith.constant 0 : index
    %c0_10 = arith.constant 0 : index
    %13 = vector.load %arg2[%c0_8, %12, %c0_9, %c0_10] : memref<1x30x15x1xf32, #tpu.memory_space<vmem>>, vector<1x1x15x1xf32>
    %14 = vector.shape_cast %13 : vector<1x1x15x1xf32> to vector<15x1xf32>
    %c2_i32_11 = arith.constant 2 : i32
    %15 = arith.muli %c2_i32_11, %arg1 : i32
    %c3_i32 = arith.constant 3 : i32
    %16 = arith.addi %15, %c3_i32 : i32
    %c0_12 = arith.constant 0 : index
    %17 = arith.index_cast %16 : i32 to index
    %c0_13 = arith.constant 0 : index
    %c0_14 = arith.constant 0 : index
    %18 = vector.load %arg2[%c0_12, %17, %c0_13, %c0_14] : memref<1x30x15x1xf32, #tpu.memory_space<vmem>>, vector<1x1x15x1xf32>
    %19 = vector.shape_cast %18 : vector<1x1x15x1xf32> to vector<15x1xf32>
    %c2_i32_15 = arith.constant 2 : i32
    %20 = arith.muli %c2_i32_15, %arg1 : i32
    %c0_i32_16 = arith.constant 0 : i32
    %21 = arith.addi %20, %c0_i32_16 : i32
    %c0_17 = arith.constant 0 : index
    %22 = arith.index_cast %21 : i32 to index
    %c0_18 = arith.constant 0 : index
    %c0_19 = arith.constant 0 : index
    %23 = vector.load %arg3[%c0_17, %22, %c0_18, %c0_19] : memref<1x30x15x1xf32, #tpu.memory_space<vmem>>, vector<1x1x15x1xf32>
    %24 = vector.shape_cast %23 : vector<1x1x15x1xf32> to vector<15x1xf32>
    %c2_i32_20 = arith.constant 2 : i32
    %25 = arith.muli %c2_i32_20, %arg1 : i32
    %c1_i32_21 = arith.constant 1 : i32
    %26 = arith.addi %25, %c1_i32_21 : i32
    %c0_22 = arith.constant 0 : index
    %27 = arith.index_cast %26 : i32 to index
    %c0_23 = arith.constant 0 : index
    %c0_24 = arith.constant 0 : index
    %28 = vector.load %arg3[%c0_22, %27, %c0_23, %c0_24] : memref<1x30x15x1xf32, #tpu.memory_space<vmem>>, vector<1x1x15x1xf32>
    %29 = vector.shape_cast %28 : vector<1x1x15x1xf32> to vector<15x1xf32>
    %c2_i32_25 = arith.constant 2 : i32
    %30 = arith.muli %c2_i32_25, %arg1 : i32
    %c2_i32_26 = arith.constant 2 : i32
    %31 = arith.addi %30, %c2_i32_26 : i32
    %c0_27 = arith.constant 0 : index
    %32 = arith.index_cast %31 : i32 to index
    %c0_28 = arith.constant 0 : index
    %c0_29 = arith.constant 0 : index
    %33 = vector.load %arg3[%c0_27, %32, %c0_28, %c0_29] : memref<1x30x15x1xf32, #tpu.memory_space<vmem>>, vector<1x1x15x1xf32>
    %34 = vector.shape_cast %33 : vector<1x1x15x1xf32> to vector<15x1xf32>
    %c2_i32_30 = arith.constant 2 : i32
    %35 = arith.muli %c2_i32_30, %arg1 : i32
    %c3_i32_31 = arith.constant 3 : i32
    %36 = arith.addi %35, %c3_i32_31 : i32
    %c0_32 = arith.constant 0 : index
    %37 = arith.index_cast %36 : i32 to index
    %c0_33 = arith.constant 0 : index
    %c0_34 = arith.constant 0 : index
    %38 = vector.load %arg3[%c0_32, %37, %c0_33, %c0_34] : memref<1x30x15x1xf32, #tpu.memory_space<vmem>>, vector<1x1x15x1xf32>
    %39 = vector.shape_cast %38 : vector<1x1x15x1xf32> to vector<15x1xf32>
    %c0_35 = arith.constant 0 : index
    %c0_36 = arith.constant 0 : index
    %40 = vector.load %arg5[%c0_35, %c0_36] : memref<1x64xf32, #tpu.memory_space<vmem>>, vector<1x64xf32>
    %c0_37 = arith.constant 0 : index
    %c0_38 = arith.constant 0 : index
    %41 = vector.load %arg6[%c0_37, %c0_38] : memref<1x64xf32, #tpu.memory_space<vmem>>, vector<1x64xf32>
    %42 = vector.extract_strided_slice %4 {offsets = [0, 0], sizes = [14, 1], strides = [1, 1]} : vector<15x1xf32> to vector<14x1xf32>
    %43 = vector.extract_strided_slice %4 {offsets = [1, 0], sizes = [14, 1], strides = [1, 1]} : vector<15x1xf32> to vector<14x1xf32>
    %44 = vector.extract_strided_slice %24 {offsets = [0, 0], sizes = [14, 1], strides = [1, 1]} : vector<15x1xf32> to vector<14x1xf32>
    %45 = vector.extract_strided_slice %9 {offsets = [0, 0], sizes = [14, 1], strides = [1, 1]} : vector<15x1xf32> to vector<14x1xf32>
    %46 = vector.extract_strided_slice %9 {offsets = [1, 0], sizes = [14, 1], strides = [1, 1]} : vector<15x1xf32> to vector<14x1xf32>
    %47 = vector.extract_strided_slice %29 {offsets = [0, 0], sizes = [14, 1], strides = [1, 1]} : vector<15x1xf32> to vector<14x1xf32>
    %48 = vector.extract_strided_slice %14 {offsets = [0, 0], sizes = [14, 1], strides = [1, 1]} : vector<15x1xf32> to vector<14x1xf32>
    %49 = vector.extract_strided_slice %14 {offsets = [1, 0], sizes = [14, 1], strides = [1, 1]} : vector<15x1xf32> to vector<14x1xf32>
    %50 = vector.extract_strided_slice %34 {offsets = [0, 0], sizes = [14, 1], strides = [1, 1]} : vector<15x1xf32> to vector<14x1xf32>
    %51 = vector.extract_strided_slice %4 {offsets = [1, 0], sizes = [14, 1], strides = [1, 1]} : vector<15x1xf32> to vector<14x1xf32>
    %52 = vector.extract_strided_slice %24 {offsets = [0, 0], sizes = [14, 1], strides = [1, 1]} : vector<15x1xf32> to vector<14x1xf32>
    %53 = vector.extract_strided_slice %24 {offsets = [1, 0], sizes = [14, 1], strides = [1, 1]} : vector<15x1xf32> to vector<14x1xf32>
    %54 = vector.extract_strided_slice %9 {offsets = [1, 0], sizes = [14, 1], strides = [1, 1]} : vector<15x1xf32> to vector<14x1xf32>
    %55 = vector.extract_strided_slice %29 {offsets = [0, 0], sizes = [14, 1], strides = [1, 1]} : vector<15x1xf32> to vector<14x1xf32>
    %56 = vector.extract_strided_slice %29 {offsets = [1, 0], sizes = [14, 1], strides = [1, 1]} : vector<15x1xf32> to vector<14x1xf32>
    %57 = vector.extract_strided_slice %14 {offsets = [1, 0], sizes = [14, 1], strides = [1, 1]} : vector<15x1xf32> to vector<14x1xf32>
    %58 = vector.extract_strided_slice %34 {offsets = [0, 0], sizes = [14, 1], strides = [1, 1]} : vector<15x1xf32> to vector<14x1xf32>
    %59 = vector.extract_strided_slice %34 {offsets = [1, 0], sizes = [14, 1], strides = [1, 1]} : vector<15x1xf32> to vector<14x1xf32>
    %60 = vector.extract_strided_slice %9 {offsets = [0, 0], sizes = [14, 1], strides = [1, 1]} : vector<15x1xf32> to vector<14x1xf32>
    %61 = vector.extract_strided_slice %9 {offsets = [1, 0], sizes = [14, 1], strides = [1, 1]} : vector<15x1xf32> to vector<14x1xf32>
    %62 = vector.extract_strided_slice %29 {offsets = [0, 0], sizes = [14, 1], strides = [1, 1]} : vector<15x1xf32> to vector<14x1xf32>
    %63 = vector.extract_strided_slice %14 {offsets = [0, 0], sizes = [14, 1], strides = [1, 1]} : vector<15x1xf32> to vector<14x1xf32>
    %64 = vector.extract_strided_slice %14 {offsets = [1, 0], sizes = [14, 1], strides = [1, 1]} : vector<15x1xf32> to vector<14x1xf32>
    %65 = vector.extract_strided_slice %34 {offsets = [0, 0], sizes = [14, 1], strides = [1, 1]} : vector<15x1xf32> to vector<14x1xf32>
    %66 = vector.extract_strided_slice %19 {offsets = [0, 0], sizes = [14, 1], strides = [1, 1]} : vector<15x1xf32> to vector<14x1xf32>
    %67 = vector.extract_strided_slice %19 {offsets = [1, 0], sizes = [14, 1], strides = [1, 1]} : vector<15x1xf32> to vector<14x1xf32>
    %68 = vector.extract_strided_slice %39 {offsets = [0, 0], sizes = [14, 1], strides = [1, 1]} : vector<15x1xf32> to vector<14x1xf32>
    %69 = vector.extract_strided_slice %9 {offsets = [1, 0], sizes = [14, 1], strides = [1, 1]} : vector<15x1xf32> to vector<14x1xf32>
    %70 = vector.extract_strided_slice %29 {offsets = [0, 0], sizes = [14, 1], strides = [1, 1]} : vector<15x1xf32> to vector<14x1xf32>
    %71 = vector.extract_strided_slice %29 {offsets = [1, 0], sizes = [14, 1], strides = [1, 1]} : vector<15x1xf32> to vector<14x1xf32>
    %72 = vector.extract_strided_slice %14 {offsets = [1, 0], sizes = [14, 1], strides = [1, 1]} : vector<15x1xf32> to vector<14x1xf32>
    %73 = vector.extract_strided_slice %34 {offsets = [0, 0], sizes = [14, 1], strides = [1, 1]} : vector<15x1xf32> to vector<14x1xf32>
    %74 = vector.extract_strided_slice %34 {offsets = [1, 0], sizes = [14, 1], strides = [1, 1]} : vector<15x1xf32> to vector<14x1xf32>
    %75 = vector.extract_strided_slice %19 {offsets = [1, 0], sizes = [14, 1], strides = [1, 1]} : vector<15x1xf32> to vector<14x1xf32>
    %76 = vector.extract_strided_slice %39 {offsets = [0, 0], sizes = [14, 1], strides = [1, 1]} : vector<15x1xf32> to vector<14x1xf32>
    %77 = vector.extract_strided_slice %39 {offsets = [1, 0], sizes = [14, 1], strides = [1, 1]} : vector<15x1xf32> to vector<14x1xf32>
    %c0_39 = arith.constant 0 : index
    %c0_40 = arith.constant 0 : index
    %78 = vector.load %arg4[%c0_39, %c0_40] : memref<9x64xf32, #tpu.memory_space<vmem>>, vector<9x64xf32>
    %79 = vector.extract_strided_slice %78 {offsets = [0, 0], sizes = [1, 64], strides = [1, 1]} : vector<9x64xf32> to vector<1x64xf32>
    %80 = vector.broadcast %42 : vector<14x1xf32> to vector<14x64xf32>
    %81 = vector.broadcast %79 : vector<1x64xf32> to vector<14x64xf32>
    %82 = arith.mulf %80, %81 : vector<14x64xf32>
    %83 = vector.extract_strided_slice %78 {offsets = [1, 0], sizes = [1, 64], strides = [1, 1]} : vector<9x64xf32> to vector<1x64xf32>
    %84 = vector.broadcast %44 : vector<14x1xf32> to vector<14x64xf32>
    %85 = vector.broadcast %83 : vector<1x64xf32> to vector<14x64xf32>
    %86 = arith.mulf %84, %85 : vector<14x64xf32>
    %87 = arith.addf %82, %86 : vector<14x64xf32>
    %88 = vector.extract_strided_slice %78 {offsets = [2, 0], sizes = [1, 64], strides = [1, 1]} : vector<9x64xf32> to vector<1x64xf32>
    %89 = vector.broadcast %43 : vector<14x1xf32> to vector<14x64xf32>
    %90 = vector.broadcast %88 : vector<1x64xf32> to vector<14x64xf32>
    %91 = arith.mulf %89, %90 : vector<14x64xf32>
    %92 = arith.addf %87, %91 : vector<14x64xf32>
    %93 = vector.extract_strided_slice %78 {offsets = [3, 0], sizes = [1, 64], strides = [1, 1]} : vector<9x64xf32> to vector<1x64xf32>
    %94 = vector.broadcast %45 : vector<14x1xf32> to vector<14x64xf32>
    %95 = vector.broadcast %93 : vector<1x64xf32> to vector<14x64xf32>
    %96 = arith.mulf %94, %95 : vector<14x64xf32>
    %97 = arith.addf %92, %96 : vector<14x64xf32>
    %98 = vector.extract_strided_slice %78 {offsets = [4, 0], sizes = [1, 64], strides = [1, 1]} : vector<9x64xf32> to vector<1x64xf32>
    %99 = vector.broadcast %47 : vector<14x1xf32> to vector<14x64xf32>
    %100 = vector.broadcast %98 : vector<1x64xf32> to vector<14x64xf32>
    %101 = arith.mulf %99, %100 : vector<14x64xf32>
    %102 = arith.addf %97, %101 : vector<14x64xf32>
    %103 = vector.extract_strided_slice %78 {offsets = [5, 0], sizes = [1, 64], strides = [1, 1]} : vector<9x64xf32> to vector<1x64xf32>
    %104 = vector.broadcast %46 : vector<14x1xf32> to vector<14x64xf32>
    %105 = vector.broadcast %103 : vector<1x64xf32> to vector<14x64xf32>
    %106 = arith.mulf %104, %105 : vector<14x64xf32>
    %107 = arith.addf %102, %106 : vector<14x64xf32>
    %108 = vector.extract_strided_slice %78 {offsets = [6, 0], sizes = [1, 64], strides = [1, 1]} : vector<9x64xf32> to vector<1x64xf32>
    %109 = vector.broadcast %48 : vector<14x1xf32> to vector<14x64xf32>
    %110 = vector.broadcast %108 : vector<1x64xf32> to vector<14x64xf32>
    %111 = arith.mulf %109, %110 : vector<14x64xf32>
    %112 = arith.addf %107, %111 : vector<14x64xf32>
    %113 = vector.extract_strided_slice %78 {offsets = [7, 0], sizes = [1, 64], strides = [1, 1]} : vector<9x64xf32> to vector<1x64xf32>
    %114 = vector.broadcast %50 : vector<14x1xf32> to vector<14x64xf32>
    %115 = vector.broadcast %113 : vector<1x64xf32> to vector<14x64xf32>
    %116 = arith.mulf %114, %115 : vector<14x64xf32>
    %117 = arith.addf %112, %116 : vector<14x64xf32>
    %118 = vector.extract_strided_slice %78 {offsets = [8, 0], sizes = [1, 64], strides = [1, 1]} : vector<9x64xf32> to vector<1x64xf32>
    %119 = vector.broadcast %49 : vector<14x1xf32> to vector<14x64xf32>
    %120 = vector.broadcast %118 : vector<1x64xf32> to vector<14x64xf32>
    %121 = arith.mulf %119, %120 : vector<14x64xf32>
    %122 = arith.addf %117, %121 : vector<14x64xf32>
    %123 = vector.broadcast %40 : vector<1x64xf32> to vector<14x64xf32>
    %124 = arith.mulf %122, %123 : vector<14x64xf32>
    %125 = vector.broadcast %41 : vector<1x64xf32> to vector<14x64xf32>
    %126 = arith.addf %124, %125 : vector<14x64xf32>
    %cst = arith.constant 0.000000e+00 : f32
    %127 = vector.broadcast %cst : f32 to vector<14x64xf32>
    %128 = arith.maximumf %126, %127 : vector<14x64xf32>
    %129 = vector.extract_strided_slice %78 {offsets = [0, 0], sizes = [1, 64], strides = [1, 1]} : vector<9x64xf32> to vector<1x64xf32>
    %130 = vector.broadcast %52 : vector<14x1xf32> to vector<14x64xf32>
    %131 = vector.broadcast %129 : vector<1x64xf32> to vector<14x64xf32>
    %132 = arith.mulf %130, %131 : vector<14x64xf32>
    %133 = vector.extract_strided_slice %78 {offsets = [1, 0], sizes = [1, 64], strides = [1, 1]} : vector<9x64xf32> to vector<1x64xf32>
    %134 = vector.broadcast %51 : vector<14x1xf32> to vector<14x64xf32>
    %135 = vector.broadcast %133 : vector<1x64xf32> to vector<14x64xf32>
    %136 = arith.mulf %134, %135 : vector<14x64xf32>
    %137 = arith.addf %132, %136 : vector<14x64xf32>
    %138 = vector.extract_strided_slice %78 {offsets = [2, 0], sizes = [1, 64], strides = [1, 1]} : vector<9x64xf32> to vector<1x64xf32>
    %139 = vector.broadcast %53 : vector<14x1xf32> to vector<14x64xf32>
    %140 = vector.broadcast %138 : vector<1x64xf32> to vector<14x64xf32>
    %141 = arith.mulf %139, %140 : vector<14x64xf32>
    %142 = arith.addf %137, %141 : vector<14x64xf32>
    %143 = vector.extract_strided_slice %78 {offsets = [3, 0], sizes = [1, 64], strides = [1, 1]} : vector<9x64xf32> to vector<1x64xf32>
    %144 = vector.broadcast %55 : vector<14x1xf32> to vector<14x64xf32>
    %145 = vector.broadcast %143 : vector<1x64xf32> to vector<14x64xf32>
    %146 = arith.mulf %144, %145 : vector<14x64xf32>
    %147 = arith.addf %142, %146 : vector<14x64xf32>
    %148 = vector.extract_strided_slice %78 {offsets = [4, 0], sizes = [1, 64], strides = [1, 1]} : vector<9x64xf32> to vector<1x64xf32>
    %149 = vector.broadcast %54 : vector<14x1xf32> to vector<14x64xf32>
    %150 = vector.broadcast %148 : vector<1x64xf32> to vector<14x64xf32>
    %151 = arith.mulf %149, %150 : vector<14x64xf32>
    %152 = arith.addf %147, %151 : vector<14x64xf32>
    %153 = vector.extract_strided_slice %78 {offsets = [5, 0], sizes = [1, 64], strides = [1, 1]} : vector<9x64xf32> to vector<1x64xf32>
    %154 = vector.broadcast %56 : vector<14x1xf32> to vector<14x64xf32>
    %155 = vector.broadcast %153 : vector<1x64xf32> to vector<14x64xf32>
    %156 = arith.mulf %154, %155 : vector<14x64xf32>
    %157 = arith.addf %152, %156 : vector<14x64xf32>
    %158 = vector.extract_strided_slice %78 {offsets = [6, 0], sizes = [1, 64], strides = [1, 1]} : vector<9x64xf32> to vector<1x64xf32>
    %159 = vector.broadcast %58 : vector<14x1xf32> to vector<14x64xf32>
    %160 = vector.broadcast %158 : vector<1x64xf32> to vector<14x64xf32>
    %161 = arith.mulf %159, %160 : vector<14x64xf32>
    %162 = arith.addf %157, %161 : vector<14x64xf32>
    %163 = vector.extract_strided_slice %78 {offsets = [7, 0], sizes = [1, 64], strides = [1, 1]} : vector<9x64xf32> to vector<1x64xf32>
    %164 = vector.broadcast %57 : vector<14x1xf32> to vector<14x64xf32>
    %165 = vector.broadcast %163 : vector<1x64xf32> to vector<14x64xf32>
    %166 = arith.mulf %164, %165 : vector<14x64xf32>
    %167 = arith.addf %162, %166 : vector<14x64xf32>
    %168 = vector.extract_strided_slice %78 {offsets = [8, 0], sizes = [1, 64], strides = [1, 1]} : vector<9x64xf32> to vector<1x64xf32>
    %169 = vector.broadcast %59 : vector<14x1xf32> to vector<14x64xf32>
    %170 = vector.broadcast %168 : vector<1x64xf32> to vector<14x64xf32>
    %171 = arith.mulf %169, %170 : vector<14x64xf32>
    %172 = arith.addf %167, %171 : vector<14x64xf32>
    %173 = vector.broadcast %40 : vector<1x64xf32> to vector<14x64xf32>
    %174 = arith.mulf %172, %173 : vector<14x64xf32>
    %175 = vector.broadcast %41 : vector<1x64xf32> to vector<14x64xf32>
    %176 = arith.addf %174, %175 : vector<14x64xf32>
    %cst_41 = arith.constant 0.000000e+00 : f32
    %177 = vector.broadcast %cst_41 : f32 to vector<14x64xf32>
    %178 = arith.maximumf %176, %177 : vector<14x64xf32>
    %179 = vector.extract_strided_slice %78 {offsets = [0, 0], sizes = [1, 64], strides = [1, 1]} : vector<9x64xf32> to vector<1x64xf32>
    %180 = vector.broadcast %60 : vector<14x1xf32> to vector<14x64xf32>
    %181 = vector.broadcast %179 : vector<1x64xf32> to vector<14x64xf32>
    %182 = arith.mulf %180, %181 : vector<14x64xf32>
    %183 = vector.extract_strided_slice %78 {offsets = [1, 0], sizes = [1, 64], strides = [1, 1]} : vector<9x64xf32> to vector<1x64xf32>
    %184 = vector.broadcast %62 : vector<14x1xf32> to vector<14x64xf32>
    %185 = vector.broadcast %183 : vector<1x64xf32> to vector<14x64xf32>
    %186 = arith.mulf %184, %185 : vector<14x64xf32>
    %187 = arith.addf %182, %186 : vector<14x64xf32>
    %188 = vector.extract_strided_slice %78 {offsets = [2, 0], sizes = [1, 64], strides = [1, 1]} : vector<9x64xf32> to vector<1x64xf32>
    %189 = vector.broadcast %61 : vector<14x1xf32> to vector<14x64xf32>
    %190 = vector.broadcast %188 : vector<1x64xf32> to vector<14x64xf32>
    %191 = arith.mulf %189, %190 : vector<14x64xf32>
    %192 = arith.addf %187, %191 : vector<14x64xf32>
    %193 = vector.extract_strided_slice %78 {offsets = [3, 0], sizes = [1, 64], strides = [1, 1]} : vector<9x64xf32> to vector<1x64xf32>
    %194 = vector.broadcast %63 : vector<14x1xf32> to vector<14x64xf32>
    %195 = vector.broadcast %193 : vector<1x64xf32> to vector<14x64xf32>
    %196 = arith.mulf %194, %195 : vector<14x64xf32>
    %197 = arith.addf %192, %196 : vector<14x64xf32>
    %198 = vector.extract_strided_slice %78 {offsets = [4, 0], sizes = [1, 64], strides = [1, 1]} : vector<9x64xf32> to vector<1x64xf32>
    %199 = vector.broadcast %65 : vector<14x1xf32> to vector<14x64xf32>
    %200 = vector.broadcast %198 : vector<1x64xf32> to vector<14x64xf32>
    %201 = arith.mulf %199, %200 : vector<14x64xf32>
    %202 = arith.addf %197, %201 : vector<14x64xf32>
    %203 = vector.extract_strided_slice %78 {offsets = [5, 0], sizes = [1, 64], strides = [1, 1]} : vector<9x64xf32> to vector<1x64xf32>
    %204 = vector.broadcast %64 : vector<14x1xf32> to vector<14x64xf32>
    %205 = vector.broadcast %203 : vector<1x64xf32> to vector<14x64xf32>
    %206 = arith.mulf %204, %205 : vector<14x64xf32>
    %207 = arith.addf %202, %206 : vector<14x64xf32>
    %208 = vector.extract_strided_slice %78 {offsets = [6, 0], sizes = [1, 64], strides = [1, 1]} : vector<9x64xf32> to vector<1x64xf32>
    %209 = vector.broadcast %66 : vector<14x1xf32> to vector<14x64xf32>
    %210 = vector.broadcast %208 : vector<1x64xf32> to vector<14x64xf32>
    %211 = arith.mulf %209, %210 : vector<14x64xf32>
    %212 = arith.addf %207, %211 : vector<14x64xf32>
    %213 = vector.extract_strided_slice %78 {offsets = [7, 0], sizes = [1, 64], strides = [1, 1]} : vector<9x64xf32> to vector<1x64xf32>
    %214 = vector.broadcast %68 : vector<14x1xf32> to vector<14x64xf32>
    %215 = vector.broadcast %213 : vector<1x64xf32> to vector<14x64xf32>
    %216 = arith.mulf %214, %215 : vector<14x64xf32>
    %217 = arith.addf %212, %216 : vector<14x64xf32>
    %218 = vector.extract_strided_slice %78 {offsets = [8, 0], sizes = [1, 64], strides = [1, 1]} : vector<9x64xf32> to vector<1x64xf32>
    %219 = vector.broadcast %67 : vector<14x1xf32> to vector<14x64xf32>
    %220 = vector.broadcast %218 : vector<1x64xf32> to vector<14x64xf32>
    %221 = arith.mulf %219, %220 : vector<14x64xf32>
    %222 = arith.addf %217, %221 : vector<14x64xf32>
    %223 = vector.broadcast %40 : vector<1x64xf32> to vector<14x64xf32>
    %224 = arith.mulf %222, %223 : vector<14x64xf32>
    %225 = vector.broadcast %41 : vector<1x64xf32> to vector<14x64xf32>
    %226 = arith.addf %224, %225 : vector<14x64xf32>
    %cst_42 = arith.constant 0.000000e+00 : f32
    %227 = vector.broadcast %cst_42 : f32 to vector<14x64xf32>
    %228 = arith.maximumf %226, %227 : vector<14x64xf32>
    %229 = vector.extract_strided_slice %78 {offsets = [0, 0], sizes = [1, 64], strides = [1, 1]} : vector<9x64xf32> to vector<1x64xf32>
    %230 = vector.broadcast %70 : vector<14x1xf32> to vector<14x64xf32>
    %231 = vector.broadcast %229 : vector<1x64xf32> to vector<14x64xf32>
    %232 = arith.mulf %230, %231 : vector<14x64xf32>
    %233 = vector.extract_strided_slice %78 {offsets = [1, 0], sizes = [1, 64], strides = [1, 1]} : vector<9x64xf32> to vector<1x64xf32>
    %234 = vector.broadcast %69 : vector<14x1xf32> to vector<14x64xf32>
    %235 = vector.broadcast %233 : vector<1x64xf32> to vector<14x64xf32>
    %236 = arith.mulf %234, %235 : vector<14x64xf32>
    %237 = arith.addf %232, %236 : vector<14x64xf32>
    %238 = vector.extract_strided_slice %78 {offsets = [2, 0], sizes = [1, 64], strides = [1, 1]} : vector<9x64xf32> to vector<1x64xf32>
    %239 = vector.broadcast %71 : vector<14x1xf32> to vector<14x64xf32>
    %240 = vector.broadcast %238 : vector<1x64xf32> to vector<14x64xf32>
    %241 = arith.mulf %239, %240 : vector<14x64xf32>
    %242 = arith.addf %237, %241 : vector<14x64xf32>
    %243 = vector.extract_strided_slice %78 {offsets = [3, 0], sizes = [1, 64], strides = [1, 1]} : vector<9x64xf32> to vector<1x64xf32>
    %244 = vector.broadcast %73 : vector<14x1xf32> to vector<14x64xf32>
    %245 = vector.broadcast %243 : vector<1x64xf32> to vector<14x64xf32>
    %246 = arith.mulf %244, %245 : vector<14x64xf32>
    %247 = arith.addf %242, %246 : vector<14x64xf32>
    %248 = vector.extract_strided_slice %78 {offsets = [4, 0], sizes = [1, 64], strides = [1, 1]} : vector<9x64xf32> to vector<1x64xf32>
    %249 = vector.broadcast %72 : vector<14x1xf32> to vector<14x64xf32>
    %250 = vector.broadcast %248 : vector<1x64xf32> to vector<14x64xf32>
    %251 = arith.mulf %249, %250 : vector<14x64xf32>
    %252 = arith.addf %247, %251 : vector<14x64xf32>
    %253 = vector.extract_strided_slice %78 {offsets = [5, 0], sizes = [1, 64], strides = [1, 1]} : vector<9x64xf32> to vector<1x64xf32>
    %254 = vector.broadcast %74 : vector<14x1xf32> to vector<14x64xf32>
    %255 = vector.broadcast %253 : vector<1x64xf32> to vector<14x64xf32>
    %256 = arith.mulf %254, %255 : vector<14x64xf32>
    %257 = arith.addf %252, %256 : vector<14x64xf32>
    %258 = vector.extract_strided_slice %78 {offsets = [6, 0], sizes = [1, 64], strides = [1, 1]} : vector<9x64xf32> to vector<1x64xf32>
    %259 = vector.broadcast %76 : vector<14x1xf32> to vector<14x64xf32>
    %260 = vector.broadcast %258 : vector<1x64xf32> to vector<14x64xf32>
    %261 = arith.mulf %259, %260 : vector<14x64xf32>
    %262 = arith.addf %257, %261 : vector<14x64xf32>
    %263 = vector.extract_strided_slice %78 {offsets = [7, 0], sizes = [1, 64], strides = [1, 1]} : vector<9x64xf32> to vector<1x64xf32>
    %264 = vector.broadcast %75 : vector<14x1xf32> to vector<14x64xf32>
    %265 = vector.broadcast %263 : vector<1x64xf32> to vector<14x64xf32>
    %266 = arith.mulf %264, %265 : vector<14x64xf32>
    %267 = arith.addf %262, %266 : vector<14x64xf32>
    %268 = vector.extract_strided_slice %78 {offsets = [8, 0], sizes = [1, 64], strides = [1, 1]} : vector<9x64xf32> to vector<1x64xf32>
    %269 = vector.broadcast %77 : vector<14x1xf32> to vector<14x64xf32>
    %270 = vector.broadcast %268 : vector<1x64xf32> to vector<14x64xf32>
    %271 = arith.mulf %269, %270 : vector<14x64xf32>
    %272 = arith.addf %267, %271 : vector<14x64xf32>
    %273 = vector.broadcast %40 : vector<1x64xf32> to vector<14x64xf32>
    %274 = arith.mulf %272, %273 : vector<14x64xf32>
    %275 = vector.broadcast %41 : vector<1x64xf32> to vector<14x64xf32>
    %276 = arith.addf %274, %275 : vector<14x64xf32>
    %cst_43 = arith.constant 0.000000e+00 : f32
    %277 = vector.broadcast %cst_43 : f32 to vector<14x64xf32>
    %278 = arith.maximumf %276, %277 : vector<14x64xf32>
    %279 = arith.maximumf %128, %178 : vector<14x64xf32>
    %280 = arith.maximumf %228, %278 : vector<14x64xf32>
    %281 = arith.maximumf %279, %280 : vector<14x64xf32>
    %c0_44 = arith.constant 0 : index
    %c0_45 = arith.constant 0 : index
    %c0_46 = arith.constant 0 : index
    %c0_47 = arith.constant 0 : index
    %282 = vector.load %arg7[%c0_44, %c0_45, %c0_46, %c0_47] : memref<1x1x14x64xf32, #tpu.memory_space<vmem>>, vector<1x1x14x64xf32>
    %283 = vector.shape_cast %282 : vector<1x1x14x64xf32> to vector<14x64xf32>
    %284 = vector.shape_cast %281 : vector<14x64xf32> to vector<1x1x14x64xf32>
    tpu.vector_store %arg7[%c0_44, %c0_45, %c0_46, %c0_47], %284 {strides = array<i32>} : memref<1x1x14x64xf32, #tpu.memory_space<vmem>>, vector<1x1x14x64xf32>,
    return
  }
  func.func @transform_0(%arg0: i32, %arg1: i32) -> (i32, i32, i32, i32) {
    %c0_i32 = arith.constant 0 : i32
    %c0_i32_0 = arith.constant 0 : i32
    %c0_i32_1 = arith.constant 0 : i32
    %c0_i32_2 = arith.constant 0 : i32
    return %arg0, %c0_i32, %c0_i32_0, %c0_i32_1 : i32, i32, i32, i32
  }
  func.func @transform_1(%arg0: i32, %arg1: i32) -> (i32, i32, i32, i32) {
    %c0_i32 = arith.constant 0 : i32
    %c0_i32_0 = arith.constant 0 : i32
    %c0_i32_1 = arith.constant 0 : i32
    %c0_i32_2 = arith.constant 0 : i32
    return %arg0, %c0_i32, %c0_i32_0, %c0_i32_1 : i32, i32, i32, i32
  }
  func.func @transform_2(%arg0: i32, %arg1: i32) -> (i32, i32) {
    %c0_i32 = arith.constant 0 : i32
    %c0_i32_0 = arith.constant 0 : i32
    %c0_i32_1 = arith.constant 0 : i32
    return %c0_i32, %c0_i32_0 : i32, i32
  }
  func.func @transform_3(%arg0: i32, %arg1: i32) -> (i32, i32) {
    %c0_i32 = arith.constant 0 : i32
    %c0_i32_0 = arith.constant 0 : i32
    %c0_i32_1 = arith.constant 0 : i32
    return %c0_i32, %c0_i32_0 : i32, i32
  }
  func.func @transform_4(%arg0: i32, %arg1: i32) -> (i32, i32) {
    %c0_i32 = arith.constant 0 : i32
    %c0_i32_0 = arith.constant 0 : i32
    %c0_i32_1 = arith.constant 0 : i32
    return %c0_i32, %c0_i32_0 : i32, i32
  }
  func.func @transform_5(%arg0: i32, %arg1: i32) -> (i32, i32, i32, i32) {
    %c0_i32 = arith.constant 0 : i32
    %c0_i32_0 = arith.constant 0 : i32
    %c0_i32_1 = arith.constant 0 : i32
    return %arg0, %arg1, %c0_i32, %c0_i32_0 : i32, i32, i32, i32
  }
}

module attributes {stable_mosaic.version = 11 : i64} {
  func.func @_conv_pool_kernel(%arg0: i32, %arg1: i32, %arg2: memref<1x16x8x64xf32, #tpu.memory_space<vmem>>, %arg3: memref<1x16x8x64xf32, #tpu.memory_space<vmem>>, %arg4: memref<576x128xbf16, #tpu.memory_space<vmem>>, %arg5: memref<1x128xf32, #tpu.memory_space<vmem>>, %arg6: memref<1x128xf32, #tpu.memory_space<vmem>>, %arg7: memref<1x1x7x128xf32, #tpu.memory_space<vmem>>) attributes {dimension_semantics = [#tpu.dimension_semantics<parallel>, #tpu.dimension_semantics<parallel>], iteration_bounds = array<i64: 2, 7>, scalar_prefetch = 0 : i64, scratch_operands = 0 : i64, tpu.core_type = #tpu.core_type<tc>, window_params = [{transform_indices = @transform_0, window_bounds = array<i64: 1, 16, 8, 64>}, {transform_indices = @transform_1, window_bounds = array<i64: 1, 16, 8, 64>}, {pipeline_mode = #tpu.pipeline_mode<synchronous>, transform_indices = @transform_2, window_bounds = array<i64: 576, 128>}, {pipeline_mode = #tpu.pipeline_mode<synchronous>, transform_indices = @transform_3, window_bounds = array<i64: 1, 128>}, {pipeline_mode = #tpu.pipeline_mode<synchronous>, transform_indices = @transform_4, window_bounds = array<i64: 1, 128>}, {transform_indices = @transform_5, window_bounds = array<i64: 1, 1, 7, 128>}]} {
    %c2_i32 = arith.constant 2 : i32
    %0 = arith.muli %c2_i32, %arg1 : i32
    %c0_i32 = arith.constant 0 : i32
    %1 = arith.addi %0, %c0_i32 : i32
    %c0 = arith.constant 0 : index
    %2 = arith.index_cast %1 : i32 to index
    %c0_0 = arith.constant 0 : index
    %c0_1 = arith.constant 0 : index
    %3 = vector.load %arg2[%c0, %2, %c0_0, %c0_1] : memref<1x16x8x64xf32, #tpu.memory_space<vmem>>, vector<1x1x8x64xf32>
    %4 = vector.shape_cast %3 : vector<1x1x8x64xf32> to vector<8x64xf32>
    %c2_i32_2 = arith.constant 2 : i32
    %5 = arith.muli %c2_i32_2, %arg1 : i32
    %c1_i32 = arith.constant 1 : i32
    %6 = arith.addi %5, %c1_i32 : i32
    %c0_3 = arith.constant 0 : index
    %7 = arith.index_cast %6 : i32 to index
    %c0_4 = arith.constant 0 : index
    %c0_5 = arith.constant 0 : index
    %8 = vector.load %arg2[%c0_3, %7, %c0_4, %c0_5] : memref<1x16x8x64xf32, #tpu.memory_space<vmem>>, vector<1x1x8x64xf32>
    %9 = vector.shape_cast %8 : vector<1x1x8x64xf32> to vector<8x64xf32>
    %c2_i32_6 = arith.constant 2 : i32
    %10 = arith.muli %c2_i32_6, %arg1 : i32
    %c2_i32_7 = arith.constant 2 : i32
    %11 = arith.addi %10, %c2_i32_7 : i32
    %c0_8 = arith.constant 0 : index
    %12 = arith.index_cast %11 : i32 to index
    %c0_9 = arith.constant 0 : index
    %c0_10 = arith.constant 0 : index
    %13 = vector.load %arg2[%c0_8, %12, %c0_9, %c0_10] : memref<1x16x8x64xf32, #tpu.memory_space<vmem>>, vector<1x1x8x64xf32>
    %14 = vector.shape_cast %13 : vector<1x1x8x64xf32> to vector<8x64xf32>
    %c2_i32_11 = arith.constant 2 : i32
    %15 = arith.muli %c2_i32_11, %arg1 : i32
    %c3_i32 = arith.constant 3 : i32
    %16 = arith.addi %15, %c3_i32 : i32
    %c0_12 = arith.constant 0 : index
    %17 = arith.index_cast %16 : i32 to index
    %c0_13 = arith.constant 0 : index
    %c0_14 = arith.constant 0 : index
    %18 = vector.load %arg2[%c0_12, %17, %c0_13, %c0_14] : memref<1x16x8x64xf32, #tpu.memory_space<vmem>>, vector<1x1x8x64xf32>
    %19 = vector.shape_cast %18 : vector<1x1x8x64xf32> to vector<8x64xf32>
    %c2_i32_15 = arith.constant 2 : i32
    %20 = arith.muli %c2_i32_15, %arg1 : i32
    %c0_i32_16 = arith.constant 0 : i32
    %21 = arith.addi %20, %c0_i32_16 : i32
    %c0_17 = arith.constant 0 : index
    %22 = arith.index_cast %21 : i32 to index
    %c0_18 = arith.constant 0 : index
    %c0_19 = arith.constant 0 : index
    %23 = vector.load %arg3[%c0_17, %22, %c0_18, %c0_19] : memref<1x16x8x64xf32, #tpu.memory_space<vmem>>, vector<1x1x8x64xf32>
    %24 = vector.shape_cast %23 : vector<1x1x8x64xf32> to vector<8x64xf32>
    %c2_i32_20 = arith.constant 2 : i32
    %25 = arith.muli %c2_i32_20, %arg1 : i32
    %c1_i32_21 = arith.constant 1 : i32
    %26 = arith.addi %25, %c1_i32_21 : i32
    %c0_22 = arith.constant 0 : index
    %27 = arith.index_cast %26 : i32 to index
    %c0_23 = arith.constant 0 : index
    %c0_24 = arith.constant 0 : index
    %28 = vector.load %arg3[%c0_22, %27, %c0_23, %c0_24] : memref<1x16x8x64xf32, #tpu.memory_space<vmem>>, vector<1x1x8x64xf32>
    %29 = vector.shape_cast %28 : vector<1x1x8x64xf32> to vector<8x64xf32>
    %c2_i32_25 = arith.constant 2 : i32
    %30 = arith.muli %c2_i32_25, %arg1 : i32
    %c2_i32_26 = arith.constant 2 : i32
    %31 = arith.addi %30, %c2_i32_26 : i32
    %c0_27 = arith.constant 0 : index
    %32 = arith.index_cast %31 : i32 to index
    %c0_28 = arith.constant 0 : index
    %c0_29 = arith.constant 0 : index
    %33 = vector.load %arg3[%c0_27, %32, %c0_28, %c0_29] : memref<1x16x8x64xf32, #tpu.memory_space<vmem>>, vector<1x1x8x64xf32>
    %34 = vector.shape_cast %33 : vector<1x1x8x64xf32> to vector<8x64xf32>
    %c2_i32_30 = arith.constant 2 : i32
    %35 = arith.muli %c2_i32_30, %arg1 : i32
    %c3_i32_31 = arith.constant 3 : i32
    %36 = arith.addi %35, %c3_i32_31 : i32
    %c0_32 = arith.constant 0 : index
    %37 = arith.index_cast %36 : i32 to index
    %c0_33 = arith.constant 0 : index
    %c0_34 = arith.constant 0 : index
    %38 = vector.load %arg3[%c0_32, %37, %c0_33, %c0_34] : memref<1x16x8x64xf32, #tpu.memory_space<vmem>>, vector<1x1x8x64xf32>
    %39 = vector.shape_cast %38 : vector<1x1x8x64xf32> to vector<8x64xf32>
    %c0_35 = arith.constant 0 : index
    %c0_36 = arith.constant 0 : index
    %40 = vector.load %arg5[%c0_35, %c0_36] : memref<1x128xf32, #tpu.memory_space<vmem>>, vector<1x128xf32>
    %c0_37 = arith.constant 0 : index
    %c0_38 = arith.constant 0 : index
    %41 = vector.load %arg6[%c0_37, %c0_38] : memref<1x128xf32, #tpu.memory_space<vmem>>, vector<1x128xf32>
    %42 = vector.extract_strided_slice %4 {offsets = [0, 0], sizes = [7, 64], strides = [1, 1]} : vector<8x64xf32> to vector<7x64xf32>
    %43 = vector.extract_strided_slice %4 {offsets = [1, 0], sizes = [7, 64], strides = [1, 1]} : vector<8x64xf32> to vector<7x64xf32>
    %44 = vector.extract_strided_slice %24 {offsets = [0, 0], sizes = [7, 64], strides = [1, 1]} : vector<8x64xf32> to vector<7x64xf32>
    %45 = vector.extract_strided_slice %9 {offsets = [0, 0], sizes = [7, 64], strides = [1, 1]} : vector<8x64xf32> to vector<7x64xf32>
    %46 = vector.extract_strided_slice %9 {offsets = [1, 0], sizes = [7, 64], strides = [1, 1]} : vector<8x64xf32> to vector<7x64xf32>
    %47 = vector.extract_strided_slice %29 {offsets = [0, 0], sizes = [7, 64], strides = [1, 1]} : vector<8x64xf32> to vector<7x64xf32>
    %48 = vector.extract_strided_slice %14 {offsets = [0, 0], sizes = [7, 64], strides = [1, 1]} : vector<8x64xf32> to vector<7x64xf32>
    %49 = vector.extract_strided_slice %14 {offsets = [1, 0], sizes = [7, 64], strides = [1, 1]} : vector<8x64xf32> to vector<7x64xf32>
    %50 = vector.extract_strided_slice %34 {offsets = [0, 0], sizes = [7, 64], strides = [1, 1]} : vector<8x64xf32> to vector<7x64xf32>
    %51 = vector.extract_strided_slice %4 {offsets = [1, 0], sizes = [7, 64], strides = [1, 1]} : vector<8x64xf32> to vector<7x64xf32>
    %52 = vector.extract_strided_slice %24 {offsets = [0, 0], sizes = [7, 64], strides = [1, 1]} : vector<8x64xf32> to vector<7x64xf32>
    %53 = vector.extract_strided_slice %24 {offsets = [1, 0], sizes = [7, 64], strides = [1, 1]} : vector<8x64xf32> to vector<7x64xf32>
    %54 = vector.extract_strided_slice %9 {offsets = [1, 0], sizes = [7, 64], strides = [1, 1]} : vector<8x64xf32> to vector<7x64xf32>
    %55 = vector.extract_strided_slice %29 {offsets = [0, 0], sizes = [7, 64], strides = [1, 1]} : vector<8x64xf32> to vector<7x64xf32>
    %56 = vector.extract_strided_slice %29 {offsets = [1, 0], sizes = [7, 64], strides = [1, 1]} : vector<8x64xf32> to vector<7x64xf32>
    %57 = vector.extract_strided_slice %14 {offsets = [1, 0], sizes = [7, 64], strides = [1, 1]} : vector<8x64xf32> to vector<7x64xf32>
    %58 = vector.extract_strided_slice %34 {offsets = [0, 0], sizes = [7, 64], strides = [1, 1]} : vector<8x64xf32> to vector<7x64xf32>
    %59 = vector.extract_strided_slice %34 {offsets = [1, 0], sizes = [7, 64], strides = [1, 1]} : vector<8x64xf32> to vector<7x64xf32>
    %60 = vector.extract_strided_slice %9 {offsets = [0, 0], sizes = [7, 64], strides = [1, 1]} : vector<8x64xf32> to vector<7x64xf32>
    %61 = vector.extract_strided_slice %9 {offsets = [1, 0], sizes = [7, 64], strides = [1, 1]} : vector<8x64xf32> to vector<7x64xf32>
    %62 = vector.extract_strided_slice %29 {offsets = [0, 0], sizes = [7, 64], strides = [1, 1]} : vector<8x64xf32> to vector<7x64xf32>
    %63 = vector.extract_strided_slice %14 {offsets = [0, 0], sizes = [7, 64], strides = [1, 1]} : vector<8x64xf32> to vector<7x64xf32>
    %64 = vector.extract_strided_slice %14 {offsets = [1, 0], sizes = [7, 64], strides = [1, 1]} : vector<8x64xf32> to vector<7x64xf32>
    %65 = vector.extract_strided_slice %34 {offsets = [0, 0], sizes = [7, 64], strides = [1, 1]} : vector<8x64xf32> to vector<7x64xf32>
    %66 = vector.extract_strided_slice %19 {offsets = [0, 0], sizes = [7, 64], strides = [1, 1]} : vector<8x64xf32> to vector<7x64xf32>
    %67 = vector.extract_strided_slice %19 {offsets = [1, 0], sizes = [7, 64], strides = [1, 1]} : vector<8x64xf32> to vector<7x64xf32>
    %68 = vector.extract_strided_slice %39 {offsets = [0, 0], sizes = [7, 64], strides = [1, 1]} : vector<8x64xf32> to vector<7x64xf32>
    %69 = vector.extract_strided_slice %9 {offsets = [1, 0], sizes = [7, 64], strides = [1, 1]} : vector<8x64xf32> to vector<7x64xf32>
    %70 = vector.extract_strided_slice %29 {offsets = [0, 0], sizes = [7, 64], strides = [1, 1]} : vector<8x64xf32> to vector<7x64xf32>
    %71 = vector.extract_strided_slice %29 {offsets = [1, 0], sizes = [7, 64], strides = [1, 1]} : vector<8x64xf32> to vector<7x64xf32>
    %72 = vector.extract_strided_slice %14 {offsets = [1, 0], sizes = [7, 64], strides = [1, 1]} : vector<8x64xf32> to vector<7x64xf32>
    %73 = vector.extract_strided_slice %34 {offsets = [0, 0], sizes = [7, 64], strides = [1, 1]} : vector<8x64xf32> to vector<7x64xf32>
    %74 = vector.extract_strided_slice %34 {offsets = [1, 0], sizes = [7, 64], strides = [1, 1]} : vector<8x64xf32> to vector<7x64xf32>
    %75 = vector.extract_strided_slice %19 {offsets = [1, 0], sizes = [7, 64], strides = [1, 1]} : vector<8x64xf32> to vector<7x64xf32>
    %76 = vector.extract_strided_slice %39 {offsets = [0, 0], sizes = [7, 64], strides = [1, 1]} : vector<8x64xf32> to vector<7x64xf32>
    %77 = vector.extract_strided_slice %39 {offsets = [1, 0], sizes = [7, 64], strides = [1, 1]} : vector<8x64xf32> to vector<7x64xf32>
    %78 = tpu.concatenate %42, %44, %43, %45, %47, %46, %48, %50, %49 in 1 : vector<7x64xf32>, vector<7x64xf32>, vector<7x64xf32>, vector<7x64xf32>, vector<7x64xf32>, vector<7x64xf32>, vector<7x64xf32>, vector<7x64xf32>, vector<7x64xf32> -> vector<7x576xf32>
    %79 = tpu.concatenate %52, %51, %53, %55, %54, %56, %58, %57, %59 in 1 : vector<7x64xf32>, vector<7x64xf32>, vector<7x64xf32>, vector<7x64xf32>, vector<7x64xf32>, vector<7x64xf32>, vector<7x64xf32>, vector<7x64xf32>, vector<7x64xf32> -> vector<7x576xf32>
    %80 = tpu.concatenate %60, %62, %61, %63, %65, %64, %66, %68, %67 in 1 : vector<7x64xf32>, vector<7x64xf32>, vector<7x64xf32>, vector<7x64xf32>, vector<7x64xf32>, vector<7x64xf32>, vector<7x64xf32>, vector<7x64xf32>, vector<7x64xf32> -> vector<7x576xf32>
    %81 = tpu.concatenate %70, %69, %71, %73, %72, %74, %76, %75, %77 in 1 : vector<7x64xf32>, vector<7x64xf32>, vector<7x64xf32>, vector<7x64xf32>, vector<7x64xf32>, vector<7x64xf32>, vector<7x64xf32>, vector<7x64xf32>, vector<7x64xf32> -> vector<7x576xf32>
    %82 = tpu.concatenate %78, %79, %80, %81 in 0 : vector<7x576xf32>, vector<7x576xf32>, vector<7x576xf32>, vector<7x576xf32> -> vector<28x576xf32>
    %83 = arith.truncf %82 : vector<28x576xf32> to vector<28x576xbf16>
    %c0_39 = arith.constant 0 : index
    %c0_40 = arith.constant 0 : index
    %84 = vector.load %arg4[%c0_39, %c0_40] : memref<576x128xbf16, #tpu.memory_space<vmem>>, vector<576x128xbf16>
    %cst = arith.constant dense<0.000000e+00> : vector<28x128xf32>
    %85 = tpu.matmul %83, %84, %cst {dimension_numbers = #tpu.dot_dimension_numbers<[1], [0], [0], [1], [0, 0, 1, 1], [], []>} : vector<28x576xbf16>, vector<576x128xbf16>, vector<28x128xf32> -> vector<28x128xf32>
    %86 = vector.broadcast %40 : vector<1x128xf32> to vector<28x128xf32>
    %87 = arith.mulf %85, %86 : vector<28x128xf32>
    %88 = vector.broadcast %41 : vector<1x128xf32> to vector<28x128xf32>
    %89 = arith.addf %87, %88 : vector<28x128xf32>
    %cst_41 = arith.constant 0.000000e+00 : f32
    %90 = vector.broadcast %cst_41 : f32 to vector<28x128xf32>
    %91 = arith.maximumf %89, %90 : vector<28x128xf32>
    %92 = vector.extract_strided_slice %91 {offsets = [0, 0], sizes = [7, 128], strides = [1, 1]} : vector<28x128xf32> to vector<7x128xf32>
    %93 = vector.extract_strided_slice %91 {offsets = [7, 0], sizes = [7, 128], strides = [1, 1]} : vector<28x128xf32> to vector<7x128xf32>
    %94 = vector.extract_strided_slice %91 {offsets = [14, 0], sizes = [7, 128], strides = [1, 1]} : vector<28x128xf32> to vector<7x128xf32>
    %95 = vector.extract_strided_slice %91 {offsets = [21, 0], sizes = [7, 128], strides = [1, 1]} : vector<28x128xf32> to vector<7x128xf32>
    %96 = arith.maximumf %92, %93 : vector<7x128xf32>
    %97 = arith.maximumf %94, %95 : vector<7x128xf32>
    %98 = arith.maximumf %96, %97 : vector<7x128xf32>
    %c0_42 = arith.constant 0 : index
    %c0_43 = arith.constant 0 : index
    %c0_44 = arith.constant 0 : index
    %c0_45 = arith.constant 0 : index
    %99 = vector.load %arg7[%c0_42, %c0_43, %c0_44, %c0_45] : memref<1x1x7x128xf32, #tpu.memory_space<vmem>>, vector<1x1x7x128xf32>
    %100 = vector.shape_cast %99 : vector<1x1x7x128xf32> to vector<7x128xf32>
    %101 = vector.shape_cast %98 : vector<7x128xf32> to vector<1x1x7x128xf32>
    tpu.vector_store %arg7[%c0_42, %c0_43, %c0_44, %c0_45], %101 {strides = array<i32>} : memref<1x1x7x128xf32, #tpu.memory_space<vmem>>, vector<1x1x7x128xf32>,
    return
  }
  func.func @transform_0(%arg0: i32, %arg1: i32) -> (i32, i32, i32, i32) {
    %c0_i32 = arith.constant 0 : i32
    %c0_i32_0 = arith.constant 0 : i32
    %c0_i32_1 = arith.constant 0 : i32
    %c0_i32_2 = arith.constant 0 : i32
    return %arg0, %c0_i32, %c0_i32_0, %c0_i32_1 : i32, i32, i32, i32
  }
  func.func @transform_1(%arg0: i32, %arg1: i32) -> (i32, i32, i32, i32) {
    %c0_i32 = arith.constant 0 : i32
    %c0_i32_0 = arith.constant 0 : i32
    %c0_i32_1 = arith.constant 0 : i32
    %c0_i32_2 = arith.constant 0 : i32
    return %arg0, %c0_i32, %c0_i32_0, %c0_i32_1 : i32, i32, i32, i32
  }
  func.func @transform_2(%arg0: i32, %arg1: i32) -> (i32, i32) {
    %c0_i32 = arith.constant 0 : i32
    %c0_i32_0 = arith.constant 0 : i32
    %c0_i32_1 = arith.constant 0 : i32
    return %c0_i32, %c0_i32_0 : i32, i32
  }
  func.func @transform_3(%arg0: i32, %arg1: i32) -> (i32, i32) {
    %c0_i32 = arith.constant 0 : i32
    %c0_i32_0 = arith.constant 0 : i32
    %c0_i32_1 = arith.constant 0 : i32
    return %c0_i32, %c0_i32_0 : i32, i32
  }
  func.func @transform_4(%arg0: i32, %arg1: i32) -> (i32, i32) {
    %c0_i32 = arith.constant 0 : i32
    %c0_i32_0 = arith.constant 0 : i32
    %c0_i32_1 = arith.constant 0 : i32
    return %c0_i32, %c0_i32_0 : i32, i32
  }
  func.func @transform_5(%arg0: i32, %arg1: i32) -> (i32, i32, i32, i32) {
    %c0_i32 = arith.constant 0 : i32
    %c0_i32_0 = arith.constant 0 : i32
    %c0_i32_1 = arith.constant 0 : i32
    return %arg0, %arg1, %c0_i32, %c0_i32_0 : i32, i32, i32, i32
  }
}

module attributes {stable_mosaic.version = 11 : i64} {
  func.func @_conv_pool_kernel(%arg0: i32, %arg1: i32, %arg2: memref<1x7x4x128xf32, #tpu.memory_space<vmem>>, %arg3: memref<1x7x3x128xf32, #tpu.memory_space<vmem>>, %arg4: memref<1152x128xbf16, #tpu.memory_space<vmem>>, %arg5: memref<1x128xf32, #tpu.memory_space<vmem>>, %arg6: memref<1x128xf32, #tpu.memory_space<vmem>>, %arg7: memref<1x1x2x128xf32, #tpu.memory_space<vmem>>) attributes {dimension_semantics = [#tpu.dimension_semantics<parallel>, #tpu.dimension_semantics<parallel>], iteration_bounds = array<i64: 2, 2>, scalar_prefetch = 0 : i64, scratch_operands = 0 : i64, tpu.core_type = #tpu.core_type<tc>, window_params = [{transform_indices = @transform_0, window_bounds = array<i64: 1, 7, 4, 128>}, {transform_indices = @transform_1, window_bounds = array<i64: 1, 7, 3, 128>}, {pipeline_mode = #tpu.pipeline_mode<synchronous>, transform_indices = @transform_2, window_bounds = array<i64: 1152, 128>}, {pipeline_mode = #tpu.pipeline_mode<synchronous>, transform_indices = @transform_3, window_bounds = array<i64: 1, 128>}, {pipeline_mode = #tpu.pipeline_mode<synchronous>, transform_indices = @transform_4, window_bounds = array<i64: 1, 128>}, {transform_indices = @transform_5, window_bounds = array<i64: 1, 1, 2, 128>}]} {
    %c2_i32 = arith.constant 2 : i32
    %0 = arith.muli %c2_i32, %arg1 : i32
    %c0_i32 = arith.constant 0 : i32
    %1 = arith.addi %0, %c0_i32 : i32
    %c0 = arith.constant 0 : index
    %2 = arith.index_cast %1 : i32 to index
    %c0_0 = arith.constant 0 : index
    %c0_1 = arith.constant 0 : index
    %3 = vector.load %arg2[%c0, %2, %c0_0, %c0_1] : memref<1x7x4x128xf32, #tpu.memory_space<vmem>>, vector<1x1x4x128xf32>
    %4 = vector.shape_cast %3 : vector<1x1x4x128xf32> to vector<4x128xf32>
    %c2_i32_2 = arith.constant 2 : i32
    %5 = arith.muli %c2_i32_2, %arg1 : i32
    %c1_i32 = arith.constant 1 : i32
    %6 = arith.addi %5, %c1_i32 : i32
    %c0_3 = arith.constant 0 : index
    %7 = arith.index_cast %6 : i32 to index
    %c0_4 = arith.constant 0 : index
    %c0_5 = arith.constant 0 : index
    %8 = vector.load %arg2[%c0_3, %7, %c0_4, %c0_5] : memref<1x7x4x128xf32, #tpu.memory_space<vmem>>, vector<1x1x4x128xf32>
    %9 = vector.shape_cast %8 : vector<1x1x4x128xf32> to vector<4x128xf32>
    %c2_i32_6 = arith.constant 2 : i32
    %10 = arith.muli %c2_i32_6, %arg1 : i32
    %c2_i32_7 = arith.constant 2 : i32
    %11 = arith.addi %10, %c2_i32_7 : i32
    %c0_8 = arith.constant 0 : index
    %12 = arith.index_cast %11 : i32 to index
    %c0_9 = arith.constant 0 : index
    %c0_10 = arith.constant 0 : index
    %13 = vector.load %arg2[%c0_8, %12, %c0_9, %c0_10] : memref<1x7x4x128xf32, #tpu.memory_space<vmem>>, vector<1x1x4x128xf32>
    %14 = vector.shape_cast %13 : vector<1x1x4x128xf32> to vector<4x128xf32>
    %c2_i32_11 = arith.constant 2 : i32
    %15 = arith.muli %c2_i32_11, %arg1 : i32
    %c3_i32 = arith.constant 3 : i32
    %16 = arith.addi %15, %c3_i32 : i32
    %c0_12 = arith.constant 0 : index
    %17 = arith.index_cast %16 : i32 to index
    %c0_13 = arith.constant 0 : index
    %c0_14 = arith.constant 0 : index
    %18 = vector.load %arg2[%c0_12, %17, %c0_13, %c0_14] : memref<1x7x4x128xf32, #tpu.memory_space<vmem>>, vector<1x1x4x128xf32>
    %19 = vector.shape_cast %18 : vector<1x1x4x128xf32> to vector<4x128xf32>
    %c2_i32_15 = arith.constant 2 : i32
    %20 = arith.muli %c2_i32_15, %arg1 : i32
    %c0_i32_16 = arith.constant 0 : i32
    %21 = arith.addi %20, %c0_i32_16 : i32
    %c0_17 = arith.constant 0 : index
    %22 = arith.index_cast %21 : i32 to index
    %c0_18 = arith.constant 0 : index
    %c0_19 = arith.constant 0 : index
    %23 = vector.load %arg3[%c0_17, %22, %c0_18, %c0_19] : memref<1x7x3x128xf32, #tpu.memory_space<vmem>>, vector<1x1x3x128xf32>
    %24 = vector.shape_cast %23 : vector<1x1x3x128xf32> to vector<3x128xf32>
    %c2_i32_20 = arith.constant 2 : i32
    %25 = arith.muli %c2_i32_20, %arg1 : i32
    %c1_i32_21 = arith.constant 1 : i32
    %26 = arith.addi %25, %c1_i32_21 : i32
    %c0_22 = arith.constant 0 : index
    %27 = arith.index_cast %26 : i32 to index
    %c0_23 = arith.constant 0 : index
    %c0_24 = arith.constant 0 : index
    %28 = vector.load %arg3[%c0_22, %27, %c0_23, %c0_24] : memref<1x7x3x128xf32, #tpu.memory_space<vmem>>, vector<1x1x3x128xf32>
    %29 = vector.shape_cast %28 : vector<1x1x3x128xf32> to vector<3x128xf32>
    %c2_i32_25 = arith.constant 2 : i32
    %30 = arith.muli %c2_i32_25, %arg1 : i32
    %c2_i32_26 = arith.constant 2 : i32
    %31 = arith.addi %30, %c2_i32_26 : i32
    %c0_27 = arith.constant 0 : index
    %32 = arith.index_cast %31 : i32 to index
    %c0_28 = arith.constant 0 : index
    %c0_29 = arith.constant 0 : index
    %33 = vector.load %arg3[%c0_27, %32, %c0_28, %c0_29] : memref<1x7x3x128xf32, #tpu.memory_space<vmem>>, vector<1x1x3x128xf32>
    %34 = vector.shape_cast %33 : vector<1x1x3x128xf32> to vector<3x128xf32>
    %c2_i32_30 = arith.constant 2 : i32
    %35 = arith.muli %c2_i32_30, %arg1 : i32
    %c3_i32_31 = arith.constant 3 : i32
    %36 = arith.addi %35, %c3_i32_31 : i32
    %c0_32 = arith.constant 0 : index
    %37 = arith.index_cast %36 : i32 to index
    %c0_33 = arith.constant 0 : index
    %c0_34 = arith.constant 0 : index
    %38 = vector.load %arg3[%c0_32, %37, %c0_33, %c0_34] : memref<1x7x3x128xf32, #tpu.memory_space<vmem>>, vector<1x1x3x128xf32>
    %39 = vector.shape_cast %38 : vector<1x1x3x128xf32> to vector<3x128xf32>
    %c0_35 = arith.constant 0 : index
    %c0_36 = arith.constant 0 : index
    %40 = vector.load %arg5[%c0_35, %c0_36] : memref<1x128xf32, #tpu.memory_space<vmem>>, vector<1x128xf32>
    %c0_37 = arith.constant 0 : index
    %c0_38 = arith.constant 0 : index
    %41 = vector.load %arg6[%c0_37, %c0_38] : memref<1x128xf32, #tpu.memory_space<vmem>>, vector<1x128xf32>
    %42 = vector.extract_strided_slice %4 {offsets = [0, 0], sizes = [2, 128], strides = [1, 1]} : vector<4x128xf32> to vector<2x128xf32>
    %43 = vector.extract_strided_slice %4 {offsets = [1, 0], sizes = [2, 128], strides = [1, 1]} : vector<4x128xf32> to vector<2x128xf32>
    %44 = vector.extract_strided_slice %24 {offsets = [0, 0], sizes = [2, 128], strides = [1, 1]} : vector<3x128xf32> to vector<2x128xf32>
    %45 = vector.extract_strided_slice %9 {offsets = [0, 0], sizes = [2, 128], strides = [1, 1]} : vector<4x128xf32> to vector<2x128xf32>
    %46 = vector.extract_strided_slice %9 {offsets = [1, 0], sizes = [2, 128], strides = [1, 1]} : vector<4x128xf32> to vector<2x128xf32>
    %47 = vector.extract_strided_slice %29 {offsets = [0, 0], sizes = [2, 128], strides = [1, 1]} : vector<3x128xf32> to vector<2x128xf32>
    %48 = vector.extract_strided_slice %14 {offsets = [0, 0], sizes = [2, 128], strides = [1, 1]} : vector<4x128xf32> to vector<2x128xf32>
    %49 = vector.extract_strided_slice %14 {offsets = [1, 0], sizes = [2, 128], strides = [1, 1]} : vector<4x128xf32> to vector<2x128xf32>
    %50 = vector.extract_strided_slice %34 {offsets = [0, 0], sizes = [2, 128], strides = [1, 1]} : vector<3x128xf32> to vector<2x128xf32>
    %51 = vector.extract_strided_slice %4 {offsets = [1, 0], sizes = [2, 128], strides = [1, 1]} : vector<4x128xf32> to vector<2x128xf32>
    %52 = vector.extract_strided_slice %24 {offsets = [0, 0], sizes = [2, 128], strides = [1, 1]} : vector<3x128xf32> to vector<2x128xf32>
    %53 = vector.extract_strided_slice %24 {offsets = [1, 0], sizes = [2, 128], strides = [1, 1]} : vector<3x128xf32> to vector<2x128xf32>
    %54 = vector.extract_strided_slice %9 {offsets = [1, 0], sizes = [2, 128], strides = [1, 1]} : vector<4x128xf32> to vector<2x128xf32>
    %55 = vector.extract_strided_slice %29 {offsets = [0, 0], sizes = [2, 128], strides = [1, 1]} : vector<3x128xf32> to vector<2x128xf32>
    %56 = vector.extract_strided_slice %29 {offsets = [1, 0], sizes = [2, 128], strides = [1, 1]} : vector<3x128xf32> to vector<2x128xf32>
    %57 = vector.extract_strided_slice %14 {offsets = [1, 0], sizes = [2, 128], strides = [1, 1]} : vector<4x128xf32> to vector<2x128xf32>
    %58 = vector.extract_strided_slice %34 {offsets = [0, 0], sizes = [2, 128], strides = [1, 1]} : vector<3x128xf32> to vector<2x128xf32>
    %59 = vector.extract_strided_slice %34 {offsets = [1, 0], sizes = [2, 128], strides = [1, 1]} : vector<3x128xf32> to vector<2x128xf32>
    %60 = vector.extract_strided_slice %9 {offsets = [0, 0], sizes = [2, 128], strides = [1, 1]} : vector<4x128xf32> to vector<2x128xf32>
    %61 = vector.extract_strided_slice %9 {offsets = [1, 0], sizes = [2, 128], strides = [1, 1]} : vector<4x128xf32> to vector<2x128xf32>
    %62 = vector.extract_strided_slice %29 {offsets = [0, 0], sizes = [2, 128], strides = [1, 1]} : vector<3x128xf32> to vector<2x128xf32>
    %63 = vector.extract_strided_slice %14 {offsets = [0, 0], sizes = [2, 128], strides = [1, 1]} : vector<4x128xf32> to vector<2x128xf32>
    %64 = vector.extract_strided_slice %14 {offsets = [1, 0], sizes = [2, 128], strides = [1, 1]} : vector<4x128xf32> to vector<2x128xf32>
    %65 = vector.extract_strided_slice %34 {offsets = [0, 0], sizes = [2, 128], strides = [1, 1]} : vector<3x128xf32> to vector<2x128xf32>
    %66 = vector.extract_strided_slice %19 {offsets = [0, 0], sizes = [2, 128], strides = [1, 1]} : vector<4x128xf32> to vector<2x128xf32>
    %67 = vector.extract_strided_slice %19 {offsets = [1, 0], sizes = [2, 128], strides = [1, 1]} : vector<4x128xf32> to vector<2x128xf32>
    %68 = vector.extract_strided_slice %39 {offsets = [0, 0], sizes = [2, 128], strides = [1, 1]} : vector<3x128xf32> to vector<2x128xf32>
    %69 = vector.extract_strided_slice %9 {offsets = [1, 0], sizes = [2, 128], strides = [1, 1]} : vector<4x128xf32> to vector<2x128xf32>
    %70 = vector.extract_strided_slice %29 {offsets = [0, 0], sizes = [2, 128], strides = [1, 1]} : vector<3x128xf32> to vector<2x128xf32>
    %71 = vector.extract_strided_slice %29 {offsets = [1, 0], sizes = [2, 128], strides = [1, 1]} : vector<3x128xf32> to vector<2x128xf32>
    %72 = vector.extract_strided_slice %14 {offsets = [1, 0], sizes = [2, 128], strides = [1, 1]} : vector<4x128xf32> to vector<2x128xf32>
    %73 = vector.extract_strided_slice %34 {offsets = [0, 0], sizes = [2, 128], strides = [1, 1]} : vector<3x128xf32> to vector<2x128xf32>
    %74 = vector.extract_strided_slice %34 {offsets = [1, 0], sizes = [2, 128], strides = [1, 1]} : vector<3x128xf32> to vector<2x128xf32>
    %75 = vector.extract_strided_slice %19 {offsets = [1, 0], sizes = [2, 128], strides = [1, 1]} : vector<4x128xf32> to vector<2x128xf32>
    %76 = vector.extract_strided_slice %39 {offsets = [0, 0], sizes = [2, 128], strides = [1, 1]} : vector<3x128xf32> to vector<2x128xf32>
    %77 = vector.extract_strided_slice %39 {offsets = [1, 0], sizes = [2, 128], strides = [1, 1]} : vector<3x128xf32> to vector<2x128xf32>
    %78 = tpu.concatenate %42, %44, %43, %45, %47, %46, %48, %50, %49 in 1 : vector<2x128xf32>, vector<2x128xf32>, vector<2x128xf32>, vector<2x128xf32>, vector<2x128xf32>, vector<2x128xf32>, vector<2x128xf32>, vector<2x128xf32>, vector<2x128xf32> -> vector<2x1152xf32>
    %79 = tpu.concatenate %52, %51, %53, %55, %54, %56, %58, %57, %59 in 1 : vector<2x128xf32>, vector<2x128xf32>, vector<2x128xf32>, vector<2x128xf32>, vector<2x128xf32>, vector<2x128xf32>, vector<2x128xf32>, vector<2x128xf32>, vector<2x128xf32> -> vector<2x1152xf32>
    %80 = tpu.concatenate %60, %62, %61, %63, %65, %64, %66, %68, %67 in 1 : vector<2x128xf32>, vector<2x128xf32>, vector<2x128xf32>, vector<2x128xf32>, vector<2x128xf32>, vector<2x128xf32>, vector<2x128xf32>, vector<2x128xf32>, vector<2x128xf32> -> vector<2x1152xf32>
    %81 = tpu.concatenate %70, %69, %71, %73, %72, %74, %76, %75, %77 in 1 : vector<2x128xf32>, vector<2x128xf32>, vector<2x128xf32>, vector<2x128xf32>, vector<2x128xf32>, vector<2x128xf32>, vector<2x128xf32>, vector<2x128xf32>, vector<2x128xf32> -> vector<2x1152xf32>
    %82 = tpu.concatenate %78, %79, %80, %81 in 0 : vector<2x1152xf32>, vector<2x1152xf32>, vector<2x1152xf32>, vector<2x1152xf32> -> vector<8x1152xf32>
    %83 = arith.truncf %82 : vector<8x1152xf32> to vector<8x1152xbf16>
    %c0_39 = arith.constant 0 : index
    %c0_40 = arith.constant 0 : index
    %84 = vector.load %arg4[%c0_39, %c0_40] : memref<1152x128xbf16, #tpu.memory_space<vmem>>, vector<1152x128xbf16>
    %cst = arith.constant dense<0.000000e+00> : vector<8x128xf32>
    %85 = tpu.matmul %83, %84, %cst {dimension_numbers = #tpu.dot_dimension_numbers<[1], [0], [0], [1], [0, 0, 1, 1], [], []>} : vector<8x1152xbf16>, vector<1152x128xbf16>, vector<8x128xf32> -> vector<8x128xf32>
    %86 = vector.broadcast %40 : vector<1x128xf32> to vector<8x128xf32>
    %87 = arith.mulf %85, %86 : vector<8x128xf32>
    %88 = vector.broadcast %41 : vector<1x128xf32> to vector<8x128xf32>
    %89 = arith.addf %87, %88 : vector<8x128xf32>
    %cst_41 = arith.constant 0.000000e+00 : f32
    %90 = vector.broadcast %cst_41 : f32 to vector<8x128xf32>
    %91 = arith.maximumf %89, %90 : vector<8x128xf32>
    %92 = vector.extract_strided_slice %91 {offsets = [0, 0], sizes = [2, 128], strides = [1, 1]} : vector<8x128xf32> to vector<2x128xf32>
    %93 = vector.extract_strided_slice %91 {offsets = [2, 0], sizes = [2, 128], strides = [1, 1]} : vector<8x128xf32> to vector<2x128xf32>
    %94 = vector.extract_strided_slice %91 {offsets = [4, 0], sizes = [2, 128], strides = [1, 1]} : vector<8x128xf32> to vector<2x128xf32>
    %95 = vector.extract_strided_slice %91 {offsets = [6, 0], sizes = [2, 128], strides = [1, 1]} : vector<8x128xf32> to vector<2x128xf32>
    %96 = arith.maximumf %92, %93 : vector<2x128xf32>
    %97 = arith.maximumf %94, %95 : vector<2x128xf32>
    %98 = arith.maximumf %96, %97 : vector<2x128xf32>
    %c0_42 = arith.constant 0 : index
    %c0_43 = arith.constant 0 : index
    %c0_44 = arith.constant 0 : index
    %c0_45 = arith.constant 0 : index
    %99 = vector.load %arg7[%c0_42, %c0_43, %c0_44, %c0_45] : memref<1x1x2x128xf32, #tpu.memory_space<vmem>>, vector<1x1x2x128xf32>
    %100 = vector.shape_cast %99 : vector<1x1x2x128xf32> to vector<2x128xf32>
    %101 = vector.shape_cast %98 : vector<2x128xf32> to vector<1x1x2x128xf32>
    tpu.vector_store %arg7[%c0_42, %c0_43, %c0_44, %c0_45], %101 {strides = array<i32>} : memref<1x1x2x128xf32, #tpu.memory_space<vmem>>, vector<1x1x2x128xf32>,
    return
  }
  func.func @transform_0(%arg0: i32, %arg1: i32) -> (i32, i32, i32, i32) {
    %c0_i32 = arith.constant 0 : i32
    %c0_i32_0 = arith.constant 0 : i32
    %c0_i32_1 = arith.constant 0 : i32
    %c0_i32_2 = arith.constant 0 : i32
    return %arg0, %c0_i32, %c0_i32_0, %c0_i32_1 : i32, i32, i32, i32
  }
  func.func @transform_1(%arg0: i32, %arg1: i32) -> (i32, i32, i32, i32) {
    %c0_i32 = arith.constant 0 : i32
    %c0_i32_0 = arith.constant 0 : i32
    %c0_i32_1 = arith.constant 0 : i32
    %c0_i32_2 = arith.constant 0 : i32
    return %arg0, %c0_i32, %c0_i32_0, %c0_i32_1 : i32, i32, i32, i32
  }
  func.func @transform_2(%arg0: i32, %arg1: i32) -> (i32, i32) {
    %c0_i32 = arith.constant 0 : i32
    %c0_i32_0 = arith.constant 0 : i32
    %c0_i32_1 = arith.constant 0 : i32
    return %c0_i32, %c0_i32_0 : i32, i32
  }
  func.func @transform_3(%arg0: i32, %arg1: i32) -> (i32, i32) {
    %c0_i32 = arith.constant 0 : i32
    %c0_i32_0 = arith.constant 0 : i32
    %c0_i32_1 = arith.constant 0 : i32
    return %c0_i32, %c0_i32_0 : i32, i32
  }
  func.func @transform_4(%arg0: i32, %arg1: i32) -> (i32, i32) {
    %c0_i32 = arith.constant 0 : i32
    %c0_i32_0 = arith.constant 0 : i32
    %c0_i32_1 = arith.constant 0 : i32
    return %c0_i32, %c0_i32_0 : i32, i32
  }
  func.func @transform_5(%arg0: i32, %arg1: i32) -> (i32, i32, i32, i32) {
    %c0_i32 = arith.constant 0 : i32
    %c0_i32_0 = arith.constant 0 : i32
    %c0_i32_1 = arith.constant 0 : i32
    return %arg0, %arg1, %c0_i32, %c0_i32_0 : i32, i32, i32, i32
  }
}

module attributes {stable_mosaic.version = 11 : i64} {
  func.func @_fc_head_kernel(%arg0: i32, %arg1: memref<2x512xf32, #tpu.memory_space<vmem>>, %arg2: memref<512x256xbf16, #tpu.memory_space<vmem>>, %arg3: memref<1x256xf32, #tpu.memory_space<vmem>>, %arg4: memref<256x10xbf16, #tpu.memory_space<vmem>>, %arg5: memref<1x10xf32, #tpu.memory_space<vmem>>, %arg6: memref<2x10xf32, #tpu.memory_space<vmem>>) attributes {dimension_semantics = [#tpu.dimension_semantics<parallel>], iteration_bounds = array<i64: 1>, scalar_prefetch = 0 : i64, scratch_operands = 0 : i64, tpu.core_type = #tpu.core_type<tc>, window_params = [{transform_indices = @transform_0, window_bounds = array<i64: 2, 512>}, {pipeline_mode = #tpu.pipeline_mode<synchronous>, transform_indices = @transform_1, window_bounds = array<i64: 512, 256>}, {pipeline_mode = #tpu.pipeline_mode<synchronous>, transform_indices = @transform_2, window_bounds = array<i64: 1, 256>}, {pipeline_mode = #tpu.pipeline_mode<synchronous>, transform_indices = @transform_3, window_bounds = array<i64: 256, 10>}, {pipeline_mode = #tpu.pipeline_mode<synchronous>, transform_indices = @transform_4, window_bounds = array<i64: 1, 10>}, {transform_indices = @transform_5, window_bounds = array<i64: 2, 10>}]} {
    %c0 = arith.constant 0 : index
    %c0_0 = arith.constant 0 : index
    %0 = vector.load %arg1[%c0, %c0_0] : memref<2x512xf32, #tpu.memory_space<vmem>>, vector<2x512xf32>
    %1 = arith.truncf %0 : vector<2x512xf32> to vector<2x512xbf16>
    %c0_1 = arith.constant 0 : index
    %c0_2 = arith.constant 0 : index
    %2 = vector.load %arg2[%c0_1, %c0_2] : memref<512x256xbf16, #tpu.memory_space<vmem>>, vector<512x256xbf16>
    %cst = arith.constant dense<0.000000e+00> : vector<2x256xf32>
    %3 = tpu.matmul %1, %2, %cst {dimension_numbers = #tpu.dot_dimension_numbers<[1], [0], [0], [1], [0, 0, 1, 1], [], []>} : vector<2x512xbf16>, vector<512x256xbf16>, vector<2x256xf32> -> vector<2x256xf32>
    %c0_3 = arith.constant 0 : index
    %c0_4 = arith.constant 0 : index
    %4 = vector.load %arg3[%c0_3, %c0_4] : memref<1x256xf32, #tpu.memory_space<vmem>>, vector<1x256xf32>
    %5 = vector.broadcast %4 : vector<1x256xf32> to vector<2x256xf32>
    %6 = arith.addf %3, %5 : vector<2x256xf32>
    %cst_5 = arith.constant 0.000000e+00 : f32
    %7 = vector.broadcast %cst_5 : f32 to vector<2x256xf32>
    %8 = arith.maximumf %6, %7 : vector<2x256xf32>
    %9 = arith.truncf %8 : vector<2x256xf32> to vector<2x256xbf16>
    %c0_6 = arith.constant 0 : index
    %c0_7 = arith.constant 0 : index
    %10 = vector.load %arg4[%c0_6, %c0_7] : memref<256x10xbf16, #tpu.memory_space<vmem>>, vector<256x10xbf16>
    %cst_8 = arith.constant dense<0.000000e+00> : vector<2x10xf32>
    %11 = tpu.matmul %9, %10, %cst_8 {dimension_numbers = #tpu.dot_dimension_numbers<[1], [0], [0], [1], [0, 0, 1, 1], [], []>} : vector<2x256xbf16>, vector<256x10xbf16>, vector<2x10xf32> -> vector<2x10xf32>
    %c0_9 = arith.constant 0 : index
    %c0_10 = arith.constant 0 : index
    %12 = vector.load %arg5[%c0_9, %c0_10] : memref<1x10xf32, #tpu.memory_space<vmem>>, vector<1x10xf32>
    %13 = vector.broadcast %12 : vector<1x10xf32> to vector<2x10xf32>
    %14 = arith.addf %11, %13 : vector<2x10xf32>
    %cst_11 = arith.constant dense<0xFF800000> : vector<2xf32>
    %15 = vector.multi_reduction <maximumf>, %14, %cst_11 [1] : vector<2x10xf32> to vector<2xf32>
    %16 = vector.shape_cast %15 : vector<2xf32> to vector<2x1xf32>
    %17 = vector.broadcast %16 : vector<2x1xf32> to vector<2x10xf32>
    %18 = arith.subf %14, %17 : vector<2x10xf32>
    %19 = math.exp %18 : vector<2x10xf32>
    %cst_12 = arith.constant dense<0.000000e+00> : vector<2xf32>
    %20 = vector.multi_reduction <add>, %19, %cst_12 [1] : vector<2x10xf32> to vector<2xf32>
    %21 = vector.shape_cast %20 : vector<2xf32> to vector<2x1xf32>
    %22 = math.log %21 : vector<2x1xf32>
    %23 = arith.addf %22, %16 : vector<2x1xf32>
    %24 = vector.broadcast %23 : vector<2x1xf32> to vector<2x10xf32>
    %25 = arith.subf %14, %24 : vector<2x10xf32>
    %c0_13 = arith.constant 0 : index
    %c0_14 = arith.constant 0 : index
    %26 = vector.load %arg6[%c0_13, %c0_14] : memref<2x10xf32, #tpu.memory_space<vmem>>, vector<2x10xf32>
    tpu.vector_store %arg6[%c0_13, %c0_14], %25 {strides = array<i32>} : memref<2x10xf32, #tpu.memory_space<vmem>>, vector<2x10xf32>,
    return
  }
  func.func @transform_0(%arg0: i32) -> (i32, i32) {
    %c0_i32 = arith.constant 0 : i32
    %c0_i32_0 = arith.constant 0 : i32
    return %arg0, %c0_i32 : i32, i32
  }
  func.func @transform_1(%arg0: i32) -> (i32, i32) {
    %c0_i32 = arith.constant 0 : i32
    %c0_i32_0 = arith.constant 0 : i32
    %c0_i32_1 = arith.constant 0 : i32
    return %c0_i32, %c0_i32_0 : i32, i32
  }
  func.func @transform_2(%arg0: i32) -> (i32, i32) {
    %c0_i32 = arith.constant 0 : i32
    %c0_i32_0 = arith.constant 0 : i32
    %c0_i32_1 = arith.constant 0 : i32
    return %c0_i32, %c0_i32_0 : i32, i32
  }
  func.func @transform_3(%arg0: i32) -> (i32, i32) {
    %c0_i32 = arith.constant 0 : i32
    %c0_i32_0 = arith.constant 0 : i32
    %c0_i32_1 = arith.constant 0 : i32
    return %c0_i32, %c0_i32_0 : i32, i32
  }
  func.func @transform_4(%arg0: i32) -> (i32, i32) {
    %c0_i32 = arith.constant 0 : i32
    %c0_i32_0 = arith.constant 0 : i32
    %c0_i32_1 = arith.constant 0 : i32
    return %c0_i32, %c0_i32_0 : i32, i32
  }
  func.func @transform_5(%arg0: i32) -> (i32, i32) {
    %c0_i32 = arith.constant 0 : i32
    %c0_i32_0 = arith.constant 0 : i32
    return %arg0, %c0_i32 : i32, i32
  }
}

</mosaic_0001>

<bundles_post_ra>
// kernel: forward.4
= control target key start
LH: loop header
LB: loop body
LE: loop exit
PB: predicated region body
PF: predicated region fallthrough
CT: control target
= control target key end

     0   :  { %s1017_s18 = smov 0   ;;  %s1019_s19 = smov 0   ;;  %s1310_s0 = inlined_call_operand.vmem [shape: f32[2,30,15,1], index: 0, kind: input, shape index: {}]   ;;  %s1311_s1 = inlined_call_operand.vmem [shape: f32[2,30,15,1], index: 1, kind: input, shape index: {}]   ;;  %s1312_s2 = inlined_call_operand.vmem [shape: f32[9,64], index: 2, kind: input, shape index: {}]   ;;  %s1313_s3 = inlined_call_operand.vmem [shape: f32[1,64], index: 3, kind: input, shape index: {}]   ;;  %s1314_s4 = inlined_call_operand.vmem [shape: f32[1,64], index: 4, kind: input, shape index: {}]   ;;  %s1315_s5 = inlined_call_operand.vmem [shape: f32[2,14,14,64], index: 5, kind: output, shape index: {}]  }
   0x1   :  { %s1021_s20 = smov 0   ;;  %s1023_s21 = smov 0  }
   0x2   :  { %s1025_s22 = smov 0  }
   0x3 LB: > { %s24_s23 = sadd.s32 1, %s976_s20  ;;  %s27_s24 = sadd.s32 1, %s980_s21  ;;  %s984_s22 = sphi %s1025_s22, %s15_s22   ;;  %s980_s21 = sphi %s1023_s21, %s1319_s21   ;;  %s976_s20 = sphi %s1021_s20, %s1318_s20   ;;  %s972_s19 = sphi %s1019_s19, %s1317_s19   ;;  %s968_s18 = sphi %s1017_s18, %s1316_s18  }
   0x4   : > { %p25_p0 = scmp.ge.s32.totalorder %s24_s23, 14  ;;  %p858_p1 = scmp.ge.s32.totalorder %s984_s22, 1 }
   0x5   : > { %p211_p2 = scmp.lt.s32.totalorder %s984_s22, 29 }
   0x6   : > { %s1321_s23 = smov (%p25_p0, %s24_s23), 0  ;;  %s1323_s24 = smov (!%p25_p0, %s27_s24), %s980_s21 }
   0x7   : > { %p212_p3 = pnand %p858_p1, %p211_p2  ;;  %p29_p4 = scmp.ge.s32.totalorder %s1323_s24, 2 }
   0x8   : > { %p248_p5 = scmp.lt.s32.totalorder (!%p212_p3), %s972_s19, 1  ;;  %v986_v0 = vmov (!%p212_p3), 0   ;;  %s894_s26 = sshll.u32 (!%p212_p3), %s968_s18, 5  ;;  %v313_v17 = vlaneseq (!%p212_p3)  ;;  %v301_v20 = vld [vmem:[%s1312_s2] sm:$0xff] (!%p212_p3)  ;;  %vm345_vm0 = vcmask (!%p212_p3), 1046528   ;;  %vm726_vm1 = vcmask (!%p212_p3), 521216  }
   0x9   : > { %s1325_s24 = smov (%p29_p4, %s1323_s24), 0  ;;  %215 = sbr.rel (%p212_p3) target bundleno = 217 (0xd9), region = 40 }
   0xa   : > { %945 = vset.pattern.permute.xlu1 (!%p212_p3), %v986_v0  ;;  %944 = vset.pattern.permute.xlu0 (!%p212_p3), %v986_v0  ;;  %v314_v18 = vshrl.u32 (!%p212_p3), %v313_v17, 7  ;;  %p260_p6 = scmp.lt.s32.totalorder (!%p212_p3), %s968_s18, 13  ;;  %vm724_vm2 = vcmask (!%p212_p3), 523264  }
   0xc   : > { %v331_v19 = vsub.s32 (!%p212_p3), 1, %v314_v18  ;;  %v391_v21 = vsub.s32 (!%p212_p3), 5, %v314_v18  ;;  %v315_v22 = vsub.s32 (!%p212_p3), 0, %v314_v18  ;;  %v339_v23 = vsub.s32 (!%p212_p3), 2, %v314_v18 }
   0xd   : > { %v383_v26 = vsub.s32 (!%p212_p3), 4, %v314_v18  ;;  %v365_v28 = vsub.s32 (!%p212_p3), 3, %v314_v18  ;;  %v416_v30 = vsub.s32 (!%p212_p3), 6, %v314_v18  ;;  %v434_v31 = vsub.s32 (!%p212_p3), 7, %v314_v18 }
   0xe   : > { %v1064_v27 = vrot.slane (!%p212_p3), %v301_v20, %v331_v19  ;;  %v1066_v29 = vrot.slane (!%p212_p3), %v301_v20, %v391_v21  ;;  %v1068_v32 = vrot.slane (!%p212_p3), %v301_v20, %v315_v22  ;;  %v1070_v33 = vrot.slane (!%p212_p3), %v301_v20, %v339_v23 }
   0xf   : > { %v1074_v36 = vrot.slane (!%p212_p3), %v301_v20, %v383_v26  ;;  %v1079_v40 = vrot.slane (!%p212_p3), %v301_v20, %v365_v28  ;;  %v1085_v42 = vrot.slane (!%p212_p3), %v301_v20, %v416_v30  ;;  %v1087_v43 = vrot.slane (!%p212_p3), %v301_v20, %v434_v31 }
  0x10   : > { %s1327_s19 = smov (!%p248_p5, %s972_s19), 1  ;;  %s1329_s18 = smov (!%p260_p6, %s968_s18), 13 }
  0x11   : > { %s901_s25 = smul.u32 480, %s1327_s19 }
  0x13   : > { %s252_s29 = scalar_lea.vmem %s1310_s0, %s901_s25  ;;  %s257_s8 = scalar_lea.vmem %s1311_s1, %s901_s25 }
  0x14   : > { %s269_s30 = scalar_lea.vmem %s252_s29, %s894_s26  ;;  %s287_s9 = scalar_lea.vmem %s257_s8, %s894_s26 }
  0x15   : > { %v867_v1 = vld [vmem:[%s269_s30 + $0x10] sm:$0xff]  ;;  %v270_v2 = vld [vmem:[%s269_s30] sm:$0xff]  ;;  %v868_v3 = vld [vmem:[%s269_s30 + $0x18] sm:$0x7f]  ;;  %s902_s25 = smul.u32 28, %s1327_s19  ;;  %s861_s26 = sshll.u32 %s1329_s18, 1 }
  0x16   : > { %355 = vperm.xlu1 %945, %v867_v1   ;;  %305 = vperm.xlu0 %944, %v270_v2   ;;  %v271_v4 = vld [vmem:[%s269_s30 + $0x8] sm:$0x7f]  ;;  %v288_v6 = vld [vmem:[%s287_s9] sm:$0xff]  ;;  %v880_v7 = vld [vmem:[%s287_s9 + $0x18] sm:$0x7f] }
  0x17   : > { %v289_v5 = vld [vmem:[%s287_s9 + $0x8] sm:$0x7f]  ;;  %v879_v8 = vld [vmem:[%s287_s9 + $0x10] sm:$0xff]  ;;  %v871_v10 = vld [vmem:[%s269_s30 + $0x20] sm:$0xff]  ;;  %s264_s19 = sadd.s32 %s902_s25, %s861_s26 }
  0x18   : > { %v872_v9 = vld [vmem:[%s269_s30 + $0x28] sm:$0x7f]  ;;  %v883_v12 = vld [vmem:[%s287_s9 + $0x20] sm:$0xff]  ;;  %v876_v13 = vld [vmem:[%s269_s30 + $0x38] sm:$0x7f]  ;;  %s862_s18 = sshll.u32 %s264_s19, 3 }
  0x19   : > { %v884_v11 = vld [vmem:[%s287_s9 + $0x28] sm:$0x7f]  ;;  %v875_v14 = vld [vmem:[%s269_s30 + $0x30] sm:$0xff]  ;;  %v888_v15 = vld [vmem:[%s287_s9 + $0x38] sm:$0x7f]  ;;  %s266_s29 = scalar_lea.vmem %s1315_s5, %s862_s18 }
  0x1a   : > { %360 = vperm.xlu1 %945, %v868_v3   ;;  %310 = vperm.xlu0 %944, %v271_v4   ;;  %v887_v16 = vld [vmem:[%s287_s9 + $0x30] sm:$0xff] }
  0x1e   : > { %326 = vperm.xlu1 %945, %v289_v5   ;;  %321 = vperm.xlu0 %944, %v288_v6  }
  0x22   : > { %378 = vperm.xlu1 %945, %v880_v7   ;;  %373 = vperm.xlu0 %944, %v879_v8  }
  0x26   : > { %411 = vperm.xlu1 %945, %v872_v9   ;;  %406 = vperm.xlu0 %944, %v871_v10  }
  0x2a   : > { %429 = vperm.xlu1 %945, %v884_v11   ;;  %424 = vperm.xlu0 %944, %v883_v12  }
  0x2e   : > { %598 = vperm.xlu1 %945, %v876_v13   ;;  %593 = vperm.xlu0 %944, %v875_v14  }
  0x32   : > { %612 = vperm.xlu1 %945, %v888_v15   ;;  %607 = vperm.xlu0 %944, %v887_v16  }
  0x95   : > { %v1062_v24 = vpop.permute.xlu1 %355  ;;  %v306_v25 = vpop.permute.xlu0 %305 }
  0x96   : > { %v475_v37 = vmul.f32 %v1064_v27, %v306_v25  ;;  %v1083_v41 = vmul.f32 %v1066_v29, %v1062_v24  ;;  %v317_v44 = vmul.f32 %v1068_v32, %v306_v25  ;;  %v341_v45 = vmul.f32 %v1070_v33, %v306_v25 }
  0x97   : > { %v501_v62 = vmul.f32 %v1074_v36, %v1062_v24  ;;  %v1103_v3 = vmul.f32 %v1062_v24, %v1070_v33  ;;  %v555_v11 = vmul.f32 %v1062_v24, %v1068_v32  ;;  %v1117_v12 = vmul.f32 %v1062_v24, %v1064_v27 }
  0x98   : > { %v479_v54 = vrot.slane %v475_v37, 1  ;;  %v346_v63 = vrot.slane %v341_v45, 1  ;;  %v397_v15 = vrot.slane %v1083_v41, 1  ;;  %v367_v25 = vmul.f32 %v1079_v40, %v1062_v24 }
  0x99   : > { %v1072_v34 = vpop.permute.xlu1 %360  ;;  %v311_v35 = vpop.permute.xlu0 %310  ;;  %v505_v16 = vrot.slane %v501_v62, 1  ;;  %v565_v21 = vrot.slane %v1103_v3, 1  ;;  %v1216_v3 = vld [vmem:[%s1313_s3] ss:$0 sm:$0xff] }
  0x9a   : > { %v342_v38 = vmul.f32 %v1070_v33, %v311_v35  ;;  %v476_v39 = vmul.f32 %v1064_v27, %v311_v35  ;;  %v318_v46 = vmul.f32 %v1068_v32, %v311_v35  ;;  %v394_v4 = vmul.f32 %v1066_v29, %v1072_v34 }
  0x9b   : > { %v502_v5 = vmul.f32 %v1074_v36, %v1072_v34  ;;  %v368_v7 = vmul.f32 %v1079_v40, %v1072_v34  ;;  %v1126_v22 = vmul.f32 %v1072_v34, %v1070_v33  ;;  %v1130_v23 = vmul.f32 %v1072_v34, %v1064_v27 }
  0x9c   : > { %v480_v47 = vrot.slane %v476_v39, 1  ;;  %v347_v55 = vrot.slane %v342_v38, 1  ;;  %v398_v26 = vrot.slane %v394_v4, 1  ;;  %v642_v35 = vrot.slane %v1117_v12, 1 }
  0x9d   : > { %v327_v48 = vpop.permute.xlu1 %326  ;;  %v322_v49 = vpop.permute.xlu0 %321  ;;  %v506_v28 = vrot.slane %v502_v5, 1  ;;  %v556_v41 = vmul.f32 %v1072_v34, %v1068_v32  ;;  %v566_v24 = vrot.slane %v1126_v22, 1  ;;  %v1152_v34 = vld [vmem:[%s1312_s2 + $0x8] ss:$0 sm:$0xff] }
  0x9e   : > { %v334_v50 = vmul.f32 %v1064_v27, %v327_v48  ;;  %v474_v51 = vmul.f32 %v327_v48, %v1068_v32  ;;  %v487_v52 = vmul.f32 %v1070_v33, %v327_v48  ;;  %v333_v53 = vmul.f32 %v1064_v27, %v322_v49 }
  0x9f   : > { %v473_v56 = vmul.f32 %v322_v49, %v1068_v32  ;;  %v486_v57 = vmul.f32 %v1070_v33, %v322_v49  ;;  %v481_v0 = vsel %vm345_vm0, %v479_v54, %v480_v47  ;;  %v348_v9 = vsel %vm345_vm0, %v346_v63, %v347_v55 }
  0xa0   : > { %v336_v58 = vadd.f32 %v334_v50, %v318_v46  ;;  %v485_v59 = vadd.f32 %v480_v47, %v474_v51  ;;  %v491_v60 = vrot.slane %v487_v52, 1  ;;  %v335_v61 = vadd.f32 %v333_v53, %v317_v44 }
  0xa1   : > { %v490_v1 = vrot.slane %v486_v57, 1  ;;  %v379_v2 = vpop.permute.xlu1 %378  ;;  %v484_v14 = vadd.f32 %v481_v0, %v473_v56  ;;  %v374_v19 = vpop.permute.xlu0 %373  ;;  %v643_v47 = vrot.slane %v1130_v23, 1  ;;  %v507_v51 = vsel %vm345_vm0, %v505_v16, %v506_v28 }
  0xa2   : > { %v352_v6 = vadd.f32 %v347_v55, %v336_v58  ;;  %v496_v8 = vadd.f32 %v491_v60, %v485_v59  ;;  %v498_v10 = vmul.f32 %v379_v2, %v1079_v40  ;;  %v351_v13 = vadd.f32 %v348_v9, %v335_v61 }
  0xa3   : > { %v492_v18 = vsel %vm345_vm0, %v490_v1, %v491_v60  ;;  %v386_v30 = vmul.f32 %v1074_v36, %v379_v2  ;;  %v497_v39 = vmul.f32 %v374_v19, %v1079_v40  ;;  %v513_v45 = vmul.f32 %v1066_v29, %v379_v2 }
  0xa4   : > { %v370_v17 = vadd.f32 %v368_v7, %v352_v6  ;;  %v500_v31 = vadd.f32 %v498_v10, %v496_v8  ;;  %v369_v37 = vadd.f32 %v367_v25, %v351_v13  ;;  %v495_v38 = vadd.f32 %v492_v18, %v484_v14 }
  0xa5   : > { %v1121_v20 = vpop.permute.xlu1 %411  ;;  %v558_v46 = vmul.f32 %v379_v2, %v1064_v27  ;;  %v1144_v48 = vmul.f32 %v379_v2, %v1070_v33  ;;  %v385_v49 = vmul.f32 %v1074_v36, %v374_v19  ;;  %v512_v52 = vmul.f32 %v1066_v29, %v374_v19  ;;  %v407_v63 = vpop.permute.xlu0 %406 }
  0xa6   : > { %v388_v44 = vadd.f32 %v386_v30, %v370_v17  ;;  %v511_v50 = vadd.f32 %v506_v28, %v500_v31  ;;  %v399_v53 = vsel %vm345_vm0, %v397_v15, %v398_v26  ;;  %v1158_v55 = vmul.f32 %v379_v2, %v1068_v32 }
  0xa7   : > { %v387_v56 = vadd.f32 %v385_v49, %v369_v37  ;;  %v499_v57 = vadd.f32 %v497_v39, %v495_v38  ;;  %v557_v58 = vmul.f32 %v374_v19, %v1064_v27  ;;  %v517_v59 = vrot.slane %v513_v45, 1 }
  0xa8   : > { %v560_v60 = vadd.f32 %v558_v46, %v556_v41  ;;  %v1162_v61 = vmul.f32 %v374_v19, %v1070_v33  ;;  %v403_v62 = vadd.f32 %v398_v26, %v388_v44  ;;  %v654_v0 = vrot.slane %v1144_v48, 1 }
  0xa9   : > { %v1155_v54 = vpop.permute.xlu1 %429  ;;  %v445_v1 = vmul.f32 %v1152_v34, %v1121_v20  ;;  %v528_v2 = vmul.f32 %v1087_v43, %v1121_v20  ;;  %v522_v5 = vadd.f32 %v517_v59, %v511_v50  ;;  %v516_v27 = vrot.slane %v512_v52, 1  ;;  %v1185_v26 = vpop.permute.xlu0 %424 }
  0xaa   : > { %v524_v4 = vmul.f32 %v1155_v54, %v1085_v42  ;;  %v1172_v6 = vmul.f32 %v374_v19, %v1068_v32  ;;  %v419_v33 = vmul.f32 %v1085_v42, %v1121_v20  ;;  %v510_v7 = vadd.f32 %v507_v51, %v499_v57 }
  0xab   : > { %v559_v8 = vadd.f32 %v557_v58, %v555_v11  ;;  %v573_v9 = vmul.f32 %v1121_v20, %v1079_v40  ;;  %v402_v10 = vadd.f32 %v399_v53, %v387_v56  ;;  %v653_v13 = vrot.slane %v1162_v61, 1 }
  0xac   : > { %v421_v14 = vadd.f32 %v419_v33, %v403_v62  ;;  %v418_v15 = vmul.f32 %v1085_v42, %v407_v63  ;;  %v437_v16 = vmul.f32 %v1087_v43, %v1155_v54  ;;  %v449_v17 = vrot.slane %v445_v1, 1 }
  0xad   : > { %v532_v32 = vrot.slane %v528_v2, 1  ;;  %v526_v18 = vadd.f32 %v524_v4, %v522_v5  ;;  %v571_v19 = vadd.f32 %v566_v24, %v560_v60  ;;  %v444_v22 = vmul.f32 %v1152_v34, %v407_v63  ;;  %v599_v46 = vpop.permute.xlu1 %598 }
  0xae   : > { %v527_v11 = vmul.f32 %v1087_v43, %v407_v63  ;;  %v580_v25 = vmul.f32 %v407_v63, %v1066_v29  ;;  %v577_v28 = vmul.f32 %v1155_v54, %v1074_v36  ;;  %v420_v30 = vadd.f32 %v418_v15, %v402_v10 }
  0xaf   : > { %v1191_v31 = vmul.f32 %v1152_v34, %v1155_v54  ;;  %v575_v37 = vadd.f32 %v573_v9, %v571_v19  ;;  %v581_v38 = vmul.f32 %v1121_v20, %v1066_v29  ;;  %v572_v39 = vmul.f32 %v407_v63, %v1079_v40 }
  0xb0   : > { %v1197_v41 = vmul.f32 %v407_v63, %v1074_v36  ;;  %v439_v44 = vadd.f32 %v437_v16, %v421_v14  ;;  %v518_v45 = vsel %vm345_vm0, %v516_v27, %v517_v59  ;;  %v537_v49 = vadd.f32 %v532_v32, %v526_v18 }
  0xb1   : > { %v521_v50 = vadd.f32 %v518_v45, %v510_v7  ;;  %v523_v51 = vmul.f32 %v1185_v26, %v1085_v42  ;;  %v579_v52 = vadd.f32 %v577_v28, %v575_v37  ;;  %v448_v53 = vrot.slane %v444_v22, 1  ;;  %v613_v14 = vpop.permute.xlu1 %612  ;;  %v594_v22 = vpop.permute.xlu0 %593 }
  0xb2   : > { %v531_v56 = vrot.slane %v527_v11, 1  ;;  %v584_v57 = vrot.slane %v580_v25, 1  ;;  %v567_v58 = vsel %vm345_vm0, %v565_v21, %v566_v24  ;;  %v543_v60 = vrot.slane %v1191_v31, 1 }
  0xb3   : > { %v436_v62 = vmul.f32 %v1087_v43, %v1185_v26  ;;  %v585_v59 = vrot.slane %v581_v38, 1  ;;  %v570_v63 = vadd.f32 %v567_v58, %v559_v8  ;;  %v668_v1 = vrot.slane %v1197_v41, 1 }
  0xb4   : > { %v454_v2 = vadd.f32 %v449_v17, %v439_v44  ;;  %v538_v4 = vmul.f32 %v1152_v34, %v1185_v26  ;;  %v576_v5 = vmul.f32 %v1185_v26, %v1074_v36  ;;  %v548_v21 = vadd.f32 %v543_v60, %v537_v49 }
  0xb5   : > { %v525_v24 = vadd.f32 %v523_v51, %v521_v50  ;;  %v590_v27 = vadd.f32 %v585_v59, %v579_v52  ;;  %v602_v33 = vmul.f32 %v599_v46, %v1085_v42  ;;  %v574_v7 = vadd.f32 %v572_v39, %v570_v63  ;;  %v608_v58 = vpop.permute.xlu0 %607 }
  0xb6   : > { %v648_v8 = vadd.f32 %v643_v47, %v1158_v55  ;;  %v661_v9 = vmul.f32 %v1155_v54, %v1079_v40  ;;  %v665_v10 = vmul.f32 %v1121_v20, %v1074_v36  ;;  %v450_v15 = vsel %vm345_vm0, %v448_v53, %v449_v17 }
  0xb7   : > { %v533_v16 = vsel %vm345_vm0, %v531_v56, %v532_v32  ;;  %v438_v18 = vadd.f32 %v436_v62, %v420_v30  ;;  %v1229_v19 = vmul.f32 %v1152_v34, %v599_v46  ;;  %v462_v11 = vmul.f32 %v1216_v3, %v454_v2 }
  0xb8   : > { %v578_v25 = vadd.f32 %v576_v5, %v574_v7  ;;  %v659_v55 = vadd.f32 %v654_v0, %v648_v8  ;;  %v676_v36 = vmul.f32 %v1155_v54, %v1066_v29  ;;  %v536_v20 = vadd.f32 %v533_v16, %v525_v24  ;;  %v891_v5 = vld [vmem:[%s1314_s4] ss:$0 sm:$0xff] }
  0xb9   : > { %v542_v28 = vrot.slane %v538_v4, 1  ;;  %v604_v17 = vadd.f32 %v602_v33, %v590_v27  ;;  %v616_v32 = vmul.f32 %v613_v14, %v1087_v43  ;;  %v550_v30 = vmul.f32 %v1216_v3, %v548_v21 }
  0xba   : > { %v1239_v31 = vmul.f32 %v599_v46, %v1087_v43  ;;  %v663_v37 = vadd.f32 %v661_v9, %v659_v55  ;;  %v669_v38 = vrot.slane %v665_v10, 1  ;;  %v624_v39 = vrot.slane %v1229_v19, 1 }
  0xbb   : > { %v586_v44 = vsel %vm345_vm0, %v584_v57, %v585_v59  ;;  %v601_v45 = vmul.f32 %v594_v22, %v1085_v42  ;;  %v618_v49 = vadd.f32 %v616_v32, %v604_v17  ;;  %v680_v51 = vrot.slane %v676_v36, 1 }
  0xbc   : > { %v589_v54 = vadd.f32 %v586_v44, %v578_v25  ;;  %v674_v50 = vadd.f32 %v669_v38, %v663_v37  ;;  %v687_v52 = vmul.f32 %v613_v14, %v1085_v42  ;;  %v619_v46 = vmul.f32 %v1152_v34, %v594_v22 }
  0xbd   : > { %v702_v53 = vmul.f32 %v1152_v34, %v613_v14  ;;  %v644_v56 = vsel %vm345_vm0, %v642_v35, %v643_v47  ;;  %v655_v57 = vsel %vm345_vm0, %v653_v13, %v654_v0  ;;  %v629_v59 = vadd.f32 %v624_v39, %v618_v49 }
  0xbe   : > { %v685_v62 = vadd.f32 %v680_v51, %v674_v50  ;;  %v647_v63 = vadd.f32 %v644_v56, %v1172_v6  ;;  %v660_v2 = vmul.f32 %v1185_v26, %v1079_v40  ;;  %v544_v23 = vsel %vm345_vm0, %v542_v28, %v543_v60 }
  0xbf   : > { %v695_v12 = vrot.slane %v1239_v31, 1  ;;  %v690_v35 = vmul.f32 %v594_v22, %v1087_v43  ;;  %v675_v47 = vmul.f32 %v1185_v26, %v1066_v29  ;;  %v603_v48 = vadd.f32 %v601_v45, %v589_v54 }
  0xc0   : > { %v689_v61 = vadd.f32 %v687_v52, %v685_v62  ;;  %v658_v0 = vadd.f32 %v655_v57, %v647_v63  ;;  %v615_v6 = vmul.f32 %v608_v58, %v1087_v43  ;;  %v623_v40 = vrot.slane %v619_v46, 1 }
  0xc1   : > { %v706_v13 = vrot.slane %v702_v53, 1  ;;  %v679_v60 = vrot.slane %v675_v47, 1  ;;  %v701_v4 = vmul.f32 %v1152_v34, %v608_v58  ;;  %v631_v29 = vmul.f32 %v1216_v3, %v629_v59 }
  0xc2   : > { %v700_v26 = vadd.f32 %v695_v12, %v689_v61  ;;  %v662_v21 = vadd.f32 %v660_v2, %v658_v0  ;;  %v617_v24 = vadd.f32 %v615_v6, %v603_v48  ;;  %v453_v27 = vadd.f32 %v450_v15, %v438_v18 }
  0xc3   : > { %v547_v33 = vadd.f32 %v544_v23, %v536_v20  ;;  %v670_v43 = vsel %vm345_vm0, %v668_v1, %v669_v38  ;;  %v681_v7 = vsel %vm345_vm0, %v679_v60, %v680_v51  ;;  %v552_v34 = vadd.f32 %v891_v5, %v550_v30 }
  0xc4   : > { %v711_v8 = vadd.f32 %v706_v13, %v700_v26  ;;  %v673_v9 = vadd.f32 %v670_v43, %v662_v21  ;;  %v686_v10 = vmul.f32 %v608_v58, %v1085_v42  ;;  %v694_v14 = vrot.slane %v690_v35, 1 }
  0xc5   : > { %v470_v16 = vadd.f32 %v891_v5, %v462_v11  ;;  %v625_v19 = vsel %vm345_vm0, %v623_v40, %v624_v39  ;;  %v705_v22 = vrot.slane %v701_v4, 1  ;;  %v633_v15 = vadd.f32 %v891_v5, %v631_v29 }
  0xc6   : > { %v713_v18 = vmul.f32 %v1216_v3, %v711_v8  ;;  %v684_v25 = vadd.f32 %v681_v7, %v673_v9  ;;  %v628_v41 = vadd.f32 %v625_v19, %v617_v24  ;;  %v549_v1 = vmul.f32 %v1216_v3, %v547_v33 }
  0xc7   : > { %v554_v55 = vmax.f32 %v552_v34, 0.0  ;;  %v461_v28 = vmul.f32 %v1216_v3, %v453_v27  ;;  %v472_v17 = vmax.f32 %v470_v16, 0.0  ;;  %v696_v42 = vsel %vm345_vm0, %v694_v14, %v695_v12 }
  0xc8   : > { %v715_v36 = vadd.f32 %v891_v5, %v713_v18  ;;  %v688_v20 = vadd.f32 %v686_v10, %v684_v25  ;;  %v707_v11 = vsel %vm345_vm0, %v705_v22, %v706_v13  ;;  %v635_v32 = vmax.f32 %v633_v15, 0.0 }
  0xc9   : > { %v630_v31 = vmul.f32 %v1216_v3, %v628_v41  ;;  %v719_v38 = vmax.f32 %v472_v17, %v554_v55  ;;  %v551_v44 = vadd.f32 %v891_v5, %v549_v1  ;;  %v469_v54 = vadd.f32 %v891_v5, %v461_v28 }
  0xca   : > { %v717_v30 = vmax.f32 %v715_v36, 0.0  ;;  %v699_v37 = vadd.f32 %v696_v42, %v688_v20 }
  0xcb   : > { %v632_v50 = vadd.f32 %v891_v5, %v630_v31  ;;  %v553_v52 = vmax.f32 %v551_v44, 0.0  ;;  %v471_v53 = vmax.f32 %v469_v54, 0.0 }
  0xcc   : > { %v721_v39 = vmax.f32 %v635_v32, %v717_v30  ;;  %v710_v45 = vadd.f32 %v707_v11, %v699_v37 }
  0xcd   : > { %v634_v56 = vmax.f32 %v632_v50, 0.0  ;;  %v718_v58 = vmax.f32 %v471_v53, %v553_v52 }
  0xce   : > { %v723_v49 = vmax.f32 %v719_v38, %v721_v39  ;;  %v712_v51 = vmul.f32 %v1216_v3, %v710_v45 }
  0xd0   : > { %727 = vst.msk [vmem:[%s266_s29 + $0x8] sm:$0x3f] %vm726_vm1, %v723_v49  ;;  %v714_v46 = vadd.f32 %v891_v5, %v712_v51 }
  0xd2   : > { %v716_v57 = vmax.f32 %v714_v46, 0.0 }
  0xd4   : > { %v720_v62 = vmax.f32 %v634_v56, %v716_v57 }
  0xd6   : > { %v722_v59 = vmax.f32 %v718_v58, %v720_v62 }
  0xd8   : > { %725 = vst.msk [vmem:[%s266_s29] sm:$0xff] %vm724_vm2, %v722_v59 }
  0xd9 PF: > { %s15_s22 = sadd.s32 1, %s984_s22   ;;  %s1316_s18 = smov %s976_s20 }
  0xda   : > { %p12_p7 = scmp.ge.s32.totalorder %s15_s22, 30   ;;  %s1317_s19 = smov %s980_s21 }
  0xdb   : > { %s1318_s20 = smov %s1321_s23  ;;  %s1319_s21 = smov %s1325_s24 }
  0xdc   :  { %14 = sbr.rel (!%p12_p7) target bundleno = 3 (0x3), region = 81 }

// kernel: forward.5
= control target key start
LH: loop header
LB: loop body
LE: loop exit
PB: predicated region body
PF: predicated region fallthrough
CT: control target
= control target key end

     0   :  { %s1378_s18 = smov 0   ;;  %s1380_s19 = smov 0   ;;  %s1672_s0 = inlined_call_operand.vmem [shape: f32[2,16,8,64], index: 0, kind: input, shape index: {}]   ;;  %s1673_s1 = inlined_call_operand.vmem [shape: f32[2,16,8,64], index: 1, kind: input, shape index: {}]   ;;  %s1674_s2 = inlined_call_operand.vmem [shape: bf16[576,128], index: 2, kind: input, shape index: {}]   ;;  %s1675_s3 = inlined_call_operand.vmem [shape: f32[1,128], index: 3, kind: input, shape index: {}]   ;;  %s1676_s4 = inlined_call_operand.vmem [shape: f32[1,128], index: 4, kind: input, shape index: {}]   ;;  %s1677_s5 = inlined_call_operand.vmem [shape: f32[2,7,7,128], index: 5, kind: output, shape index: {}]  }
   0x1   :  { %s1382_s20 = smov 0   ;;  %s1384_s21 = smov 0  }
   0x2   :  { %s1386_s22 = smov 0  }
   0x3 LB: > { %s24_s23 = sadd.s32 1, %s1337_s20  ;;  %s27_s24 = sadd.s32 1, %s1341_s21  ;;  %s1345_s22 = sphi %s1386_s22, %s15_s22   ;;  %s1341_s21 = sphi %s1384_s21, %s1681_s21   ;;  %s1337_s20 = sphi %s1382_s20, %s1680_s20   ;;  %s1333_s19 = sphi %s1380_s19, %s1679_s19   ;;  %s1329_s18 = sphi %s1378_s18, %s1678_s18  }
   0x4   : > { %p25_p0 = scmp.ge.s32.totalorder %s24_s23, 7  ;;  %p1048_p1 = scmp.ge.s32.totalorder %s1345_s22, 1 }
   0x5   : > { %p211_p2 = scmp.lt.s32.totalorder %s1345_s22, 15 }
   0x6   : > { %s1683_s23 = smov (%p25_p0, %s24_s23), 0  ;;  %s1685_s24 = smov (!%p25_p0, %s27_s24), %s1341_s21 }
   0x7   : > { %p212_p3 = pnand %p1048_p1, %p211_p2  ;;  %p29_p4 = scmp.ge.s32.totalorder %s1685_s24, 2 }
   0x8   : > { %p247_p5 = scmp.lt.s32.totalorder (!%p212_p3), %s1333_s19, 1  ;;  %v1271_v0 = vld [vmem:[%s1674_s2 + $0x40] sm:$0xff] (!%p212_p3)   ;;  %v1273_v2 = vld [vmem:[%s1674_s2 + $0x48] sm:$0xff] (!%p212_p3)   ;;  %s1118_s6 = sshll.u32 (!%p212_p3), %s1329_s18, 4  ;;  %v1277_v18 = vld [vmem:[%s1674_s2 + $0x50] sm:$0xff] (!%p212_p3)   ;;  %vm405_vm0 = vcmask (!%p212_p3), 1046528  }
   0x9   : > { %s1687_s24 = smov (%p29_p4, %s1685_s24), 0  ;;  %215 = sbr.rel (%p212_p3) target bundleno = 402 (0x192), region = 40 }
   0xa   : > { %v1272_v1 = vld [vmem:[%s1674_s2] sm:$0xff] (!%p212_p3)   ;;  %1125 = vmatprep.subr.bf16.mxu0 (!%p212_p3), %v1271_v0  ;;  %v1275_v4 = vld [vmem:[%s1674_s2 + $0x8] sm:$0xff] (!%p212_p3)   ;;  %s1347_s8 = smov (!%p212_p3), 64   ;;  %v1279_v26 = vld [vmem:[%s1674_s2 + $0x10] sm:$0xff] (!%p212_p3)   ;;  %vm411_vm1 = vcmask (!%p212_p3), 1045504   ;;  %vm314_vm2 = vcmask (!%p212_p3), 523264  }
   0xb   : > { %v1274_v3 = vld [vmem:[%s1674_s2 + $0xc0] sm:$0xff] (!%p212_p3)   ;;  %1126 = vmatpush3.bf16.msra.mxu0 (!%p212_p3), %v1272_v1  ;;  %v1278_v20 = vld [vmem:[%s1674_s2 + $0xc8] sm:$0xff] (!%p212_p3)   ;;  %v1281_v28 = vld [vmem:[%s1674_s2 + $0x58] sm:$0xff] (!%p212_p3)   ;;  %vm417_vm3 = vcmask (!%p212_p3), 1044480   ;;  %p259_p6 = scmp.lt.s32.totalorder (!%p212_p3), %s1329_s18, 6  ;;  %vm900_vm4 = vcmask (!%p212_p3), 1040384  }
   0xc   : > { %1127 = vmatprep.subr.bf16.mxu0 (!%p212_p3), %v1273_v2  ;;  %1153 = vmatprep.subr.bf16.mxu1 (!%p212_p3), %v1274_v3  ;;  %v1276_v5 = vld [vmem:[%s1674_s2 + $0x80] sm:$0xff] (!%p212_p3)   ;;  %v1280_v27 = vld [vmem:[%s1674_s2 + $0x88] sm:$0xff] (!%p212_p3)   ;;  %v1282_v30 = vld [vmem:[%s1674_s2 + $0xd0] sm:$0xff] (!%p212_p3)   ;;  %vm917_vm5 = vcmask (!%p212_p3), 1041408  }
   0xd   : > { %1154 = vmatpush3.bf16.msra.mxu1 (!%p212_p3), %v1276_v5  ;;  %v1283_v32 = vld [vmem:[%s1674_s2 + $0x18] sm:$0xff] (!%p212_p3)   ;;  %v1284_v33 = vld [vmem:[%s1674_s2 + $0x90] sm:$0xff] (!%p212_p3)   ;;  %v1285_v35 = vld [vmem:[%s1674_s2 + $0x60] sm:$0xff] (!%p212_p3)  }
   0xe   : > { %1155 = vmatprep.subr.bf16.mxu1 (!%p212_p3), %v1278_v20  ;;  %v1286_v37 = vld [vmem:[%s1674_s2 + $0xd8] sm:$0xff] (!%p212_p3)   ;;  %v1287_v38 = vld [vmem:[%s1674_s2 + $0x20] sm:$0xff] (!%p212_p3)   ;;  %v1289_v40 = vld [vmem:[%s1674_s2 + $0x68] sm:$0xff] (!%p212_p3)  }
   0xf   : > { %1128 = vmatpush3.bf16.msra.mxu0 (!%p212_p3), %v1275_v4  ;;  %v1288_v39 = vld [vmem:[%s1674_s2 + $0x98] sm:$0xff] (!%p212_p3)   ;;  %v1290_v41 = vld [vmem:[%s1674_s2 + $0xe0] sm:$0xff] (!%p212_p3)   ;;  %v1291_v44 = vld [vmem:[%s1674_s2 + $0x28] sm:$0xff] (!%p212_p3)  }
  0x10   : > { %s1689_s19 = smov (!%p247_p5, %s1333_s19), 1  ;;  %1129 = vmatprep.subr.bf16.mxu0 %v1277_v18  ;;  %v1292_v46 = vld [vmem:[%s1674_s2 + $0xa0] sm:$0xff]   ;;  %v1293_v47 = vld [vmem:[%s1674_s2 + $0x70] sm:$0xff]   ;;  %v1294_v48 = vld [vmem:[%s1674_s2 + $0xe8] sm:$0xff]   ;;  %s1691_s18 = smov (!%p259_p6, %s1329_s18), 6 }
  0x11   : > { %s1116_s9 = sshll.u32 %s1689_s19, 7  ;;  %1156 = vmatpush3.bf16.msra.mxu1 %v1280_v27  ;;  %v1295_v49 = vld [vmem:[%s1674_s2 + $0x30] sm:$0xff]   ;;  %v1296_v50 = vld [vmem:[%s1674_s2 + $0xa8] sm:$0xff]   ;;  %v1297_v51 = vld [vmem:[%s1674_s2 + $0x78] sm:$0xff]  }
  0x12   : > { %s251_s12 = scalar_lea.vmem %s1672_s0, %s1116_s9  ;;  %s256_s15 = scalar_lea.vmem %s1673_s1, %s1116_s9  ;;  %1157 = vmatprep.subr.bf16.mxu1 %v1282_v30  ;;  %v1298_v52 = vld [vmem:[%s1674_s2 + $0xf0] sm:$0xff]   ;;  %v1299_v53 = vld [vmem:[%s1674_s2 + $0x38] sm:$0xff]   ;;  %v1572_v56 = vld [vmem:[%s1674_s2 + $0x100] sm:$0xff]  }
  0x13   : > { %s268_s25 = scalar_lea.vmem %s251_s12, %s1118_s6  ;;  %s282_s28 = scalar_lea.vmem %s256_s15, %s1118_s6  ;;  %1130 = vmatpush3.bf16.msra.mxu0 %v1279_v26  ;;  %v1300_v54 = vld [vmem:[%s1674_s2 + $0xb0] sm:$0xff]   ;;  %v1301_v55 = vld [vmem:[%s1674_s2 + $0xf8] sm:$0xff]  }
  0x14   : > { %v1438_v6 = vld [vmem:[%s268_s25 + $0x10] sm:$0xff]  ;;  %v1440_v7 = vld [vmem:[%s268_s25] sm:$0xff]  ;;  %v1442_v8 = vld [vmem:[%s268_s25 + $0x8] sm:$0xff]  ;;  %1131 = vmatprep.subr.bf16.mxu0 %v1281_v28  ;;  %s1199_s15 = smul.u32 7, %s1689_s19 }
  0x15   : > { %v1444_v9 = vld [vmem:[%s282_s28 + $0x8] sm:$0xff]  ;;  %v1446_v10 = vld [vmem:[%s282_s28] sm:$0xff]  ;;  %v1449_v11 = vrot.slane %v1438_v6, 1  ;;  %v297_v12 = vrot.slane %v1440_v7, 1  ;;  %v1452_v13 = vld [vmem:[%s282_s28 + $0x18] sm:$0xff]  ;;  %v1474_v22 = vrot.slane %v1442_v8, 1  ;;  %1158 = vmatpush3.bf16.msra.mxu1 %v1284_v33 }
  0x16   : > { %v1241_v14 = vpack.i.bf16 %v1438_v6, %v1444_v9  ;;  %v329_v15 = vrot.slane %v1444_v9, 1  ;;  %v1457_v16 = vld [vmem:[%s282_s28 + $0x10] sm:$0xff]  ;;  %v1459_v17 = vld [vmem:[%s268_s25 + $0x18] sm:$0xff]  ;;  %1159 = vmatprep.subr.bf16.mxu1 %v1286_v37  ;;  %v322_v58 = vrot.slane %v1446_v10, 1  ;;  %v360_v4 = vrot.slane %v1452_v13, 1  ;;  %s262_s16 = sadd.s32 %s1199_s15, %s1691_s18 }
  0x17   : > { %v1251_v19 = vpack.i.bf16 %v1449_v11, %v1446_v10  ;;  %v1246_v21 = vpack.i.bf16 %v1442_v8, %v297_v12  ;;  %v336_v23 = vrot.slane %v1457_v16, 1  ;;  %v349_v25 = vrot.slane %v1459_v17, 1  ;;  %1132 = vmatpush3.bf16.msra.mxu0 %v1283_v32  ;;  %v1303_v57 = vld [vmem:[%s1674_s2 + $0xb8] sm:$0xff]   ;;  %s1053_s17 = sshll.u32 %s262_s16, 3 }
  0x18   : > { %1242 = vrot.lane.b32.xlu0 %v1241_v14, %s1347_s8  ;;  %v1256_v24 = vpack.i.bf16 %v329_v15, %v1452_v13  ;;  %v1261_v29 = vpack.i.bf16 %v1474_v22, %v1457_v16  ;;  %1133 = vmatprep.subr.bf16.mxu0 %v1285_v35  ;;  %s264_s19 = scalar_lea.vmem %s1677_s5, %s1053_s17 }
  0x19   : > { %1252 = vrot.lane.b32.xlu1 %v1251_v19, %s1347_s8  ;;  %v1266_v31 = vpack.i.bf16 %v336_v23, %v349_v25  ;;  %v372_v34 = vrot.slane %v336_v23, 1  ;;  %v1508_v36 = vrot.slane %v349_v25, 2  ;;  %1160 = vmatpush3.bf16.msra.mxu1 %v1288_v39 }
  0x1a   : > { %1161 = vmatprep.subr.bf16.mxu1 %v1290_v41 }
  0x1b   : > { %1134 = vmatpush3.bf16.msra.mxu0 %v1287_v38  ;;  %v1528_v42 = vsel %vm405_vm0, %v1449_v11, %v372_v34  ;;  %v1532_v43 = vsel %vm411_vm1, %v372_v34, %v1508_v36 }
  0x1c   : > { %1247 = vrot.lane.b32.xlu0 %v1246_v21, %s1347_s8  ;;  %1135 = vmatprep.subr.bf16.mxu0 %v1289_v40  ;;  %v427_v45 = vpack.c.bf16 %v1532_v43, %v1528_v42 }
  0x1d   : > { %1257 = vrot.lane.b32.xlu1 %v1256_v24, %s1347_s8  ;;  %1162 = vmatpush3.bf16.msra.mxu1 %v1292_v46 }
  0x1e   : > { %1163 = vmatprep.subr.bf16.mxu1 %v1294_v48 }
  0x1f   : > { %1136 = vmatpush3.bf16.msra.mxu0 %v1291_v44 }
  0x20   : > { %1262 = vrot.lane.b32.xlu0 %v1261_v29, %s1347_s8  ;;  %1137 = vmatprep.subr.bf16.mxu0 %v1293_v47  ;;  %v1304_v47 = vld [vmem:[%s1674_s2 + $0x108] sm:$0xff]  }
  0x21   : > { %1267 = vrot.lane.b32.xlu1 %v1266_v31, %s1347_s8  ;;  %1164 = vmatpush3.bf16.msra.mxu1 %v1296_v50 }
  0x22   : > { %1165 = vmatprep.subr.bf16.mxu1 %v1298_v52 }
  0x23   : > { %1138 = vmatpush3.bf16.msra.mxu0 %v1295_v49 }
  0x24   : > { %1139 = vmatprep.subr.bf16.mxu0 %v1297_v51 }
  0x25   : > { %1166 = vmatpush3.bf16.msra.mxu1 %v1300_v54 }
  0x26   : > { %1167 = vmatprep.subr.bf16.mxu1 %v1301_v55 }
  0x27   : > { %1140 = vmatpush3.bf16.msra.mxu0 %v1299_v53 }
  0x28   : > { %1187 = vmatprep.subr.bf16.mxu0 %v1572_v56 }
  0x29   : > { %1168 = vmatpush3.bf16.msra.mxu1 %v1303_v57 }
  0x8a   : > { %v1243_v59 = vpop.permute.xlu0 %1242 }
  0x8b   : > { %v1245_v60 = vunpack.i.h.bf16 %v1243_v59  ;;  %v1244_v61 = vunpack.i.l.bf16 %v1243_v59  ;;  %v1253_v62 = vpop.permute.xlu1 %1252 }
  0x8c   : > { %v1255_v63 = vunpack.i.h.bf16 %v1253_v62  ;;  %v1254_v0 = vunpack.i.l.bf16 %v1253_v62 }
  0x8d   : > { %v1581_v1 = vsel %vm314_vm2, %v1442_v8, %v1244_v61  ;;  %v338_v2 = vsel %vm314_vm2, %v322_v58, %v1244_v61  ;;  %v351_v3 = vsel %vm314_vm2, %v1474_v22, %v1245_v60  ;;  %v1305_v60 = vld [vmem:[%s1674_s2 + $0x110] sm:$0xff]  }
  0x8e   : > { %v1589_v5 = vsel %vm314_vm2, %v1457_v16, %v1255_v63  ;;  %v1248_v14 = vpop.permute.xlu0 %1247  ;;  %v369_v18 = vrot.slane %v338_v2, 1  ;;  %v382_v23 = vrot.slane %v351_v3, 2  ;;  %v381_v8 = vrot.slane %v1581_v1, 2  ;;  %v1306_v1 = vld [vmem:[%s1674_s2 + $0x118] sm:$0xff]  }
  0x8f   : > { %v1250_v19 = vunpack.i.h.bf16 %v1248_v14  ;;  %v1249_v20 = vunpack.i.l.bf16 %v1248_v14  ;;  %v1258_v21 = vpop.permute.xlu1 %1257  ;;  %v315_v24 = vsel %vm314_vm2, %v1440_v7, %v1254_v0  ;;  %v371_v29 = vrot.slane %v1589_v5, 1 }
  0x90   : > { %v1260_v25 = vunpack.i.h.bf16 %v1258_v21  ;;  %v1259_v26 = vunpack.i.l.bf16 %v1258_v21  ;;  %v413_v28 = vsel %vm411_vm1, %v369_v18, %v382_v23  ;;  %v383_v48 = vrot.slane %v1589_v5, 2 }
  0x91   : > { %v337_v27 = vsel %vm314_vm2, %v1446_v10, %v1249_v20  ;;  %v316_v16 = vsel %vm314_vm2, %v297_v12, %v1250_v19  ;;  %v399_v63 = vrot.slane %v360_v4, 3 }
  0x92   : > { %v368_v30 = vrot.slane %v337_v27, 1  ;;  %v339_v31 = vsel %vm314_vm2, %v1474_v22, %v1260_v25  ;;  %v1263_v32 = vpop.permute.xlu0 %1262  ;;  %v407_v33 = vsel %vm405_vm0, %v316_v16, %v369_v18  ;;  %v352_v34 = vsel %vm314_vm2, %v1459_v17, %v1259_v26 }
  0x93   : > { %v370_v35 = vrot.slane %v339_v31, 1  ;;  %v1265_v10 = vunpack.i.h.bf16 %v1263_v32  ;;  %v1264_v37 = vunpack.i.l.bf16 %v1263_v32  ;;  %v1268_v7 = vpop.permute.xlu1 %1267  ;;  %v424_v38 = vpack.c.bf16 %v413_v28, %v407_v33 }
  0x94   : > { %v1270_v12 = vunpack.i.h.bf16 %v1268_v7  ;;  %v1269_v39 = vunpack.i.l.bf16 %v1268_v7  ;;  %v406_v40 = vsel %vm405_vm0, %v315_v24, %v368_v30  ;;  %v412_v41 = vsel %vm411_vm1, %v368_v30, %v381_v8 }
  0x95   : > { %v317_v22 = vsel %vm314_vm2, %v1444_v9, %v1265_v10  ;;  %v361_v44 = vsel %vm314_vm2, %v329_v15, %v1264_v37  ;;  %759 = vmatprep.mubr.bf16.mxu0 %v424_v38  ;;  %v423_v17 = vpack.c.bf16 %v412_v41, %v406_v40  ;;  %v318_v46 = vsel %vm314_vm2, %v1438_v6, %v1264_v37  ;;  %v1112_v38 = vld [vmem:[%s1675_s3] ss:$0 sm:$0xff] }
  0x96   : > { %v396_v49 = vrot.slane %v361_v44, 3  ;;  %v363_v50 = vsel %vm314_vm2, %v1452_v13, %v1269_v39  ;;  %v384_v51 = vrot.slane %v352_v34, 2  ;;  %v362_v9 = vsel %vm314_vm2, %v1449_v11, %v1270_v12 }
  0x97   : > { %v398_v15 = vrot.slane %v363_v50, 3  ;;  %760 = vmatmul.mubr.bf16.vlgmr.msra.gmra.mrb[0].mxu0 %v423_v17  ;;  %v409_v52 = vsel %vm405_vm0, %v318_v46, %v371_v29  ;;  %v408_v6 = vsel %vm405_vm0, %v317_v22, %v370_v35  ;;  %v414_v54 = vsel %vm411_vm1, %v370_v35, %v383_v48 }
  0x98   : > { %1188 = vmatpush3.bf16.msra.mxu0 %v1572_v56  ;;  %v415_v53 = vsel %vm411_vm1, %v371_v29, %v384_v51  ;;  %v419_v55 = vsel %vm417_vm3, %v382_v23, %v396_v49  ;;  %v395_v57 = vrot.slane %v317_v22, 3  ;;  %v425_v58 = vpack.c.bf16 %v414_v54, %v408_v6  ;;  %v1113_v22 = vld [vmem:[%s1676_s4] ss:$0 sm:$0xff] }
  0x99   : > { %v426_v13 = vpack.c.bf16 %v415_v53, %v409_v52  ;;  %1189 = vmatprep.subr.bf16.mxu0 %v1304_v47  ;;  %v429_v59 = vpack.c.bf16 %v396_v49, %v419_v55  ;;  %v421_v11 = vsel %vm417_vm3, %v384_v51, %v398_v15  ;;  %v397_v62 = vrot.slane %v362_v9, 3 }
  0x9a   : > { %v431_v61 = vpack.c.bf16 %v398_v15, %v421_v11  ;;  %v418_v56 = vsel %vm417_vm3, %v381_v8, %v395_v57  ;;  %v422_v3 = vsel %vm417_vm3, %v1508_v36, %v399_v63 }
  0x9b   : > { %808 = vmatprep.mubr.bf16.mxu1 %v426_v13  ;;  %767 = vmatprep.mubr.bf16.mxu0 %v429_v59  ;;  %v428_v0 = vpack.c.bf16 %v395_v57, %v418_v56  ;;  %v420_v2 = vsel %vm417_vm3, %v383_v48, %v397_v62  ;;  %v432_v5 = vpack.c.bf16 %v399_v63, %v422_v3 }
  0x9c   : > { %809 = vmatmul.mubr.bf16.vlgmr.msra.gmra.mrb[0].mxu1 %v425_v58  ;;  %1190 = vmatpush3.bf16.msra.mxu0 %v1304_v47  ;;  %v430_v4 = vpack.c.bf16 %v397_v62, %v420_v2 }
  0x9d   : > { %816 = vmatprep.mubr.bf16.mxu1 %v431_v61  ;;  %1191 = vmatprep.subr.bf16.mxu0 %v1305_v60 }
  0x9f   : > { %768 = vmatmul.mubr.bf16.gmra.mrb[4].mxu0 %v428_v0 }
  0xa0   : > { %1192 = vmatpush3.bf16.msra.mxu0 %v1305_v60  ;;  %1195 = vmatprep.mubr.msk.bf16.mxu0 %vm314_vm2, %v427_v45 }
  0xa1   : > { %1193 = vmatprep.subr.bf16.mxu0 %v1306_v1 }
  0xa4   : > { %817 = vmatmul.mubr.bf16.gmra.mrb[4].mxu1 %v430_v4  ;;  %1194 = vmatpush3.bf16.msra.mxu0 %v1306_v1 }
  0xa7   : > { %1196 = vmatmul.mubr.msk.bf16.vlgmr.msra.gmra.mrb[8].mxu0 %vm314_vm2, %v432_v5 }
 0x16a   : > { %v1141_v14 = vpop.f32.mrb[0].mxu0 }
 0x16b   : > { %v1142_v18 = vpop.f32.mrb[1].mxu0 }
 0x16c   : > { %v1143_v19 = vadd.f32 %v1142_v18, %v1141_v14  ;;  %v1144_v20 = vpop.f32.mrb[2].mxu0 }
 0x16d   : > { %v1145_v21 = vpop.f32.mrb[3].mxu0 }
 0x16e   : > { %v1146_v23 = vadd.f32 %v1145_v21, %v1144_v20 }
 0x16f   : > { %v1169_v36 = vpop.f32.mrb[0].mxu1 }
 0x170   : > { %v1170_v8 = vpop.f32.mrb[1].mxu1 }
 0x171   : > { %v1171_v24 = vadd.f32 %v1170_v8, %v1169_v36  ;;  %v1172_v25 = vpop.f32.mrb[2].mxu1 }
 0x172   : > { %v1173_v42 = vpop.f32.mrb[3].mxu1  ;;  %v1147_v43 = vpop.f32.mrb[4].mxu0 }
 0x173   : > { %v1174_v45 = vadd.f32 %v1173_v42, %v1172_v25  ;;  %v1148_v26 = vpop.f32.mrb[5].mxu0  ;;  %v811_v27 = vadd.f32 %v1171_v24, %v1143_v19 }
 0x174   : > { %v1149_v16 = vadd.f32 %v1148_v26, %v1147_v43  ;;  %v1150_v28 = vpop.f32.mrb[6].mxu0 }
 0x175   : > { %v1151_v29 = vpop.f32.mrb[7].mxu0  ;;  %v814_v30 = vadd.f32 %v1174_v45, %v1146_v23 }
 0x176   : > { %v1152_v31 = vadd.f32 %v1151_v29, %v1150_v28 }
 0x177   : > { %v1175_v32 = vpop.f32.mrb[4].mxu1 }
 0x178   : > { %v1176_v33 = vpop.f32.mrb[5].mxu1 }
 0x179   : > { %v1177_v34 = vadd.f32 %v1176_v33, %v1175_v32  ;;  %v1178_v35 = vpop.f32.mrb[6].mxu1 }
 0x17a   : > { %v1179_v10 = vpop.f32.mrb[7].mxu1  ;;  %v1197_v37 = vpop.f32.mrb[8].mxu0 }
 0x17b   : > { %v1180_v7 = vadd.f32 %v1179_v10, %v1178_v35  ;;  %v819_v12 = vadd.f32 %v1177_v34, %v1149_v16  ;;  %v859_v39 = vpop.f32.mrb[9].mxu0 }
 0x17c   : > { %v860_v40 = vadd.f32 %v859_v39, %v811_v27  ;;  %v1198_v41 = vpop.f32.mrb[10].mxu0 }
 0x17d   : > { %v868_v44 = vadd.f32 %v1197_v37, %v819_v12  ;;  %v822_v17 = vadd.f32 %v1180_v7, %v1152_v31  ;;  %v862_v46 = vpop.f32.mrb[11].mxu0 }
 0x17e   : > { %v880_v47 = vmul.f32 %v1112_v38, %v860_v40  ;;  %v863_v48 = vadd.f32 %v862_v46, %v814_v30 }
 0x17f   : > { %v882_v49 = vmul.f32 %v1112_v38, %v868_v44  ;;  %v871_v50 = vadd.f32 %v1198_v41, %v822_v17 }
 0x180   : > { %v890_v51 = vadd.f32 %v1113_v22, %v880_v47  ;;  %v881_v9 = vmul.f32 %v1112_v38, %v863_v48 }
 0x181   : > { %v892_v15 = vadd.f32 %v1113_v22, %v882_v49  ;;  %v883_v52 = vmul.f32 %v1112_v38, %v871_v50 }
 0x182   : > { %v894_v6 = vmax.f32 %v890_v51, 0.0  ;;  %v891_v53 = vadd.f32 %v1113_v22, %v881_v9 }
 0x183   : > { %v896_v54 = vmax.f32 %v892_v15, 0.0  ;;  %v893_v55 = vadd.f32 %v1113_v22, %v883_v52 }
 0x184   : > { %v895_v57 = vmax.f32 %v891_v53, 0.0  ;;  %v901_v59 = vrot.slane %v894_v6, 7 }
 0x185   : > { %v908_v13 = vrot.slane %v896_v54, 7  ;;  %v897_v58 = vmax.f32 %v893_v55, 0.0 }
 0x186   : > { %v902_v11 = vrot.slane %v895_v57, 7 }
 0x187   : > { %v909_v60 = vrot.slane %v897_v58, 7  ;;  %v913_v61 = vmax.f32 %v895_v57, %v908_v13 }
 0x188   : > { %v903_v56 = vsel %vm900_vm4, %v901_v59, %v902_v11 }
 0x189   : > { %v910_v62 = vsel %vm900_vm4, %v908_v13, %v909_v60  ;;  %v905_v63 = vmax.f32 %v894_v6, %v903_v56  ;;  %v918_v2 = vrot.slane %v913_v61, 6 }
 0x18a   : > { %v914_v0 = vmax.f32 %v896_v54, %v910_v62 }
 0x18c   : > { %v919_v1 = vrot.slane %v914_v0, 6 }
 0x18e   : > { %v920_v3 = vsel %vm917_vm5, %v918_v2, %v919_v1 }
 0x18f   : > { %v922_v4 = vmax.f32 %v905_v63, %v920_v3 }
 0x191   : > { %923 = vst [vmem:[%s264_s19] sm:$0x7f] %v922_v4 }
 0x192 PF: > { %s15_s22 = sadd.s32 1, %s1345_s22   ;;  %s1678_s18 = smov %s1337_s20 }
 0x193   : > { %p12_p7 = scmp.ge.s32.totalorder %s15_s22, 16   ;;  %s1679_s19 = smov %s1341_s21 }
 0x194   : > { %s1680_s20 = smov %s1683_s23  ;;  %s1681_s21 = smov %s1687_s24 }
 0x195   :  { %14 = sbr.rel (!%p12_p7) target bundleno = 3 (0x3), region = 81 }

// kernel: forward.6
= control target key start
LH: loop header
LB: loop body
LE: loop exit
PB: predicated region body
PF: predicated region fallthrough
CT: control target
= control target key end

     0   :  { %s1742_s18 = smov 0   ;;  %s1744_s19 = smov 0   ;;  %s2105_s0 = inlined_call_operand.vmem [shape: f32[2,7,4,128], index: 0, kind: input, shape index: {}]   ;;  %s2106_s1 = inlined_call_operand.vmem [shape: f32[2,7,3,128], index: 1, kind: input, shape index: {}]   ;;  %s2107_s2 = inlined_call_operand.vmem [shape: bf16[1152,128], index: 2, kind: input, shape index: {}]   ;;  %s2108_s3 = inlined_call_operand.vmem [shape: f32[1,128], index: 3, kind: input, shape index: {}]   ;;  %s2109_s4 = inlined_call_operand.vmem [shape: f32[1,128], index: 4, kind: input, shape index: {}]   ;;  %s2110_s5 = inlined_call_operand.vmem [shape: f32[2,2,2,128], index: 5, kind: output, shape index: {}]  }
   0x1   :  { %s1746_s20 = smov 0   ;;  %s1748_s21 = smov 0  }
   0x2   :  { %s1750_s22 = smov 0  }
   0x3 LB: > { %s24_s23 = sadd.s32 1, %s1700_s20  ;;  %s27_s24 = sadd.s32 1, %s1704_s21  ;;  %s1708_s22 = sphi %s1750_s22, %s15_s22   ;;  %s1704_s21 = sphi %s1748_s21, %s2114_s21   ;;  %s1700_s20 = sphi %s1746_s20, %s2113_s20   ;;  %s1696_s19 = sphi %s1744_s19, %s2112_s19   ;;  %s1692_s18 = sphi %s1742_s18, %s2111_s18  }
   0x4   : > { %p25_p0 = scmp.ge.s32.totalorder %s24_s23, 2  ;;  %p1328_p1 = scmp.ge.s32.totalorder %s1708_s22, 1 }
   0x5   : > { %p211_p2 = scmp.lt.s32.totalorder %s1708_s22, 5 }
   0x6   : > { %s2116_s23 = smov (%p25_p0, %s24_s23), 0  ;;  %s2118_s24 = smov (!%p25_p0, %s27_s24), %s1704_s21 }
   0x7   : > { %p212_p3 = pnand %p1328_p1, %p211_p2  ;;  %p29_p4 = scmp.ge.s32.totalorder %s2118_s24, 2 }
   0x8   : > { %v1598_v0 = vld [vmem:[%s2107_s2 + $0x40] sm:$0xff] (!%p212_p3)   ;;  %v1602_v4 = vld [vmem:[%s2107_s2 + $0x48] sm:$0xff] (!%p212_p3)   ;;  %v1606_v8 = vld [vmem:[%s2107_s2 + $0x50] sm:$0xff] (!%p212_p3)   ;;  %p247_p5 = scmp.lt.s32.totalorder (!%p212_p3), %s1696_s19, 1  ;;  %s1431_s17 = sshll.u32 (!%p212_p3), %s1692_s18, 3  ;;  %vm365_vm0 = vcmask (!%p212_p3), 1041408  }
   0x9   : > { %s2120_s24 = smov (%p29_p4, %s2118_s24), 0  ;;  %215 = sbr.rel (%p212_p3) target bundleno = 336 (0x150), region = 40 }
   0xa   : > { %v1599_v1 = vld [vmem:[%s2107_s2 + $0xc0] sm:$0xff] (!%p212_p3)   ;;  %1438 = vmatprep.subr.bf16.mxu0 (!%p212_p3), %v1598_v0  ;;  %v1603_v5 = vld [vmem:[%s2107_s2 + $0xc8] sm:$0xff] (!%p212_p3)   ;;  %v1607_v9 = vld [vmem:[%s2107_s2 + $0xd0] sm:$0xff] (!%p212_p3)   ;;  %vm375_vm1 = vcmask (!%p212_p3), 1043456   ;;  %vm385_vm2 = vcmask (!%p212_p3), 1045504   ;;  %vm1711_vm3 = vmmov (!%p212_p3), 0  }
   0xb   : > { %v1600_v2 = vld [vmem:[%s2107_s2] sm:$0xff] (!%p212_p3)   ;;  %1460 = vmatprep.subr.bf16.mxu1 (!%p212_p3), %v1599_v1  ;;  %v1604_v6 = vld [vmem:[%s2107_s2 + $0x8] sm:$0xff] (!%p212_p3)   ;;  %v1608_v10 = vld [vmem:[%s2107_s2 + $0x10] sm:$0xff] (!%p212_p3)   ;;  %p259_p6 = scmp.lt.s32.totalorder (!%p212_p3), %s1692_s18, 1 }
   0xc   : > { %v1601_v3 = vld [vmem:[%s2107_s2 + $0x80] sm:$0xff] (!%p212_p3)   ;;  %1439 = vmatpush3.bf16.msra.mxu0 (!%p212_p3), %v1600_v2  ;;  %v1605_v7 = vld [vmem:[%s2107_s2 + $0x88] sm:$0xff] (!%p212_p3)   ;;  %v1609_v11 = vld [vmem:[%s2107_s2 + $0x90] sm:$0xff] (!%p212_p3)  }
   0xd   : > { %1461 = vmatpush3.bf16.msra.mxu1 (!%p212_p3), %v1601_v3  ;;  %1440 = vmatprep.subr.bf16.mxu0 (!%p212_p3), %v1602_v4  ;;  %v1610_v12 = vld [vmem:[%s2107_s2 + $0x58] sm:$0xff] (!%p212_p3)   ;;  %v1614_v16 = vld [vmem:[%s2107_s2 + $0x60] sm:$0xff] (!%p212_p3)   ;;  %v1618_v20 = vld [vmem:[%s2107_s2 + $0x68] sm:$0xff] (!%p212_p3)  }
   0xe   : > { %1462 = vmatprep.subr.bf16.mxu1 (!%p212_p3), %v1603_v5  ;;  %v1611_v13 = vld [vmem:[%s2107_s2 + $0xd8] sm:$0xff] (!%p212_p3)   ;;  %v1615_v17 = vld [vmem:[%s2107_s2 + $0xe0] sm:$0xff] (!%p212_p3)   ;;  %v1619_v21 = vld [vmem:[%s2107_s2 + $0xe8] sm:$0xff] (!%p212_p3)  }
   0xf   : > { %v1612_v14 = vld [vmem:[%s2107_s2 + $0x18] sm:$0xff] (!%p212_p3)   ;;  %v1616_v18 = vld [vmem:[%s2107_s2 + $0x20] sm:$0xff] (!%p212_p3)   ;;  %v1620_v22 = vld [vmem:[%s2107_s2 + $0x28] sm:$0xff] (!%p212_p3)  }
  0x10   : > { %1441 = vmatpush3.bf16.msra.mxu0 %v1604_v6  ;;  %v1613_v15 = vld [vmem:[%s2107_s2 + $0x98] sm:$0xff]   ;;  %s2122_s19 = smov (!%p247_p5, %s1696_s19), 1  ;;  %v1617_v19 = vld [vmem:[%s2107_s2 + $0xa0] sm:$0xff]   ;;  %v1621_v23 = vld [vmem:[%s2107_s2 + $0xa8] sm:$0xff]   ;;  %s2124_s18 = smov (!%p259_p6, %s1692_s18), 1 }
  0x11   : > { %1463 = vmatpush3.bf16.msra.mxu1 %v1605_v7  ;;  %1442 = vmatprep.subr.bf16.mxu0 %v1606_v8  ;;  %s1555_s10 = smul.u32 28, %s2122_s19  ;;  %v1622_v24 = vld [vmem:[%s2107_s2 + $0x70] sm:$0xff]   ;;  %v1626_v28 = vld [vmem:[%s2107_s2 + $0x78] sm:$0xff]   ;;  %v1630_v50 = vld [vmem:[%s2107_s2 + $0x140] sm:$0xff]  }
  0x12   : > { %1464 = vmatprep.subr.bf16.mxu1 %v1607_v9  ;;  %v1623_v25 = vld [vmem:[%s2107_s2 + $0xf0] sm:$0xff]   ;;  %v1627_v29 = vld [vmem:[%s2107_s2 + $0xf8] sm:$0xff]   ;;  %v1632_v59 = vld [vmem:[%s2107_s2 + $0x1c0] sm:$0xff]  }
  0x13   : > { %v1624_v26 = vld [vmem:[%s2107_s2 + $0x30] sm:$0xff]   ;;  %s251_s29 = scalar_lea.vmem %s2105_s0, %s1555_s10  ;;  %s256_s7 = scalar_lea.vmem %s2106_s1, %s1555_s10  ;;  %v1628_v30 = vld [vmem:[%s2107_s2 + $0x38] sm:$0xff]   ;;  %v1631_v4 = vld [vmem:[%s2107_s2 + $0x100] sm:$0xff]  }
  0x14   : > { %1443 = vmatpush3.bf16.msra.mxu0 %v1608_v10  ;;  %v1625_v27 = vld [vmem:[%s2107_s2 + $0xb0] sm:$0xff]   ;;  %s1878_s15 = scalar_lea.vmem %s251_s29, %s1431_s17  ;;  %s1880_s10 = scalar_lea.vmem %s256_s7, %s1431_s17  ;;  %v1629_v31 = vld [vmem:[%s2107_s2 + $0xb8] sm:$0xff]   ;;  %v1634_v7 = vld [vmem:[%s2107_s2 + $0x148] sm:$0xff]  }
  0x15   : > { %1465 = vmatpush3.bf16.msra.mxu1 %v1609_v11  ;;  %1444 = vmatprep.subr.bf16.mxu0 %v1610_v12  ;;  %v269_v32 = vld [vmem:[%s1878_s15] sm:$0xf]  ;;  %v1337_v33 = vld [vmem:[%s1878_s15 + $0x4] sm:$0xf]  ;;  %v1898_v40 = vld [vmem:[%s1878_s15 + $0x8] sm:$0xf] }
  0x16   : > { %1466 = vmatprep.subr.bf16.mxu1 %v1611_v13  ;;  %v283_v34 = vld [vmem:[%s1880_s10] sm:$0x7]  ;;  %v1892_v35 = vld [vmem:[%s1880_s10 + $0x4] sm:$0x7]  ;;  %v293_v36 = vrot.slane %v269_v32, 1  ;;  %v1894_v37 = vrot.slane %v1337_v33, 1 }
  0x17   : > { %v311_v38 = vrot.slane %v283_v34, 6  ;;  %v330_v39 = vrot.slane %v1892_v35, 4  ;;  %v1901_v41 = vld [vmem:[%s1880_s10 + $0x8] sm:$0x7]  ;;  %v314_v42 = vrot.slane %v1892_v35, 6  ;;  %v1353_v44 = vrot.slane %v283_v34, 7 }
  0x18   : > { %1445 = vmatpush3.bf16.msra.mxu0 %v1612_v14  ;;  %v312_v43 = vrot.slane %v293_v36, 6  ;;  %v348_v45 = vrot.slane %v1894_v37, 2  ;;  %v332_v46 = vrot.slane %v1898_v40, 4  ;;  %v350_v47 = vrot.slane %v1901_v41, 2  ;;  %v1633_v9 = vld [vmem:[%s2107_s2 + $0x180] sm:$0xff]   ;;  %v1635_v13 = vld [vmem:[%s2107_s2 + $0x108] sm:$0xff]  }
  0x19   : > { %1467 = vmatpush3.bf16.msra.mxu1 %v1613_v15  ;;  %1446 = vmatprep.subr.bf16.mxu0 %v1614_v16  ;;  %v369_v48 = vsel %vm365_vm0, %v1337_v33, %v314_v42  ;;  %v329_v49 = vrot.slane %v1337_v33, 4  ;;  %v1913_v52 = vrot.slane %v1898_v40, 1  ;;  %v347_v53 = vrot.slane %v1892_v35, 2  ;;  %v1636_v16 = vld [vmem:[%s2107_s2 + $0x1c8] sm:$0xff]   ;;  %s1331_s17 = sshll.u32 %s2122_s19, 1 }
  0x1a   : > { %1468 = vmatprep.subr.bf16.mxu1 %v1615_v17  ;;  %v367_v51 = vsel %vm365_vm0, %v283_v34, %v312_v43  ;;  %v366_v54 = vsel %vm365_vm0, %v269_v32, %v311_v38  ;;  %v379_v56 = vsel %vm375_vm1, %v369_v48, %v332_v46  ;;  %v304_v58 = vrot.slane %v1892_v35, 1  ;;  %v1638_v17 = vld [vmem:[%s2107_s2 + $0x150] sm:$0xff]   ;;  %v1648_v32 = vld [vmem:[%s2107_s2 + $0x1e0] sm:$0xff]   ;;  %v1650_v33 = vld [vmem:[%s2107_s2 + $0x168] sm:$0xff]   ;;  %s262_s28 = sadd.s32 %s1331_s17, %s2124_s18 }
  0x1b   : > { %v377_v55 = vsel %vm375_vm1, %v367_v51, %v330_v39  ;;  %v376_v57 = vsel %vm375_vm1, %v366_v54, %v329_v49  ;;  %v389_v61 = vsel %vm385_vm2, %v379_v56, %v350_v47  ;;  %v331_v63 = vrot.slane %v1894_v37, 4  ;;  %v1651_v38 = vld [vmem:[%s2107_s2 + $0x128] sm:$0xff]   ;;  %v1655_v46 = vld [vmem:[%s2107_s2 + $0x130] sm:$0xff]   ;;  %v1658_v51 = vld [vmem:[%s2107_s2 + $0x178] sm:$0xff]   ;;  %s1332_s29 = sshll.u32 %s262_s28, 1 }
  0x1c   : > { %1447 = vmatpush3.bf16.msra.mxu0 %v1616_v18  ;;  %v387_v60 = vsel %vm385_vm2, %v377_v55, %v348_v45  ;;  %v386_v62 = vsel %vm385_vm2, %v376_v57, %v347_v53  ;;  %v398_v1 = vpack.c.bf16 %v389_v61, %v389_v61  ;;  %v316_v3 = vrot.slane %v304_v58, 6  ;;  %v1652_v39 = vld [vmem:[%s2107_s2 + $0x1e8] sm:$0xff]   ;;  %v1659_v53 = vld [vmem:[%s2107_s2 + $0x138] sm:$0xff]   ;;  %s264_s7 = scalar_lea.vmem %s2110_s5, %s1332_s29 }
  0x1d   : > { %1469 = vmatpush3.bf16.msra.mxu1 %v1617_v19  ;;  %1448 = vmatprep.subr.bf16.mxu0 %v1618_v20  ;;  %v396_v0 = vpack.c.bf16 %v387_v60, %v387_v60  ;;  %v395_v2 = vpack.c.bf16 %v386_v62, %v386_v62  ;;  %v349_v5 = vrot.slane %v304_v58, 2  ;;  %v368_v6 = vsel %vm365_vm0, %v293_v36, %v1353_v44  ;;  %v1637_v20 = vld [vmem:[%s2107_s2 + $0x188] sm:$0xff]   ;;  %v1649_v36 = vld [vmem:[%s2107_s2 + $0x1a0] sm:$0xff]   ;;  %v1660_v55 = vld [vmem:[%s2107_s2 + $0x1f8] sm:$0xff]  }
  0x1e   : > { %1470 = vmatprep.subr.bf16.mxu1 %v1619_v21  ;;  %1052 = vmatprep.mubr.bf16.mxu1 %v398_v1  ;;  %v378_v8 = vsel %vm375_vm1, %v368_v6, %v331_v63  ;;  %v306_v10 = vrot.slane %v1901_v41, 1  ;;  %v371_v11 = vsel %vm365_vm0, %v1894_v37, %v316_v3  ;;  %v334_v14 = vrot.slane %v1913_v52, 4  ;;  %v1639_v21 = vld [vmem:[%s2107_s2 + $0x110] sm:$0xff]   ;;  %v1653_v45 = vld [vmem:[%s2107_s2 + $0x1a8] sm:$0xff]   ;;  %v1662_v6 = vld [vmem:[%s2107_s2 + $0x200] sm:$0xff]  }
  0x1f   : > { %1012 = vmatprep.mubr.bf16.mxu0 %v396_v0  ;;  %v388_v12 = vsel %vm385_vm2, %v378_v8, %v349_v5  ;;  %v315_v34 = vrot.slane %v1894_v37, 6  ;;  %v333_v42 = vrot.slane %v1901_v41, 4  ;;  %v1654_v37 = vld [vmem:[%s2107_s2 + $0x170] sm:$0xff]   ;;  %v317_v44 = vrot.slane %v1901_v41, 6  ;;  %v1343_v58 = vld [vmem:[%s1878_s15 + $0xc] sm:$0xf] }
  0x20   : > { %1449 = vmatpush3.bf16.msra.mxu0 %v1620_v22  ;;  %v397_v15 = vpack.c.bf16 %v388_v12, %v388_v12  ;;  %v352_v18 = vrot.slane %v306_v10, 2  ;;  %v381_v19 = vsel %vm375_vm1, %v371_v11, %v334_v14  ;;  %v351_v47 = vrot.slane %v1913_v52, 2  ;;  %v1661_v0 = vld [vmem:[%s2107_s2 + $0x1b8] sm:$0xff]   ;;  %v1663_v14 = vld [vmem:[%s2107_s2 + $0x208] sm:$0xff]  }
  0x21   : > { %1471 = vmatpush3.bf16.msra.mxu1 %v1621_v23  ;;  %1450 = vmatprep.subr.bf16.mxu0 %v1622_v24  ;;  %v1640_v23 = vld [vmem:[%s2107_s2 + $0x1d0] sm:$0xff]   ;;  %v370_v43 = vsel %vm365_vm0, %v1892_v35, %v315_v34  ;;  %v318_v49 = vrot.slane %v1913_v52, 6  ;;  %v319_v54 = vrot.slane %v306_v10, 6  ;;  %v372_v57 = vsel %vm365_vm0, %v1898_v40, %v317_v44 }
  0x22   : > { %1472 = vmatprep.subr.bf16.mxu1 %v1623_v25  ;;  %v391_v22 = vsel %vm385_vm2, %v381_v19, %v352_v18  ;;  %v1642_v25 = vld [vmem:[%s2107_s2 + $0x158] sm:$0xff]   ;;  %v1656_v35 = vld [vmem:[%s2107_s2 + $0x1f0] sm:$0xff]   ;;  %v380_v48 = vsel %vm375_vm1, %v370_v43, %v333_v42  ;;  %v308_v61 = vrot.slane %v1343_v58, 1  ;;  %v335_v62 = vrot.slane %v1343_v58, 4  ;;  %v1667_v18 = vld [vmem:[%s2107_s2 + $0x228] sm:$0xff]  }
  0x23   : > { %v400_v24 = vpack.c.bf16 %v391_v22, %v391_v22  ;;  %v390_v56 = vsel %vm385_vm2, %v380_v48, %v351_v47  ;;  %v373_v60 = vsel %vm365_vm0, %v1901_v41, %v318_v49  ;;  %v374_v40 = vsel %vm365_vm0, %v1913_v52, %v319_v54  ;;  %v1668_v19 = vld [vmem:[%s2107_s2 + $0x230] sm:$0xff]  }
  0x24   : > { %1451 = vmatpush3.bf16.msra.mxu0 %v1624_v26  ;;  %v1641_v26 = vld [vmem:[%s2107_s2 + $0x190] sm:$0xff]   ;;  %v399_v1 = vpack.c.bf16 %v390_v56, %v390_v56  ;;  %v337_v3 = vrot.slane %v308_v61, 4  ;;  %v382_v41 = vsel %vm375_vm1, %v372_v57, %v335_v62 }
  0x25   : > { %1473 = vmatpush3.bf16.msra.mxu1 %v1625_v27  ;;  %1452 = vmatprep.subr.bf16.mxu0 %v1626_v28  ;;  %v1643_v27 = vld [vmem:[%s2107_s2 + $0x118] sm:$0xff]  }
  0x26   : > { %1474 = vmatprep.subr.bf16.mxu1 %v1627_v29  ;;  %v1644_v28 = vld [vmem:[%s2107_s2 + $0x1d8] sm:$0xff]   ;;  %v1646_v29 = vld [vmem:[%s2107_s2 + $0x160] sm:$0xff]   ;;  %v384_v10 = vsel %vm375_vm1, %v374_v40, %v337_v3 }
  0x28   : > { %1453 = vmatpush3.bf16.msra.mxu0 %v1628_v30  ;;  %v1645_v30 = vld [vmem:[%s2107_s2 + $0x198] sm:$0xff]  }
  0x29   : > { %1475 = vmatpush3.bf16.msra.mxu1 %v1629_v31  ;;  %1482 = vmatprep.subr.bf16.mxu0 %v1630_v50  ;;  %v1647_v31 = vld [vmem:[%s2107_s2 + $0x120] sm:$0xff]   ;;  %v1657_v50 = vld [vmem:[%s2107_s2 + $0x1b0] sm:$0xff]  }
  0x2a   : > { %1504 = vmatprep.subr.bf16.mxu1 %v1632_v59  ;;  %v1352_v59 = vld [vmem:[%s1880_s10 + $0xc] sm:$0x7] }
  0x2b   : > { %1013 = vmatmul.mubr.bf16.vlgmr.msra.gmra.mrb[0].mxu0 %v395_v2  ;;  %v336_v63 = vrot.slane %v1352_v59, 4  ;;  %v353_v2 = vrot.slane %v1352_v59, 2  ;;  %v1354_v8 = vrot.slane %v1352_v59, 3 }
  0x2c   : > { %1483 = vmatpush3.bf16.msra.mxu0 %v1631_v4  ;;  %1053 = vmatmul.mubr.bf16.vlgmr.msra.gmra.mrb[0].mxu1 %v397_v15  ;;  %v354_v4 = vrot.slane %v308_v61, 2  ;;  %v1664_v15 = vld [vmem:[%s2107_s2 + $0x210] sm:$0xff]  }
  0x2d   : > { %1484 = vmatprep.subr.bf16.mxu0 %v1634_v7  ;;  %1505 = vmatpush3.bf16.msra.mxu1 %v1633_v9  ;;  %v383_v5 = vsel %vm375_vm1, %v373_v60, %v336_v63  ;;  %v392_v7 = vsel %vm385_vm2, %v382_v41, %v353_v2  ;;  %v1710_v9 = vmov 0.0  }
  0x2e   : > { %1506 = vmatprep.subr.bf16.mxu1 %v1636_v16  ;;  %1092 = vmatprep.mubr.bf16.mxu0 %v400_v24  ;;  %v393_v52 = vsel %vm385_vm2, %v383_v5, %v354_v4  ;;  %v401_v12 = vpack.c.bf16 %v392_v7, %v392_v7  ;;  %v1665_v16 = vld [vmem:[%s2107_s2 + $0x218] sm:$0xff]  }
  0x2f   : > { %v402_v11 = vpack.c.bf16 %v393_v52, %v393_v52 }
  0x30   : > { %1485 = vmatpush3.bf16.msra.mxu0 %v1635_v13  ;;  %v394_v13 = vsel %vm385_vm2, %v384_v10, %v1354_v8 }
  0x31   : > { %1486 = vmatprep.subr.bf16.mxu0 %v1638_v17  ;;  %1507 = vmatpush3.bf16.msra.mxu1 %v1637_v20  ;;  %v1666_v17 = vld [vmem:[%s2107_s2 + $0x220] sm:$0xff]   ;;  %v1669_v20 = vld [vmem:[%s2107_s2 + $0x238] sm:$0xff]  }
  0x32   : > { %1508 = vmatprep.subr.bf16.mxu1 %v1640_v23  ;;  %1132 = vmatprep.mubr.bf16.mxu1 %v402_v11 }
  0x34   : > { %1487 = vmatpush3.bf16.msra.mxu0 %v1639_v21  ;;  %v403_v21 = vpack.c.bf16 %v394_v13, %v394_v13 }
  0x35   : > { %1488 = vmatprep.subr.bf16.mxu0 %v1642_v25  ;;  %1509 = vmatpush3.bf16.msra.mxu1 %v1641_v26 }
  0x36   : > { %1510 = vmatprep.subr.bf16.mxu1 %v1644_v28 }
  0x38   : > { %1489 = vmatpush3.bf16.msra.mxu0 %v1643_v27 }
  0x39   : > { %1490 = vmatprep.subr.bf16.mxu0 %v1646_v29  ;;  %1511 = vmatpush3.bf16.msra.mxu1 %v1645_v30 }
  0x3a   : > { %1512 = vmatprep.subr.bf16.mxu1 %v1648_v32 }
  0x3c   : > { %1491 = vmatpush3.bf16.msra.mxu0 %v1647_v31 }
  0x3d   : > { %1492 = vmatprep.subr.bf16.mxu0 %v1650_v33  ;;  %1513 = vmatpush3.bf16.msra.mxu1 %v1649_v36 }
  0x3e   : > { %1514 = vmatprep.subr.bf16.mxu1 %v1652_v39 }
  0x40   : > { %1493 = vmatpush3.bf16.msra.mxu0 %v1651_v38 }
  0x41   : > { %1494 = vmatprep.subr.bf16.mxu0 %v1654_v37  ;;  %1515 = vmatpush3.bf16.msra.mxu1 %v1653_v45 }
  0x42   : > { %1516 = vmatprep.subr.bf16.mxu1 %v1656_v35  ;;  %v1427_v35 = vld [vmem:[%s2108_s3] ss:$0 sm:$0xff] }
  0x44   : > { %1495 = vmatpush3.bf16.msra.mxu0 %v1655_v46 }
  0x45   : > { %1496 = vmatprep.subr.bf16.mxu0 %v1658_v51  ;;  %1517 = vmatpush3.bf16.msra.mxu1 %v1657_v50  ;;  %v1428_v51 = vld [vmem:[%s2109_s4] ss:$0 sm:$0xff] }
  0x46   : > { %1518 = vmatprep.subr.bf16.mxu1 %v1660_v55 }
  0x48   : > { %1497 = vmatpush3.bf16.msra.mxu0 %v1659_v53 }
  0x49   : > { %1535 = vmatprep.subr.bf16.mxu0 %v1710_v9  ;;  %1519 = vmatpush3.bf16.msra.mxu1 %v1661_v0 }
  0x4b   : > { %1093 = vmatmul.mubr.bf16.vlgmr.msra.gmra.mrb[4].mxu0 %v399_v1 }
  0x4c   : > { %1536 = vmatpush3.bf16.msra.mxu0 %v1662_v6  ;;  %1551 = vmatprep.mubr.msk.bf16.mxu0 %vm1711_vm3, %v1710_v9 }
  0x4d   : > { %1537 = vmatprep.subr.bf16.mxu0 %v1710_v9  ;;  %1133 = vmatmul.mubr.bf16.vlgmr.msra.gmra.mrb[4].mxu1 %v401_v12 }
  0x50   : > { %1538 = vmatpush3.bf16.msra.mxu0 %v1663_v14 }
  0x51   : > { %1539 = vmatprep.subr.bf16.mxu0 %v1710_v9 }
  0x54   : > { %1540 = vmatpush3.bf16.msra.mxu0 %v1664_v15 }
  0x55   : > { %1541 = vmatprep.subr.bf16.mxu0 %v1710_v9 }
  0x58   : > { %1542 = vmatpush3.bf16.msra.mxu0 %v1665_v16 }
  0x59   : > { %1543 = vmatprep.subr.bf16.mxu0 %v1710_v9 }
  0x5c   : > { %1544 = vmatpush3.bf16.msra.mxu0 %v1666_v17 }
  0x5d   : > { %1545 = vmatprep.subr.bf16.mxu0 %v1710_v9 }
  0x60   : > { %1546 = vmatpush3.bf16.msra.mxu0 %v1667_v18 }
  0x61   : > { %1547 = vmatprep.subr.bf16.mxu0 %v1710_v9 }
  0x64   : > { %1548 = vmatpush3.bf16.msra.mxu0 %v1668_v19 }
  0x65   : > { %1549 = vmatprep.subr.bf16.mxu0 %v1710_v9 }
  0x68   : > { %1550 = vmatpush3.bf16.msra.mxu0 %v1669_v20 }
  0x6b   : > { %1552 = vmatmul.mubr.bf16.vlgmr.msra.gmra.mrb[8].mxu0 %v403_v21 }
  0xfe   : > { %v1454_v22 = vpop.f32.mrb[0].mxu0 }
  0xff   : > { %v1455_v23 = vpop.f32.mrb[1].mxu0  ;;  %v1476_v26 = vpop.f32.mrb[0].mxu1 }
 0x100   : > { %v1456_v24 = vadd.f32 %v1455_v23, %v1454_v22  ;;  %v1457_v25 = vpop.f32.mrb[2].mxu0  ;;  %v1477_v28 = vpop.f32.mrb[1].mxu1 }
 0x101   : > { %v1458_v27 = vpop.f32.mrb[3].mxu0  ;;  %v1478_v29 = vadd.f32 %v1477_v28, %v1476_v26  ;;  %v1479_v30 = vpop.f32.mrb[2].mxu1 }
 0x102   : > { %v1480_v31 = vpop.f32.mrb[3].mxu1 }
 0x103   : > { %v1055_v32 = vadd.f32 %v1478_v29, %v1456_v24 }
 0x11e   : > { %v1498_v33 = vpop.f32.mrb[4].mxu0 }
 0x11f   : > { %v1499_v34 = vpop.f32.mrb[5].mxu0 }
 0x120   : > { %v1500_v36 = vadd.f32 %v1499_v34, %v1498_v33  ;;  %v1501_v38 = vpop.f32.mrb[6].mxu0  ;;  %v1520_v39 = vpop.f32.mrb[4].mxu1 }
 0x121   : > { %v1502_v42 = vpop.f32.mrb[7].mxu0  ;;  %v1521_v43 = vpop.f32.mrb[5].mxu1 }
 0x122   : > { %v1095_v37 = vadd.f32 %v1500_v36, %v1055_v32  ;;  %v1522_v44 = vadd.f32 %v1521_v43, %v1520_v39  ;;  %v1523_v45 = vpop.f32.mrb[6].mxu1 }
 0x123   : > { %v1524_v46 = vpop.f32.mrb[7].mxu1 }
 0x124   : > { %v1135_v47 = vadd.f32 %v1522_v44, %v1095_v37 }
 0x13e   : > { %v1174_v48 = vpop.f32.mrb[8].mxu0 }
 0x13f   : > { %v1175_v49 = vadd.f32 %v1174_v48, %v1135_v47  ;;  %v1553_v50 = vpop.f32.mrb[9].mxu0 }
 0x140   : > { %v1177_v53 = vpop.f32.mrb[10].mxu0 }
 0x141   : > { %v1186_v54 = vmul.f32 %v1427_v35, %v1175_v49  ;;  %v1554_v55 = vpop.f32.mrb[11].mxu0 }
 0x143   : > { %v1193_v56 = vadd.f32 %v1428_v51, %v1186_v54 }
 0x145   : > { %v1194_v57 = vmax.f32 %v1193_v56, 0.0 }
 0x147   : > { %v1196_v58 = vrot.slane %v1194_v57, 2 }
 0x149   : > { %v1198_v59 = vmax.f32 %v1194_v57, %v1196_v58 }
 0x14b   : > { %v1200_v60 = vrot.slane %v1198_v59, 4 }
 0x14d   : > { %v1202_v61 = vmax.f32 %v1198_v59, %v1200_v60 }
 0x14f   : > { %1203 = vst [vmem:[%s264_s7] sm:$0x3] %v1202_v61 }
 0x150 PF: > { %s15_s22 = sadd.s32 1, %s1708_s22   ;;  %s2111_s18 = smov %s1700_s20 }
 0x151   : > { %p12_p7 = scmp.ge.s32.totalorder %s15_s22, 6   ;;  %s2112_s19 = smov %s1704_s21 }
 0x152   : > { %s2113_s20 = smov %s2116_s23  ;;  %s2114_s21 = smov %s2120_s24 }
 0x153   :  { %14 = sbr.rel (!%p12_p7) target bundleno = 3 (0x3), region = 81 }

// kernel: forward.7
= control target key start
LH: loop header
LB: loop body
LE: loop exit
PB: predicated region body
PF: predicated region fallthrough
CT: control target
= control target key end

     0   :  { %v985_v36 = vmov 1983009808   ;;  %v28_v38 = vlaneseq  ;;  %s1286_s0 = inlined_call_operand.vmem [shape: f32[2,512], index: 0, kind: input, shape index: {}]   ;;  %s1287_s1 = inlined_call_operand.vmem [shape: bf16[512,256], index: 1, kind: input, shape index: {}]   ;;  %s1288_s2 = inlined_call_operand.vmem [shape: f32[1,256], index: 2, kind: input, shape index: {}]   ;;  %s1289_s3 = inlined_call_operand.vmem [shape: bf16[256,10], index: 3, kind: input, shape index: {}]   ;;  %s1290_s4 = inlined_call_operand.vmem [shape: f32[1,10], index: 4, kind: input, shape index: {}]   ;;  %s1291_s5 = inlined_call_operand.hbm [shape: f32[2,10], index: 5, kind: output, shape index: {}]  }
   0x1   :  { %v844_v0 = vld [vmem:[%s1287_s1 + $0x4] ss:$8 sps:$4 sm:$0xff]   ;;  %v848_v2 = vld [vmem:[%s1287_s1] ss:$8 sps:$4 sm:$0xff]   ;;  %v850_v4 = vld [vmem:[%s1287_s1 + $0x14] ss:$8 sps:$4 sm:$0xff]   ;;  %v26_v37 = vunpack.c.l.s4 %v985_v36 }
   0x2   :  { %v846_v1 = vld [vmem:[%s1287_s1 + $0x104] ss:$8 sps:$4 sm:$0xff]   ;;  %445 = vmatprep.subr.bf16.mxu1 %v844_v0  ;;  %v849_v3 = vld [vmem:[%s1287_s1 + $0x100] ss:$8 sps:$4 sm:$0xff]   ;;  %v852_v5 = vld [vmem:[%s1287_s1 + $0x114] ss:$8 sps:$4 sm:$0xff]  }
   0x3   :  { %486 = vmatprep.subr.bf16.mxu0 %v846_v1  ;;  %446 = vmatpush1.bf16.msra.mxu1 %v848_v2  ;;  %v854_v6 = vld [vmem:[%s1287_s1 + $0x10] ss:$8 sps:$4 sm:$0xff]   ;;  %v856_v8 = vld [vmem:[%s1287_s1 + $0x24] ss:$8 sps:$4 sm:$0xff]   ;;  %v860_v10 = vld [vmem:[%s1287_s1 + $0x20] ss:$8 sps:$4 sm:$0xff]   ;;  %v27_v42 = vunpack.c.0.s8 %v26_v37 }
   0x4   :  { %487 = vmatpush1.bf16.msra.mxu0 %v849_v3  ;;  %447 = vmatprep.subr.bf16.mxu1 %v850_v4  ;;  %v855_v7 = vld [vmem:[%s1287_s1 + $0x110] ss:$8 sps:$4 sm:$0xff]   ;;  %v858_v9 = vld [vmem:[%s1287_s1 + $0x124] ss:$8 sps:$4 sm:$0xff]   ;;  %v861_v11 = vld [vmem:[%s1287_s1 + $0x120] ss:$8 sps:$4 sm:$0xff]  }
   0x5   :  { %488 = vmatprep.subr.bf16.mxu0 %v852_v5  ;;  %v862_v12 = vld [vmem:[%s1287_s1 + $0x34] ss:$8 sps:$4 sm:$0xff]   ;;  %v866_v14 = vld [vmem:[%s1287_s1 + $0x30] ss:$8 sps:$4 sm:$0xff]   ;;  %v868_v16 = vld [vmem:[%s1287_s1 + $0x44] ss:$8 sps:$4 sm:$0xff]  }
   0x6   :  { %v864_v13 = vld [vmem:[%s1287_s1 + $0x134] ss:$8 sps:$4 sm:$0xff]   ;;  %v867_v15 = vld [vmem:[%s1287_s1 + $0x130] ss:$8 sps:$4 sm:$0xff]   ;;  %v870_v17 = vld [vmem:[%s1287_s1 + $0x144] ss:$8 sps:$4 sm:$0xff]  }
   0x7   :  { %448 = vmatpush1.bf16.msra.mxu1 %v854_v6  ;;  %v872_v18 = vld [vmem:[%s1287_s1 + $0x40] ss:$8 sps:$4 sm:$0xff]   ;;  %v874_v20 = vld [vmem:[%s1287_s1 + $0x54] ss:$8 sps:$4 sm:$0xff]   ;;  %v878_v22 = vld [vmem:[%s1287_s1 + $0x50] ss:$8 sps:$4 sm:$0xff]  }
   0x8   :  { %489 = vmatpush1.bf16.msra.mxu0 %v855_v7  ;;  %449 = vmatprep.subr.bf16.mxu1 %v856_v8  ;;  %v873_v19 = vld [vmem:[%s1287_s1 + $0x140] ss:$8 sps:$4 sm:$0xff]   ;;  %v876_v21 = vld [vmem:[%s1287_s1 + $0x154] ss:$8 sps:$4 sm:$0xff]   ;;  %v879_v23 = vld [vmem:[%s1287_s1 + $0x150] ss:$8 sps:$4 sm:$0xff]  }
   0x9   :  { %490 = vmatprep.subr.bf16.mxu0 %v858_v9  ;;  %v880_v24 = vld [vmem:[%s1287_s1 + $0x64] ss:$8 sps:$4 sm:$0xff]   ;;  %v884_v26 = vld [vmem:[%s1287_s1 + $0x60] ss:$8 sps:$4 sm:$0xff]   ;;  %v886_v28 = vld [vmem:[%s1287_s1 + $0x74] ss:$8 sps:$4 sm:$0xff]  }
   0xa   :  { %v882_v25 = vld [vmem:[%s1287_s1 + $0x164] ss:$8 sps:$4 sm:$0xff]   ;;  %v885_v27 = vld [vmem:[%s1287_s1 + $0x160] ss:$8 sps:$4 sm:$0xff]   ;;  %v888_v29 = vld [vmem:[%s1287_s1 + $0x174] ss:$8 sps:$4 sm:$0xff]  }
   0xb   :  { %450 = vmatpush1.bf16.msra.mxu1 %v860_v10  ;;  %v890_v30 = vld [vmem:[%s1287_s1 + $0x70] ss:$8 sps:$4 sm:$0xff]   ;;  %v892_v32 = vld [vmem:[%s1287_s1 + $0x84] ss:$8 sps:$4 sm:$0xff]   ;;  %v896_v34 = vld [vmem:[%s1287_s1 + $0x80] ss:$8 sps:$4 sm:$0xff]  }
   0xc   :  { %491 = vmatpush1.bf16.msra.mxu0 %v861_v11  ;;  %451 = vmatprep.subr.bf16.mxu1 %v862_v12  ;;  %v891_v31 = vld [vmem:[%s1287_s1 + $0x170] ss:$8 sps:$4 sm:$0xff]   ;;  %v894_v33 = vld [vmem:[%s1287_s1 + $0x184] ss:$8 sps:$4 sm:$0xff]   ;;  %v897_v35 = vld [vmem:[%s1287_s1 + $0x180] ss:$8 sps:$4 sm:$0xff]  }
   0xd   :  { %492 = vmatprep.subr.bf16.mxu0 %v864_v13  ;;  %v898_v39 = vld [vmem:[%s1287_s1 + $0x94] ss:$8 sps:$4 sm:$0xff]   ;;  %v902_v41 = vld [vmem:[%s1287_s1 + $0x90] ss:$8 sps:$4 sm:$0xff]   ;;  %v1134_v43 = vshrl.u32 %v28_v38, 7  ;;  %v22_v53 = vld [vmem:[%s1286_s0] sm:$0xff] }
   0xe   :  { %v900_v40 = vld [vmem:[%s1287_s1 + $0x194] ss:$8 sps:$4 sm:$0xff]   ;;  %v903_v44 = vld [vmem:[%s1287_s1 + $0x190] ss:$8 sps:$4 sm:$0xff]   ;;  %v904_v45 = vld [vmem:[%s1287_s1 + $0xa4] ss:$8 sps:$4 sm:$0xff]   ;;  %v24_v56 = vcombine.high %v22_v53, %v22_v53 }
   0xf   :  { %452 = vmatpush1.bf16.msra.mxu1 %v866_v14  ;;  %v906_v46 = vld [vmem:[%s1287_s1 + $0x1a4] ss:$8 sps:$4 sm:$0xff]   ;;  %v908_v47 = vld [vmem:[%s1287_s1 + $0xa0] ss:$8 sps:$4 sm:$0xff]   ;;  %v30_v49 = vsub.s32 %v27_v42, %v1134_v43  ;;  %v910_v50 = vld [vmem:[%s1287_s1 + $0xb4] ss:$8 sps:$4 sm:$0xff]  }
  0x10   :  { %493 = vmatpush1.bf16.msra.mxu0 %v867_v15  ;;  %453 = vmatprep.subr.bf16.mxu1 %v868_v16  ;;  %v909_v48 = vld [vmem:[%s1287_s1 + $0x1a0] ss:$8 sps:$4 sm:$0xff]   ;;  %v912_v51 = vld [vmem:[%s1287_s1 + $0x1b4] ss:$8 sps:$4 sm:$0xff]   ;;  %v914_v52 = vld [vmem:[%s1287_s1 + $0xb0] ss:$8 sps:$4 sm:$0xff]  }
  0x11   :  { %494 = vmatprep.subr.bf16.mxu0 %v870_v17  ;;  %v915_v54 = vld [vmem:[%s1287_s1 + $0x1b0] ss:$8 sps:$4 sm:$0xff]   ;;  %v31_v55 = vrot.slane %v22_v53, %v30_v49  ;;  %v916_v57 = vld [vmem:[%s1287_s1 + $0xc4] ss:$8 sps:$4 sm:$0xff]   ;;  %v38_v60 = vrot.slane %v24_v56, %v30_v49  ;;  %v920_v61 = vld [vmem:[%s1287_s1 + $0xc0] ss:$8 sps:$4 sm:$0xff]  }
  0x12   :  { %v918_v58 = vld [vmem:[%s1287_s1 + $0x1c4] ss:$8 sps:$4 sm:$0xff]   ;;  %v921_v62 = vld [vmem:[%s1287_s1 + $0x1c0] ss:$8 sps:$4 sm:$0xff]   ;;  %v922_v1 = vld [vmem:[%s1287_s1 + $0xd4] ss:$8 sps:$4 sm:$0xff]  }
  0x13   :  { %454 = vmatpush1.bf16.msra.mxu1 %v872_v18  ;;  %v39_v59 = vcombine.high %v31_v55, %v31_v55  ;;  %v40_v0 = vcombine.high %v38_v60, %v38_v60  ;;  %v924_v2 = vld [vmem:[%s1287_s1 + $0x1d4] ss:$8 sps:$4 sm:$0xff]   ;;  %v926_v4 = vld [vmem:[%s1287_s1 + $0xd0] ss:$8 sps:$4 sm:$0xff]   ;;  %v928_v6 = vld [vmem:[%s1287_s1 + $0xe4] ss:$8 sps:$4 sm:$0xff]  }
  0x14   :  { %495 = vmatpush1.bf16.msra.mxu0 %v873_v19  ;;  %455 = vmatprep.subr.bf16.mxu1 %v874_v20  ;;  %v927_v5 = vld [vmem:[%s1287_s1 + $0x1d0] ss:$8 sps:$4 sm:$0xff]   ;;  %v930_v7 = vld [vmem:[%s1287_s1 + $0x1e4] ss:$8 sps:$4 sm:$0xff]   ;;  %v932_v8 = vld [vmem:[%s1287_s1 + $0xe0] ss:$8 sps:$4 sm:$0xff]  }
  0x15   :  { %496 = vmatprep.subr.bf16.mxu0 %v876_v21  ;;  %v46_v63 = vpack.c.bf16 %v39_v59, %v39_v59  ;;  %v48_v3 = vpack.c.bf16 %v40_v0, %v40_v0  ;;  %v933_v9 = vld [vmem:[%s1287_s1 + $0x1e0] ss:$8 sps:$4 sm:$0xff]   ;;  %v934_v10 = vld [vmem:[%s1287_s1 + $0xf4] ss:$8 sps:$4 sm:$0xff]  }
  0x16   :  { %v936_v11 = vld [vmem:[%s1287_s1 + $0x1f4] ss:$8 sps:$4 sm:$0xff]  }
  0x17   :  { %456 = vmatpush1.bf16.msra.mxu1 %v878_v22  ;;  %477 = vmatprep.mubr.bf16.mxu1 %v46_v63 }
  0x18   :  { %497 = vmatpush1.bf16.msra.mxu0 %v879_v23  ;;  %457 = vmatprep.subr.bf16.mxu1 %v880_v24 }
  0x19   :  { %498 = vmatprep.subr.bf16.mxu0 %v882_v25  ;;  %518 = vmatprep.mubr.bf16.mxu0 %v48_v3 }
  0x1b   :  { %458 = vmatpush1.bf16.msra.mxu1 %v884_v26 }
  0x1c   :  { %499 = vmatpush1.bf16.msra.mxu0 %v885_v27  ;;  %459 = vmatprep.subr.bf16.mxu1 %v886_v28 }
  0x1d   :  { %500 = vmatprep.subr.bf16.mxu0 %v888_v29 }
  0x1f   :  { %460 = vmatpush1.bf16.msra.mxu1 %v890_v30 }
  0x20   :  { %501 = vmatpush1.bf16.msra.mxu0 %v891_v31  ;;  %461 = vmatprep.subr.bf16.mxu1 %v892_v32 }
  0x21   :  { %502 = vmatprep.subr.bf16.mxu0 %v894_v33 }
  0x23   :  { %462 = vmatpush1.bf16.msra.mxu1 %v896_v34 }
  0x24   :  { %503 = vmatpush1.bf16.msra.mxu0 %v897_v35  ;;  %463 = vmatprep.subr.bf16.mxu1 %v898_v39 }
  0x25   :  { %504 = vmatprep.subr.bf16.mxu0 %v900_v40 }
  0x27   :  { %464 = vmatpush1.bf16.msra.mxu1 %v902_v41 }
  0x28   :  { %505 = vmatpush1.bf16.msra.mxu0 %v903_v44  ;;  %465 = vmatprep.subr.bf16.mxu1 %v904_v45 }
  0x29   :  { %506 = vmatprep.subr.bf16.mxu0 %v906_v46 }
  0x2b   :  { %466 = vmatpush1.bf16.msra.mxu1 %v908_v47 }
  0x2c   :  { %507 = vmatpush1.bf16.msra.mxu0 %v909_v48  ;;  %467 = vmatprep.subr.bf16.mxu1 %v910_v50 }
  0x2d   :  { %508 = vmatprep.subr.bf16.mxu0 %v912_v51 }
  0x2f   :  { %468 = vmatpush1.bf16.msra.mxu1 %v914_v52 }
  0x30   :  { %509 = vmatpush1.bf16.msra.mxu0 %v915_v54  ;;  %469 = vmatprep.subr.bf16.mxu1 %v916_v57 }
  0x31   :  { %510 = vmatprep.subr.bf16.mxu0 %v918_v58 }
  0x33   :  { %470 = vmatpush1.bf16.msra.mxu1 %v920_v61 }
  0x34   :  { %511 = vmatpush1.bf16.msra.mxu0 %v921_v62  ;;  %471 = vmatprep.subr.bf16.mxu1 %v922_v1 }
  0x35   :  { %512 = vmatprep.subr.bf16.mxu0 %v924_v2 }
  0x37   :  { %472 = vmatpush1.bf16.msra.mxu1 %v926_v4 }
  0x38   :  { %513 = vmatpush1.bf16.msra.mxu0 %v927_v5  ;;  %473 = vmatprep.subr.bf16.mxu1 %v928_v6 }
  0x39   :  { %514 = vmatprep.subr.bf16.mxu0 %v930_v7 }
  0x3a   :  { %10 = vsyncpa [#allocation3], 0  ;;  %v938_v12 = vld [vmem:[%s1287_s1 + $0xf0] ss:$8 sps:$4 sm:$0xff]   ;;  %v941_v14 = vld [vmem:[%s1289_s3 + $0x40] sm:$0xff]   ;;  %v45_v15 = vpack.c.bf16 %v31_v55, %v31_v55  ;;  %v47_v16 = vpack.c.bf16 %v38_v60, %v38_v60  ;;  %v117_v32 = vsub.s32 0, %v1134_v43 }
  0x3b   :  { %474 = vmatpush1.bf16.msra.mxu1 %v932_v8  ;;  %v939_v13 = vld [vmem:[%s1287_s1 + $0x1f0] ss:$8 sps:$4 sm:$0xff]   ;;  %v942_v17 = vld [vmem:[%s1289_s3] sm:$0xff]   ;;  %v943_v18 = vld [vmem:[%s1289_s3 + $0x48] sm:$0xff]   ;;  %v121_v34 = vsub.s32 1, %v1134_v43  ;;  %vm706_vm0 = vcmask 74752  }
  0x3c   :  { %515 = vmatpush1.bf16.msra.mxu0 %v933_v9  ;;  %475 = vmatprep.subr.bf16.mxu1 %v934_v10  ;;  %v944_v19 = vld [vmem:[%s1289_s3 + $0x8] sm:$0xff]   ;;  %v945_v20 = vld [vmem:[%s1289_s3 + $0x50] sm:$0xff]   ;;  %v947_v22 = vld [vmem:[%s1289_s3 + $0x58] sm:$0xff]  }
  0x3d   :  { %516 = vmatprep.subr.bf16.mxu0 %v936_v11  ;;  %v946_v21 = vld [vmem:[%s1289_s3 + $0x10] sm:$0xff]   ;;  %v948_v23 = vld [vmem:[%s1289_s3 + $0x18] sm:$0xff]   ;;  %v949_v24 = vld [vmem:[%s1289_s3 + $0x60] sm:$0xff]  }
  0x3e   :  { %v950_v25 = vld [vmem:[%s1289_s3 + $0x20] sm:$0xff]   ;;  %v951_v26 = vld [vmem:[%s1289_s3 + $0x68] sm:$0xff]   ;;  %v953_v28 = vld [vmem:[%s1289_s3 + $0x70] sm:$0xff]  }
  0x3f   :  { %476 = vmatpush1.bf16.msra.mxu1 %v938_v12  ;;  %v952_v27 = vld [vmem:[%s1289_s3 + $0x28] sm:$0xff]   ;;  %v954_v29 = vld [vmem:[%s1289_s3 + $0x30] sm:$0xff]   ;;  %v955_v30 = vld [vmem:[%s1289_s3 + $0x78] sm:$0xff]  }
  0x40   :  { %517 = vmatpush1.bf16.msra.mxu0 %v939_v13  ;;  %816 = vmatprep.subr.bf16.mxu1 %v941_v14  ;;  %v956_v31 = vld [vmem:[%s1289_s3 + $0x38] sm:$0xff]   ;;  %v113_v33 = vld [vmem:[%s1288_s2] sm:$0x3] }
  0x41   :  { %v118_v35 = vrot.slane %v113_v33, %v117_v32  ;;  %v122_v36 = vrot.slane %v113_v33, %v121_v34  ;;  %v799_v54 = vld [vmem:[%s1290_s4] ss:$0 sm:$0xff]  ;;  %s986_s4 = smov [#allocation2]  }
  0x42   :  { %478 = vmatmul.mubr.bf16.vlgmr.msra.gmra.mrb[0].mxu1 %v45_v15  ;;  %s727_s27 = sshll.u32 %s986_s4, 4  ;;  %s728_s27 = int_to_ptr.vmem [resolvable:$true] %s727_s27 }
  0x43   :  { %519 = vmatmul.mubr.bf16.vlgmr.msra.gmra.mrb[0].mxu0 %v47_v16  ;;  %817 = vmatpush3.bf16.msra.mxu1 %v942_v17  ;;  %s961_s28 = scalar_lea.vmem %s728_s27, 32  ;;  %p966_p1 = scmp.lt.s32.totalorder %s728_s27, %s728_s27 }
  0x44   :  { %818 = vmatprep.subr.bf16.mxu1 %v943_v18  ;;  %p962_p0 = scmp.ne.s32.totalorder %s728_s27, %s961_s28  ;;  %p967_p2 = scmp.lt.s32.totalorder %s961_s28, %s961_s28 }
  0x46   :  { %p968_p3 = por %p967_p2, %p966_p1 }
  0x47   :  { %819 = vmatpush3.bf16.msra.mxu1 %v944_v19 }
  0x48   :  { %820 = vmatprep.subr.bf16.mxu1 %v945_v20  ;;  %p969_p4 = pnand %p968_p3, %p962_p0 }
  0x4b   :  { %821 = vmatpush3.bf16.msra.mxu1 %v946_v21 }
  0x4c   :  { %822 = vmatprep.subr.bf16.mxu1 %v947_v22 }
  0x4f   :  { %823 = vmatpush3.bf16.msra.mxu1 %v948_v23 }
  0x50   :  { %824 = vmatprep.subr.bf16.mxu1 %v949_v24 }
  0x53   :  { %825 = vmatpush3.bf16.msra.mxu1 %v950_v25 }
  0x54   :  { %826 = vmatprep.subr.bf16.mxu1 %v951_v26 }
  0x57   :  { %827 = vmatpush3.bf16.msra.mxu1 %v952_v27 }
  0x58   :  { %828 = vmatprep.subr.bf16.mxu1 %v953_v28 }
  0x5b   :  { %829 = vmatpush3.bf16.msra.mxu1 %v954_v29 }
  0x5c   :  { %830 = vmatprep.subr.bf16.mxu1 %v955_v30 }
  0x5f   :  { %831 = vmatpush3.bf16.msra.mxu1 %v956_v31 }
 0x115   :  { %v479_v37 = vpop.f32.mrb[0].mxu1 }
 0x116   :  { %v520_v38 = vpop.f32.mrb[0].mxu0  ;;  %v480_v39 = vadd.f32 %v479_v37, %v118_v35  ;;  %v481_v40 = vpop.f32.mrb[1].mxu1 }
 0x117   :  { %v522_v41 = vpop.f32.mrb[1].mxu0  ;;  %v482_v42 = vadd.f32 %v481_v40, %v122_v36  ;;  %v483_v44 = vpop.f32.mrb[2].mxu1 }
 0x118   :  { %v524_v45 = vpop.f32.mrb[2].mxu0  ;;  %v521_v46 = vadd.f32 %v520_v38, %v480_v39  ;;  %v484_v47 = vpop.f32.mrb[3].mxu1 }
 0x119   :  { %v525_v48 = vpop.f32.mrb[3].mxu0  ;;  %v523_v49 = vadd.f32 %v522_v41, %v482_v42 }
 0x11a   :  { %v527_v50 = vmax.f32 %v521_v46, 0.0 }
 0x11b   :  { %v528_v51 = vmax.f32 %v523_v49, 0.0 }
 0x11c   :  { %v529_v53 = vpack.c.bf16 %v527_v50, %v527_v50 }
 0x11d   :  { %v530_v52 = vpack.c.bf16 %v528_v51, %v528_v51 }
 0x11f   :  { %698 = vmatprep.mubr.bf16.mxu1 %v530_v52 }
 0x120   :  { %699 = vmatmul.mubr.bf16.vlgmr.msra.gmra.mrb[4].mxu1 %v529_v53 }
 0x1f3   :  { %v832_v43 = vpop.f32.mrb[4].mxu1 }
 0x1f4   :  { %v833_v55 = vpop.f32.mrb[5].mxu1 }
 0x1f5   :  { %v834_v56 = vadd.f32 %v833_v55, %v832_v43  ;;  %v835_v57 = vpop.f32.mrb[6].mxu1 }
 0x1f6   :  { %v836_v58 = vpop.f32.mrb[7].mxu1 }
 0x1f7   :  { %v701_v59 = vadd.f32 %v834_v56, %v799_v54 }
 0x1f9   :  { %v707_v60 = vsel %vm706_vm0, %v701_v59, -inf }
 0x1fa   :  { %708 = vmax.xlane.f32.xlu0 %v707_v60 }
 0x287   :  { %v709_v61 = vpop.xlane.xlu0 %708 }
 0x288   :  { %v710_v62 = vsub.f32 %v701_v59, %v709_v61 }
 0x28a   :  { %v711_v63 = vmul.f32 1.442695, %v710_v62 }
 0x28c   :  { %957 = vpow2.f32 %v711_v63 }
 0x296   :  { %v958_v0 = vpop.eup %957 }
 0x297   :  { %v713_v1 = vsel %vm706_vm0, %v958_v0, 0.0 }
 0x298   :  { %714 = vadd.xlane.f32.xlu0 %v713_v1 }
 0x325   :  { %v715_v2 = vpop.xlane.xlu0 %714 }
 0x326   :  { %959 = vlog2.f32 %v715_v2 }
 0x330   :  { %v960_v3 = vpop.eup %959 }
 0x331   :  { %v717_v4 = vmul.f32 0.6931472, %v960_v3 }
 0x333   :  { %v718_v5 = vadd.f32 %v717_v4, %v709_v61 }
 0x335   :  { %v719_v6 = vsub.f32 %v701_v59, %v718_v5 }
 0x337   :  { %720 = vst.msk [vmem:[#allocation2] sm:$0x3] %vm706_vm0, %v719_v6 }
 0x338   :  { %972 = shalt.err (!%p969_p4)
}
 0x339   :  { %s973_s6 = scalar_lea.hbm %s1291_s5, 32 }
 0x33a   :  { %p974_p5 = scmp.ne.s32.totalorder %s1291_s5, %s973_s6  ;;  %p977_p6 = scmp.lt.u32.totalorder %s973_s6, %s1291_s5 }
 0x33c   :  { %p979_p7 = pnand %p977_p6, %p974_p5 }
 0x33e   :  { %982 = shalt.err (!%p979_p7)
}
 0x33f   :  { %730 = dma.vmem_to_hbm [thread:$0]  %s728_s27, 32, %s1291_s5, [#allocation3]  }
 0x340   :  { %983 = dma.done.wait [#allocation3], 32  }
 0x341   :  { %984 = vsyncadd [#allocation3], 4294967264 }
 0x342   :  { %734 = vsyncpa [#allocation3], 1 }

</bundles_post_ra>
